<compile_context>
chip_gen: v6e
topology: v6e:2x2x1
jax: 0.10.0
libtpu: 0.0.40
codegen_flags: <defaults>
</compile_context>

<pallas_src>
import functools
import math

import jax
import jax.numpy as jnp
from jax.experimental import pallas as pl
from jax.experimental.pallas import tpu as pltpu


# ----------------------------------------------------------------------------
# helpers
# ----------------------------------------------------------------------------
_VMEM_LIMIT = 32 * 1024 * 1024  # safe on v5e/v6e (128 MiB) and v7x (64 MiB)


def _pick_tile(dim, candidates):
    """Largest candidate that divides dim, else the full dim."""
    for c in candidates:
        if c <= dim and dim % c == 0:
            return c
    return dim


# ----------------------------------------------------------------------------
# Fused linear kernel:  out = act(norm(x) @ w + b) + residual
# ----------------------------------------------------------------------------
def _fused_linear_kernel(*refs, norm, has_bias, has_residual, activation, eps):
    it = iter(refs)
    x_ref = next(it)
    w_ref = next(it)
    nw_ref = next(it) if norm is not None else None
    nb_ref = next(it) if norm == "ln" else None
    b_ref = next(it) if has_bias else None
    r_ref = next(it) if has_residual else None
    o_ref = next(it)

    x = x_ref[...]                                           # (tm, K) f32
    if norm == "ln":
        mu = jnp.mean(x, axis=-1, keepdims=True)
        var = jnp.mean(jnp.square(x - mu), axis=-1, keepdims=True)
        x = (x - mu) * jax.lax.rsqrt(var + eps) * nw_ref[...] + nb_ref[...]
    elif norm == "rms":                                      # T5LayerNorm
        var = jnp.mean(jnp.square(x), axis=-1, keepdims=True)
        x = x * jax.lax.rsqrt(var + eps) * nw_ref[...]

    y = jnp.dot(x.astype(jnp.bfloat16), w_ref[...].astype(jnp.bfloat16),
                preferred_element_type=jnp.float32)          # MXU bf16 in / f32 acc
    if has_bias:
        y = y + b_ref[...]
    if activation == "quickgelu":                            # x * sigmoid(1.702x)
        y = y * jax.nn.sigmoid(1.702 * y)
    elif activation == "relu":
        y = jnp.maximum(y, 0.0)
    if has_residual:
        y = y + r_ref[...]
    o_ref[...] = y


def fused_linear(x, w, b=None, *, norm=None, norm_w=None, norm_b=None,
                 activation="none", residual=None, eps=1e-5):
    """out = act(norm(x) @ w + b) + residual.   x:(M,K), w:(K,N)."""
    x = x.astype(jnp.float32)
    w = w.astype(jnp.float32)
    M, K = x.shape
    _, N = w.shape
    tm = _pick_tile(M, (512, 256, 128, 64, 32, 16, 8))
    tn = _pick_tile(N, (1024, 512, 256, 128))                # lane-dense or full N
    grid = (M // tm, N // tn)

    in_specs = [pl.BlockSpec((tm, K), lambda i, j: (i, 0)),
                pl.BlockSpec((K, tn), lambda i, j: (0, j))]
    args = [x, w]
    if norm is not None:
        in_specs.append(pl.BlockSpec((1, K), lambda i, j: (0, 0)))
        args.append(norm_w.reshape(1, K).astype(jnp.float32))
        if norm == "ln":
            in_specs.append(pl.BlockSpec((1, K), lambda i, j: (0, 0)))
            args.append(norm_b.reshape(1, K).astype(jnp.float32))
    if b is not None:
        in_specs.append(pl.BlockSpec((1, tn), lambda i, j: (0, j)))
        args.append(b.reshape(1, N).astype(jnp.float32))
    if residual is not None:
        in_specs.append(pl.BlockSpec((tm, tn), lambda i, j: (i, j)))
        args.append(residual.astype(jnp.float32))

    kernel = functools.partial(
        _fused_linear_kernel, norm=norm, has_bias=b is not None,
        has_residual=residual is not None, activation=activation, eps=eps)
    return pl.pallas_call(
        kernel,
        out_shape=jax.ShapeDtypeStruct((M, N), jnp.float32),
        grid=grid,
        in_specs=in_specs,
        out_specs=pl.BlockSpec((tm, tn), lambda i, j: (i, j)),
        compiler_params=pltpu.CompilerParams(
            dimension_semantics=("parallel", "parallel"),
            vmem_limit_bytes=_VMEM_LIMIT),
    )(*args)


# ----------------------------------------------------------------------------
# Standalone LayerNorm (ln_pre / ln_final, where no matmul follows directly)
# ----------------------------------------------------------------------------
def _layernorm_kernel(x_ref, w_ref, b_ref, o_ref, *, eps):
    x = x_ref[...]
    mu = jnp.mean(x, axis=-1, keepdims=True)
    var = jnp.mean(jnp.square(x - mu), axis=-1, keepdims=True)
    o_ref[...] = (x - mu) * jax.lax.rsqrt(var + eps) * w_ref[...] + b_ref[...]


def layernorm(x, w, b, eps=1e-5):
    M, D = x.shape
    tm = _pick_tile(M, (1024, 512, 256, 128, 64, 32, 16, 8))
    return pl.pallas_call(
        functools.partial(_layernorm_kernel, eps=eps),
        out_shape=jax.ShapeDtypeStruct((M, D), jnp.float32),
        grid=(M // tm,),
        in_specs=[pl.BlockSpec((tm, D), lambda i: (i, 0)),
                  pl.BlockSpec((1, D), lambda i: (0, 0)),
                  pl.BlockSpec((1, D), lambda i: (0, 0))],
        out_specs=pl.BlockSpec((tm, D), lambda i: (i, 0)),
        compiler_params=pltpu.CompilerParams(
            dimension_semantics=("parallel",), vmem_limit_bytes=_VMEM_LIMIT),
    )(x.astype(jnp.float32), w.reshape(1, D).astype(jnp.float32),
      b.reshape(1, D).astype(jnp.float32))


# ----------------------------------------------------------------------------
# Multi-head attention: grid over batch, all heads in-kernel from fused QKV
# ----------------------------------------------------------------------------
def _attn_fused_kernel(*refs, heads, hd, scale, has_bias):
    if has_bias:
        qkv_ref, bias_ref, o_ref = refs
    else:
        qkv_ref, o_ref = refs
        bias_ref = None
    qkv = qkv_ref[0]                                         # (S, 3*inner) f32
    inner = heads * hd
    outs = []
    for h in range(heads):                                   # static unroll
        q = qkv[:, h * hd:(h + 1) * hd]
        k = qkv[:, inner + h * hd: inner + (h + 1) * hd]
        v = qkv[:, 2 * inner + h * hd: 2 * inner + (h + 1) * hd]
        s = jnp.dot(q.astype(jnp.bfloat16), k.astype(jnp.bfloat16).T,
                    preferred_element_type=jnp.float32) * scale
        if has_bias:
            hb = h if bias_ref.shape[0] > 1 else 0
            s = s + bias_ref[hb]
        m = jnp.max(s, axis=-1, keepdims=True)
        e = jnp.exp(s - m)
        p = e * pl.reciprocal(jnp.sum(e, axis=-1, keepdims=True), approx=True)
        outs.append(jnp.dot(p.astype(jnp.bfloat16), v.astype(jnp.bfloat16),
                            preferred_element_type=jnp.float32))
    o_ref[0] = jnp.concatenate(outs, axis=-1)                # one lane-dense store


def attention_qkv(qkv, bias, *, heads, hd, scale):
    """qkv: (B, S, 3*heads*hd) fused projections; bias: None, (1,S,S) or (H,S,S).
    Returns (B, S, heads*hd) with heads concatenated (PyTorch MHA layout)."""
    B, S, threeI = qkv.shape
    inner = heads * hd
    in_specs = [pl.BlockSpec((1, S, threeI), lambda b: (b, 0, 0))]
    args = [qkv.astype(jnp.float32)]
    if bias is not None:
        HB = bias.shape[0]
        in_specs.append(pl.BlockSpec((HB, S, S), lambda b: (0, 0, 0)))  # reused block
        args.append(bias.astype(jnp.float32))
    kernel = functools.partial(_attn_fused_kernel, heads=heads, hd=hd,
                               scale=scale, has_bias=bias is not None)
    return pl.pallas_call(
        kernel,
        out_shape=jax.ShapeDtypeStruct((B, S, inner), jnp.float32),
        grid=(B,),
        in_specs=in_specs,
        out_specs=pl.BlockSpec((1, S, inner), lambda b: (b, 0, 0)),
        compiler_params=pltpu.CompilerParams(
            dimension_semantics=("parallel",), vmem_limit_bytes=_VMEM_LIMIT),
    )(*args)


# ----------------------------------------------------------------------------
# T5 final RMS-norm fused with mean pooling
# ----------------------------------------------------------------------------
def _rms_meanpool_kernel(x_ref, w_ref, o_ref, *, eps):
    x = x_ref[...]                                           # (B, S, D)
    var = jnp.mean(jnp.square(x), axis=-1, keepdims=True)
    xn = x * jax.lax.rsqrt(var + eps) * w_ref[...]
    o_ref[...] = jnp.mean(xn, axis=1)


def rmsnorm_meanpool(x, w, eps=1e-6):                        # (B,S,D) -> (B,D)
    B, S, D = x.shape
    return pl.pallas_call(
        functools.partial(_rms_meanpool_kernel, eps=eps),
        out_shape=jax.ShapeDtypeStruct((B, D), jnp.float32),
    )(x.astype(jnp.float32), w.reshape(1, 1, D).astype(jnp.float32))


# ----------------------------------------------------------------------------
# Contrastive scoring: F.normalize(q/p) then q @ p.T * logit_scale
# ----------------------------------------------------------------------------
def _score_kernel(q_ref, p_ref, ls_ref, o_ref):
    q = q_ref[...]
    p = p_ref[...]
    # F.normalize(eps=1e-12): clamp of the norm -> clamp of sum-of-squares.
    qn = q * jax.lax.rsqrt(jnp.maximum(jnp.sum(q * q, -1, keepdims=True), 1e-24))
    pn = p * jax.lax.rsqrt(jnp.maximum(jnp.sum(p * p, -1, keepdims=True), 1e-24))
    o_ref[...] = jnp.dot(qn, pn.T, preferred_element_type=jnp.float32) * ls_ref[0]


def contrastive_scores(q_embeds, p_embeds, logit_scale):
    bs, _ = q_embeds.shape
    return pl.pallas_call(
        _score_kernel,
        out_shape=jax.ShapeDtypeStruct((bs, bs), jnp.float32),
        in_specs=[
            pl.BlockSpec(memory_space=pltpu.MemorySpace.VMEM),
            pl.BlockSpec(memory_space=pltpu.MemorySpace.VMEM),
            pl.BlockSpec(memory_space=pltpu.MemorySpace.SMEM),
        ],
        out_specs=pl.BlockSpec(memory_space=pltpu.MemorySpace.VMEM),
    )(q_embeds, p_embeds, logit_scale.reshape(1))


# ----------------------------------------------------------------------------
# Transformer blocks (thin glue around the fused kernels)
# ----------------------------------------------------------------------------
def clip_residual_block(x, p, heads, attn_bias):
    """CLIP ResidualAttentionBlock (pre-LN, fused-QKV MHA, QuickGELU MLP)."""
    B, S, D = x.shape
    hd = D // heads
    x2 = x.reshape(B * S, D)

    # ln_1 + fused QKV projection
    qkv = fused_linear(x2, p["w_qkv"], p["b_qkv"],
                       norm="ln", norm_w=p["ln1_w"], norm_b=p["ln1_b"], eps=1e-5)
    attn = attention_qkv(qkv.reshape(B, S, 3 * D), attn_bias,
                         heads=heads, hd=hd, scale=1.0 / math.sqrt(hd))
    # out projection + residual
    x2 = fused_linear(attn.reshape(B * S, D), p["wo"], p["bo"], residual=x2)

    # ln_2 + MLP (QuickGELU) ; second linear + residual
    h = fused_linear(x2, p["mlp_w1"], p["mlp_b1"],
                     norm="ln", norm_w=p["ln2_w"], norm_b=p["ln2_b"],
                     activation="quickgelu", eps=1e-5)
    x2 = fused_linear(h, p["mlp_w2"], p["mlp_b2"], residual=x2)
    return x2.reshape(B, S, D)


def t5_block(x, p, heads, d_kv, position_bias):
    """T5 encoder block: RMSNorm self-attn (no scaling, rel-pos bias) + ReLU FF."""
    B, S, D = x.shape
    inner = heads * d_kv
    x2 = x.reshape(B * S, D)

    qkv = fused_linear(x2, p["w_qkv"], None,
                       norm="rms", norm_w=p["sa_ln_w"], eps=1e-6)
    attn = attention_qkv(qkv.reshape(B, S, 3 * inner), position_bias,
                         heads=heads, hd=d_kv, scale=1.0)      # T5: no 1/sqrt(d)
    x2 = fused_linear(attn.reshape(B * S, inner), p["wo"], None, residual=x2)

    h = fused_linear(x2, p["wi"], None,
                     norm="rms", norm_w=p["ff_ln_w"], activation="relu", eps=1e-6)
    x2 = fused_linear(h, p["wo_ff"], None, residual=x2)
    return x2.reshape(B, S, D)


def _t5_rel_bucket(rel_pos, num_buckets, max_distance):
    # bidirectional (encoder) bucketing, matches HF T5
    num_buckets //= 2
    buckets = (rel_pos > 0).astype(jnp.int32) * num_buckets
    rel = jnp.abs(rel_pos)
    max_exact = num_buckets // 2
    is_small = rel < max_exact
    rel_large = max_exact + (
        jnp.log(jnp.maximum(rel, 1).astype(jnp.float32) / max_exact)
        / math.log(max_distance / max_exact)
        * (num_buckets - max_exact)
    ).astype(jnp.int32)
    rel_large = jnp.minimum(rel_large, num_buckets - 1)
    return buckets + jnp.where(is_small, rel, rel_large)


def t5_position_bias(rel_emb, seq_len, num_buckets, max_distance):
    ctx = jnp.arange(seq_len)[:, None]
    mem = jnp.arange(seq_len)[None, :]
    buckets = _t5_rel_bucket(mem - ctx, num_buckets, max_distance)   # (S, S)
    bias = rel_emb[buckets]                                          # (S, S, H)
    return jnp.transpose(bias, (2, 0, 1))                            # (H, S, S)


# ----------------------------------------------------------------------------
# CLIPFeatureFusion forward
# ----------------------------------------------------------------------------
def encode_text(params, txt_tokens, cfg):
    tp = params["text"]
    B, S = txt_tokens.shape
    D = cfg["d_model"]
    x = tp["tok_emb"][txt_tokens] + tp["pos_emb"][None, :, :]        # (B,S,D)
    causal = jnp.triu(jnp.full((S, S), -1e9, jnp.float32), k=1)[None]  # (1,S,S)
    for blk in tp["blocks"]:
        x = clip_residual_block(x, blk, cfg["text_heads"], causal)
    x = layernorm(x.reshape(B * S, D), tp["ln_final_w"], tp["ln_final_b"])
    return x.reshape(B, S, D)


def encode_image(params, image, cfg):
    vp = params["visual"]
    B = image.shape[0]
    p = cfg["patch"]
    W = cfg["vis_width"]
    gh = cfg["img_size"] // p
    n_patch = gh * gh
    # conv1(stride=patch) as matmul: NCHW input, (C,kh,kw)-ordered patch flatten
    patches = image.reshape(B, 3, gh, p, gh, p).transpose(0, 2, 4, 1, 3, 5)
    patches = patches.reshape(B * n_patch, 3 * p * p)
    x = fused_linear(patches, vp["conv_w"]).reshape(B, n_patch, W)
    cls = jnp.broadcast_to(vp["class_emb"][None, None, :], (B, 1, W))
    x = jnp.concatenate([cls, x], axis=1)                            # (B, 1+n_patch, W)
    x = x + vp["pos_emb"][None, :, :]
    S = 1 + n_patch
    x = layernorm(x.reshape(B * S, W), vp["ln_pre_w"], vp["ln_pre_b"]).reshape(B, S, W)
    for blk in vp["blocks"]:
        x = clip_residual_block(x, blk, cfg["vis_heads"], None)      # bias-free attn
    # ln_post fused with the output projection (x @ proj, no bias)
    x = fused_linear(x.reshape(B * S, W), vp["proj"], None,
                     norm="ln", norm_w=vp["ln_post_w"], norm_b=vp["ln_post_b"])
    return x.reshape(B, S, cfg["d_model"])


def encode_multimodal_input(params, txt, img, cfg):
    txt_feat = encode_text(params, txt, cfg)                         # (B, S_txt, D)
    img_feat = encode_image(params, img, cfg)                        # (B, S_img, D)
    x = jnp.concatenate([txt_feat, img_feat], axis=1)                # (B, S, D)
    B, S, D = x.shape
    tb = params["t5"]
    pos_bias = t5_position_bias(tb["blocks"][0]["rel_emb"], S,
                                cfg["t5_num_buckets"], cfg["t5_max_distance"])
    for blk in tb["blocks"]:
        x = t5_block(x, blk, cfg["t5_heads"], cfg["t5_d_kv"], pos_bias)
    return rmsnorm_meanpool(x, tb["final_ln_w"])                     # (B, D)


def compute_inbatch_contrastive_loss(params, txt, img, q_idx, p_idx, cfg):
    embeddings = encode_multimodal_input(params, txt, img, cfg)
    q_embeds = embeddings[q_idx]
    p_embeds = embeddings[p_idx]
    bs = q_embeds.shape[0]
    logit_scale = jnp.exp(params["logit_scale"])
    score = contrastive_scores(q_embeds, p_embeds, logit_scale)      # (bs, bs)
    targets = jnp.arange(bs)
    lsm = jax.nn.log_softmax(score, axis=1)
    loss = -jnp.mean(lsm[jnp.arange(bs), targets])
    accuracy = jnp.mean((jnp.argmax(score, axis=1) == targets).astype(jnp.float32))
    return {"loss": loss, "accuracy": accuracy}


# ----------------------------------------------------------------------------
# Deterministic parameter init (synthetic; shapes follow the torch module,
# scaled down; QKV weights stored pre-fused)
# ----------------------------------------------------------------------------
def _nrm(key, shape, scale=0.02):
    return jax.random.normal(key, shape, jnp.float32) * scale


def init_clip_block(key, d):
    ks = jax.random.split(key, 4)
    return dict(
        ln1_w=jnp.ones((d,), jnp.float32), ln1_b=jnp.zeros((d,), jnp.float32),
        w_qkv=_nrm(ks[0], (d, 3 * d)), b_qkv=jnp.zeros((3 * d,), jnp.float32),
        wo=_nrm(ks[1], (d, d)), bo=jnp.zeros((d,), jnp.float32),
        ln2_w=jnp.ones((d,), jnp.float32), ln2_b=jnp.zeros((d,), jnp.float32),
        mlp_w1=_nrm(ks[2], (d, 4 * d)), mlp_b1=jnp.zeros((4 * d,), jnp.float32),
        mlp_w2=_nrm(ks[3], (4 * d, d)), mlp_b2=jnp.zeros((d,), jnp.float32),
    )


def init_t5_block(key, d, heads, d_kv, d_ff, has_rel_bias, num_buckets):
    ks = jax.random.split(key, 5)
    inner = heads * d_kv
    p = dict(
        sa_ln_w=jnp.ones((d,), jnp.float32),
        w_qkv=_nrm(ks[0], (d, 3 * inner)), wo=_nrm(ks[1], (inner, d)),
        ff_ln_w=jnp.ones((d,), jnp.float32),
        wi=_nrm(ks[2], (d, d_ff)), wo_ff=_nrm(ks[3], (d_ff, d)),
    )
    if has_rel_bias:
        p["rel_emb"] = _nrm(ks[4], (num_buckets, heads))
    return p


def init_params(key, cfg):
    kt, kv, k5, _, _ = jax.random.split(key, 5)
    D, W, p = cfg["d_model"], cfg["vis_width"], cfg["patch"]
    n_patch = (cfg["img_size"] // p) ** 2

    tkeys = jax.random.split(kt, cfg["text_layers"] + 2)
    text = dict(
        tok_emb=_nrm(tkeys[0], (cfg["vocab"], D)),
        pos_emb=_nrm(tkeys[1], (cfg["seq_txt"], D), 0.01),
        blocks=[init_clip_block(tkeys[2 + i], D) for i in range(cfg["text_layers"])],
        ln_final_w=jnp.ones((D,), jnp.float32), ln_final_b=jnp.zeros((D,), jnp.float32),
    )

    vkeys = jax.random.split(kv, cfg["vis_layers"] + 4)
    visual = dict(
        conv_w=_nrm(vkeys[0], (3 * p * p, W)),        # Conv2d(3, W, p, p, bias=False)
        class_emb=_nrm(vkeys[1], (W,)),
        pos_emb=_nrm(vkeys[2], (1 + n_patch, W), 0.01),
        ln_pre_w=jnp.ones((W,), jnp.float32), ln_pre_b=jnp.zeros((W,), jnp.float32),
        blocks=[init_clip_block(vkeys[4 + i], W) for i in range(cfg["vis_layers"])],
        ln_post_w=jnp.ones((W,), jnp.float32), ln_post_b=jnp.zeros((W,), jnp.float32),
        proj=_nrm(vkeys[3], (W, D)),
    )

    t5keys = jax.random.split(k5, cfg["t5_layers"])
    t5 = dict(
        blocks=[init_t5_block(t5keys[i], D, cfg["t5_heads"], cfg["t5_d_kv"],
                              cfg["t5_d_ff"], has_rel_bias=(i == 0),
                              num_buckets=cfg["t5_num_buckets"])
                for i in range(cfg["t5_layers"])],
        final_ln_w=jnp.ones((D,), jnp.float32),
    )

    return dict(
        text=text, visual=visual, t5=t5,
        logit_scale=jnp.array(math.log(1.0 / 0.07), jnp.float32),
    )


# ----------------------------------------------------------------------------
if __name__ == "__main__":
    cfg = dict(
        # scaled-down "ViT-B/32"-style config
        d_model=16,           # text width == visual output_dim == T5 d_model
        vocab=64, seq_txt=8, text_layers=2, text_heads=2,
        img_size=16, patch=8, vis_width=32, vis_layers=2, vis_heads=4,
        t5_layers=2, t5_heads=4, t5_d_kv=8, t5_d_ff=32,
        t5_num_buckets=32, t5_max_distance=128,
    )

    key = jax.random.PRNGKey(0)
    kp, k1, k2 = jax.random.split(key, 3)
    params = init_params(kp, cfg)

    B = 4                                  # 2 (query, pos_cand) pairs
    txt_batched = jax.random.randint(k1, (B, cfg["seq_txt"]), 0, cfg["vocab"])
    image_batched = jax.random.normal(k2, (B, 3, cfg["img_size"], cfg["img_size"]),
                                      jnp.float32)
    txt_mask_batched = jnp.ones((B,), jnp.int32)    # unused by the torch forward
    image_mask_batched = jnp.ones((B,), jnp.int32)  # unused by the torch forward
    q_idx = jnp.array([0, 2], jnp.int32)            # index_mapping['query']
    p_idx = jnp.array([1, 3], jnp.int32)            # index_mapping['pos_cand']

    fwd = jax.jit(functools.partial(compute_inbatch_contrastive_loss, cfg=cfg))
    out = fwd(params, txt_batched, image_batched, q_idx, p_idx)
    jax.block_until_ready(out)
    assert jnp.isfinite(out["loss"]) and jnp.isfinite(out["accuracy"])
    print("KERNEL_OK")
</pallas_src>

<mosaic_0001>
module attributes {stable_mosaic.version = 11 : i64} {
  func.func @_fused_linear_kernel(%arg0: i32, %arg1: i32, %arg2: memref<16x192xf32, #tpu.memory_space<vmem>>, %arg3: memref<192x32xf32, #tpu.memory_space<vmem>>, %arg4: memref<16x32xf32, #tpu.memory_space<vmem>>) attributes {dimension_semantics = [#tpu.dimension_semantics<parallel>, #tpu.dimension_semantics<parallel>], iteration_bounds = array<i64: 1, 1>, scalar_prefetch = 0 : i64, scratch_operands = 0 : i64, tpu.core_type = #tpu.core_type<tc>, window_params = [{transform_indices = @transform_0, window_bounds = array<i64: 16, 192>}, {transform_indices = @transform_1, window_bounds = array<i64: 192, 32>}, {transform_indices = @transform_2, window_bounds = array<i64: 16, 32>}]} {
    %c0 = arith.constant 0 : index
    %c0_0 = arith.constant 0 : index
    %0 = vector.load %arg2[%c0, %c0_0] : memref<16x192xf32, #tpu.memory_space<vmem>>, vector<16x192xf32>
    %1 = arith.truncf %0 : vector<16x192xf32> to vector<16x192xbf16>
    %c0_1 = arith.constant 0 : index
    %c0_2 = arith.constant 0 : index
    %2 = vector.load %arg3[%c0_1, %c0_2] : memref<192x32xf32, #tpu.memory_space<vmem>>, vector<192x32xf32>
    %3 = arith.truncf %2 : vector<192x32xf32> to vector<192x32xbf16>
    %cst = arith.constant dense<0.000000e+00> : vector<16x32xf32>
    %4 = tpu.matmul %1, %3, %cst {dimension_numbers = #tpu.dot_dimension_numbers<[1], [0], [0], [1], [0, 0, 1, 1], [], []>} : vector<16x192xbf16>, vector<192x32xbf16>, vector<16x32xf32> -> vector<16x32xf32>
    %c0_3 = arith.constant 0 : index
    %c0_4 = arith.constant 0 : index
    %5 = vector.load %arg4[%c0_3, %c0_4] : memref<16x32xf32, #tpu.memory_space<vmem>>, vector<16x32xf32>
    tpu.vector_store %arg4[%c0_3, %c0_4], %4 {strides = array<i32>} : memref<16x32xf32, #tpu.memory_space<vmem>>, vector<16x32xf32>,
    return
  }
  func.func @transform_0(%arg0: i32, %arg1: i32) -> (i32, i32) {
    %c0_i32 = arith.constant 0 : i32
    %c0_i32_0 = arith.constant 0 : i32
    return %arg0, %c0_i32 : i32, i32
  }
  func.func @transform_1(%arg0: i32, %arg1: i32) -> (i32, i32) {
    %c0_i32 = arith.constant 0 : i32
    %c0_i32_0 = arith.constant 0 : i32
    return %c0_i32, %arg1 : i32, i32
  }
  func.func @transform_2(%arg0: i32, %arg1: i32) -> (i32, i32) {
    %c0_i32 = arith.constant 0 : i32
    return %arg0, %arg1 : i32, i32
  }
}

module attributes {stable_mosaic.version = 11 : i64} {
  func.func @_layernorm_kernel(%arg0: i32, %arg1: memref<20x32xf32, #tpu.memory_space<vmem>>, %arg2: memref<1x32xf32, #tpu.memory_space<vmem>>, %arg3: memref<1x32xf32, #tpu.memory_space<vmem>>, %arg4: memref<20x32xf32, #tpu.memory_space<vmem>>) attributes {dimension_semantics = [#tpu.dimension_semantics<parallel>], iteration_bounds = array<i64: 1>, scalar_prefetch = 0 : i64, scratch_operands = 0 : i64, tpu.core_type = #tpu.core_type<tc>, window_params = [{transform_indices = @transform_0, window_bounds = array<i64: 20, 32>}, {pipeline_mode = #tpu.pipeline_mode<synchronous>, transform_indices = @transform_1, window_bounds = array<i64: 1, 32>}, {pipeline_mode = #tpu.pipeline_mode<synchronous>, transform_indices = @transform_2, window_bounds = array<i64: 1, 32>}, {transform_indices = @transform_3, window_bounds = array<i64: 20, 32>}]} {
    %c0 = arith.constant 0 : index
    %c0_0 = arith.constant 0 : index
    %0 = vector.load %arg1[%c0, %c0_0] : memref<20x32xf32, #tpu.memory_space<vmem>>, vector<20x32xf32>
    %cst = arith.constant dense<0.000000e+00> : vector<20xf32>
    %1 = vector.multi_reduction <add>, %0, %cst [1] : vector<20x32xf32> to vector<20xf32>
    %2 = vector.shape_cast %1 : vector<20xf32> to vector<20x1xf32>
    %cst_1 = arith.constant 3.200000e+01 : f32
    %3 = vector.broadcast %cst_1 : f32 to vector<20x1xf32>
    %4 = arith.divf %2, %3 : vector<20x1xf32>
    %5 = vector.broadcast %4 : vector<20x1xf32> to vector<20x32xf32>
    %6 = arith.subf %0, %5 : vector<20x32xf32>
    %7 = arith.mulf %6, %6 : vector<20x32xf32>
    %cst_2 = arith.constant dense<0.000000e+00> : vector<20xf32>
    %8 = vector.multi_reduction <add>, %7, %cst_2 [1] : vector<20x32xf32> to vector<20xf32>
    %9 = vector.shape_cast %8 : vector<20xf32> to vector<20x1xf32>
    %cst_3 = arith.constant 3.200000e+01 : f32
    %10 = vector.broadcast %cst_3 : f32 to vector<20x1xf32>
    %11 = arith.divf %9, %10 : vector<20x1xf32>
    %12 = vector.broadcast %4 : vector<20x1xf32> to vector<20x32xf32>
    %13 = arith.subf %0, %12 : vector<20x32xf32>
    %cst_4 = arith.constant 9.99999974E-6 : f32
    %14 = vector.broadcast %cst_4 : f32 to vector<20x1xf32>
    %15 = arith.addf %11, %14 : vector<20x1xf32>
    %16 = math.rsqrt %15 : vector<20x1xf32>
    %17 = vector.broadcast %16 : vector<20x1xf32> to vector<20x32xf32>
    %18 = arith.mulf %13, %17 : vector<20x32xf32>
    %c0_5 = arith.constant 0 : index
    %c0_6 = arith.constant 0 : index
    %19 = vector.load %arg2[%c0_5, %c0_6] : memref<1x32xf32, #tpu.memory_space<vmem>>, vector<1x32xf32>
    %20 = vector.broadcast %19 : vector<1x32xf32> to vector<20x32xf32>
    %21 = arith.mulf %18, %20 : vector<20x32xf32>
    %c0_7 = arith.constant 0 : index
    %c0_8 = arith.constant 0 : index
    %22 = vector.load %arg3[%c0_7, %c0_8] : memref<1x32xf32, #tpu.memory_space<vmem>>, vector<1x32xf32>
    %23 = vector.broadcast %22 : vector<1x32xf32> to vector<20x32xf32>
    %24 = arith.addf %21, %23 : vector<20x32xf32>
    %c0_9 = arith.constant 0 : index
    %c0_10 = arith.constant 0 : index
    %25 = vector.load %arg4[%c0_9, %c0_10] : memref<20x32xf32, #tpu.memory_space<vmem>>, vector<20x32xf32>
    tpu.vector_store %arg4[%c0_9, %c0_10], %24 {strides = array<i32>} : memref<20x32xf32, #tpu.memory_space<vmem>>, vector<20x32xf32>,
    return
  }
  func.func @transform_0(%arg0: i32) -> (i32, i32) {
    %c0_i32 = arith.constant 0 : i32
    %c0_i32_0 = arith.constant 0 : i32
    return %arg0, %c0_i32 : i32, i32
  }
  func.func @transform_1(%arg0: i32) -> (i32, i32) {
    %c0_i32 = arith.constant 0 : i32
    %c0_i32_0 = arith.constant 0 : i32
    %c0_i32_1 = arith.constant 0 : i32
    return %c0_i32, %c0_i32_0 : i32, i32
  }
  func.func @transform_2(%arg0: i32) -> (i32, i32) {
    %c0_i32 = arith.constant 0 : i32
    %c0_i32_0 = arith.constant 0 : i32
    %c0_i32_1 = arith.constant 0 : i32
    return %c0_i32, %c0_i32_0 : i32, i32
  }
  func.func @transform_3(%arg0: i32) -> (i32, i32) {
    %c0_i32 = arith.constant 0 : i32
    %c0_i32_0 = arith.constant 0 : i32
    return %arg0, %c0_i32 : i32, i32
  }
}

module attributes {stable_mosaic.version = 11 : i64} {
  func.func @_fused_linear_kernel(%arg0: i32, %arg1: i32, %arg2: memref<20x32xf32, #tpu.memory_space<vmem>>, %arg3: memref<32x96xf32, #tpu.memory_space<vmem>>, %arg4: memref<1x32xf32, #tpu.memory_space<vmem>>, %arg5: memref<1x32xf32, #tpu.memory_space<vmem>>, %arg6: memref<1x96xf32, #tpu.memory_space<vmem>>, %arg7: memref<20x96xf32, #tpu.memory_space<vmem>>) attributes {dimension_semantics = [#tpu.dimension_semantics<parallel>, #tpu.dimension_semantics<parallel>], iteration_bounds = array<i64: 1, 1>, scalar_prefetch = 0 : i64, scratch_operands = 0 : i64, tpu.core_type = #tpu.core_type<tc>, window_params = [{transform_indices = @transform_0, window_bounds = array<i64: 20, 32>}, {transform_indices = @transform_1, window_bounds = array<i64: 32, 96>}, {pipeline_mode = #tpu.pipeline_mode<synchronous>, transform_indices = @transform_2, window_bounds = array<i64: 1, 32>}, {pipeline_mode = #tpu.pipeline_mode<synchronous>, transform_indices = @transform_3, window_bounds = array<i64: 1, 32>}, {transform_indices = @transform_4, window_bounds = array<i64: 1, 96>}, {transform_indices = @transform_5, window_bounds = array<i64: 20, 96>}]} {
    %c0 = arith.constant 0 : index
    %c0_0 = arith.constant 0 : index
    %0 = vector.load %arg2[%c0, %c0_0] : memref<20x32xf32, #tpu.memory_space<vmem>>, vector<20x32xf32>
    %cst = arith.constant dense<0.000000e+00> : vector<20xf32>
    %1 = vector.multi_reduction <add>, %0, %cst [1] : vector<20x32xf32> to vector<20xf32>
    %2 = vector.shape_cast %1 : vector<20xf32> to vector<20x1xf32>
    %cst_1 = arith.constant 3.200000e+01 : f32
    %3 = vector.broadcast %cst_1 : f32 to vector<20x1xf32>
    %4 = arith.divf %2, %3 : vector<20x1xf32>
    %5 = vector.broadcast %4 : vector<20x1xf32> to vector<20x32xf32>
    %6 = arith.subf %0, %5 : vector<20x32xf32>
    %7 = arith.mulf %6, %6 : vector<20x32xf32>
    %cst_2 = arith.constant dense<0.000000e+00> : vector<20xf32>
    %8 = vector.multi_reduction <add>, %7, %cst_2 [1] : vector<20x32xf32> to vector<20xf32>
    %9 = vector.shape_cast %8 : vector<20xf32> to vector<20x1xf32>
    %cst_3 = arith.constant 3.200000e+01 : f32
    %10 = vector.broadcast %cst_3 : f32 to vector<20x1xf32>
    %11 = arith.divf %9, %10 : vector<20x1xf32>
    %12 = vector.broadcast %4 : vector<20x1xf32> to vector<20x32xf32>
    %13 = arith.subf %0, %12 : vector<20x32xf32>
    %cst_4 = arith.constant 9.99999974E-6 : f32
    %14 = vector.broadcast %cst_4 : f32 to vector<20x1xf32>
    %15 = arith.addf %11, %14 : vector<20x1xf32>
    %16 = math.rsqrt %15 : vector<20x1xf32>
    %17 = vector.broadcast %16 : vector<20x1xf32> to vector<20x32xf32>
    %18 = arith.mulf %13, %17 : vector<20x32xf32>
    %c0_5 = arith.constant 0 : index
    %c0_6 = arith.constant 0 : index
    %19 = vector.load %arg4[%c0_5, %c0_6] : memref<1x32xf32, #tpu.memory_space<vmem>>, vector<1x32xf32>
    %20 = vector.broadcast %19 : vector<1x32xf32> to vector<20x32xf32>
    %21 = arith.mulf %18, %20 : vector<20x32xf32>
    %c0_7 = arith.constant 0 : index
    %c0_8 = arith.constant 0 : index
    %22 = vector.load %arg5[%c0_7, %c0_8] : memref<1x32xf32, #tpu.memory_space<vmem>>, vector<1x32xf32>
    %23 = vector.broadcast %22 : vector<1x32xf32> to vector<20x32xf32>
    %24 = arith.addf %21, %23 : vector<20x32xf32>
    %25 = arith.truncf %24 : vector<20x32xf32> to vector<20x32xbf16>
    %c0_9 = arith.constant 0 : index
    %c0_10 = arith.constant 0 : index
    %26 = vector.load %arg3[%c0_9, %c0_10] : memref<32x96xf32, #tpu.memory_space<vmem>>, vector<32x96xf32>
    %27 = arith.truncf %26 : vector<32x96xf32> to vector<32x96xbf16>
    %cst_11 = arith.constant dense<0.000000e+00> : vector<20x96xf32>
    %28 = tpu.matmul %25, %27, %cst_11 {dimension_numbers = #tpu.dot_dimension_numbers<[1], [0], [0], [1], [0, 0, 1, 1], [], []>} : vector<20x32xbf16>, vector<32x96xbf16>, vector<20x96xf32> -> vector<20x96xf32>
    %c0_12 = arith.constant 0 : index
    %c0_13 = arith.constant 0 : index
    %29 = vector.load %arg6[%c0_12, %c0_13] : memref<1x96xf32, #tpu.memory_space<vmem>>, vector<1x96xf32>
    %30 = vector.broadcast %29 : vector<1x96xf32> to vector<20x96xf32>
    %31 = arith.addf %28, %30 : vector<20x96xf32>
    %c0_14 = arith.constant 0 : index
    %c0_15 = arith.constant 0 : index
    %32 = vector.load %arg7[%c0_14, %c0_15] : memref<20x96xf32, #tpu.memory_space<vmem>>, vector<20x96xf32>
    tpu.vector_store %arg7[%c0_14, %c0_15], %31 {strides = array<i32>} : memref<20x96xf32, #tpu.memory_space<vmem>>, vector<20x96xf32>,
    return
  }
  func.func @transform_0(%arg0: i32, %arg1: i32) -> (i32, i32) {
    %c0_i32 = arith.constant 0 : i32
    %c0_i32_0 = arith.constant 0 : i32
    return %arg0, %c0_i32 : i32, i32
  }
  func.func @transform_1(%arg0: i32, %arg1: i32) -> (i32, i32) {
    %c0_i32 = arith.constant 0 : i32
    %c0_i32_0 = arith.constant 0 : i32
    return %c0_i32, %arg1 : i32, i32
  }
  func.func @transform_2(%arg0: i32, %arg1: i32) -> (i32, i32) {
    %c0_i32 = arith.constant 0 : i32
    %c0_i32_0 = arith.constant 0 : i32
    %c0_i32_1 = arith.constant 0 : i32
    return %c0_i32, %c0_i32_0 : i32, i32
  }
  func.func @transform_3(%arg0: i32, %arg1: i32) -> (i32, i32) {
    %c0_i32 = arith.constant 0 : i32
    %c0_i32_0 = arith.constant 0 : i32
    %c0_i32_1 = arith.constant 0 : i32
    return %c0_i32, %c0_i32_0 : i32, i32
  }
  func.func @transform_4(%arg0: i32, %arg1: i32) -> (i32, i32) {
    %c0_i32 = arith.constant 0 : i32
    %c0_i32_0 = arith.constant 0 : i32
    return %c0_i32, %arg1 : i32, i32
  }
  func.func @transform_5(%arg0: i32, %arg1: i32) -> (i32, i32) {
    %c0_i32 = arith.constant 0 : i32
    return %arg0, %arg1 : i32, i32
  }
}

module attributes {stable_mosaic.version = 11 : i64} {
  func.func @_attn_fused_kernel(%arg0: i32, %arg1: memref<1x5x96xf32, #tpu.memory_space<vmem>>, %arg2: memref<1x5x32xf32, #tpu.memory_space<vmem>>) attributes {dimension_semantics = [#tpu.dimension_semantics<parallel>], iteration_bounds = array<i64: 4>, scalar_prefetch = 0 : i64, scratch_operands = 0 : i64, tpu.core_type = #tpu.core_type<tc>, window_params = [{transform_indices = @transform_0, window_bounds = array<i64: 1, 5, 96>}, {transform_indices = @transform_1, window_bounds = array<i64: 1, 5, 32>}]} {
    %c0 = arith.constant 0 : index
    %c0_0 = arith.constant 0 : index
    %c0_1 = arith.constant 0 : index
    %0 = vector.load %arg1[%c0, %c0_0, %c0_1] : memref<1x5x96xf32, #tpu.memory_space<vmem>>, vector<1x5x96xf32>
    %1 = vector.shape_cast %0 : vector<1x5x96xf32> to vector<5x96xf32>
    %2 = vector.extract_strided_slice %1 {offsets = [0, 0], sizes = [5, 8], strides = [1, 1]} : vector<5x96xf32> to vector<5x8xf32>
    %3 = vector.extract_strided_slice %1 {offsets = [0, 32], sizes = [5, 8], strides = [1, 1]} : vector<5x96xf32> to vector<5x8xf32>
    %4 = vector.extract_strided_slice %1 {offsets = [0, 64], sizes = [5, 8], strides = [1, 1]} : vector<5x96xf32> to vector<5x8xf32>
    %5 = arith.truncf %2 : vector<5x8xf32> to vector<5x8xbf16>
    %6 = arith.truncf %3 : vector<5x8xf32> to vector<5x8xbf16>
    %7 = tpu.transpose %6, [1, 0] : vector<5x8xbf16> -> vector<8x5xbf16>
    %cst = arith.constant dense<0.000000e+00> : vector<5x5xf32>
    %8 = tpu.matmul %5, %7, %cst {dimension_numbers = #tpu.dot_dimension_numbers<[1], [0], [0], [1], [0, 0, 1, 1], [], []>} : vector<5x8xbf16>, vector<8x5xbf16>, vector<5x5xf32> -> vector<5x5xf32>
    %cst_2 = arith.constant 0.353553385 : f32
    %9 = vector.broadcast %cst_2 : f32 to vector<5x5xf32>
    %10 = arith.mulf %8, %9 : vector<5x5xf32>
    %cst_3 = arith.constant dense<0xFF800000> : vector<5xf32>
    %11 = vector.multi_reduction <maximumf>, %10, %cst_3 [1] : vector<5x5xf32> to vector<5xf32>
    %12 = vector.shape_cast %11 : vector<5xf32> to vector<5x1xf32>
    %13 = vector.broadcast %12 : vector<5x1xf32> to vector<5x5xf32>
    %14 = arith.subf %10, %13 : vector<5x5xf32>
    %15 = math.exp %14 : vector<5x5xf32>
    %cst_4 = arith.constant dense<0.000000e+00> : vector<5xf32>
    %16 = vector.multi_reduction <add>, %15, %cst_4 [1] : vector<5x5xf32> to vector<5xf32>
    %17 = vector.shape_cast %16 : vector<5xf32> to vector<5x1xf32>
    %18 = tpu.reciprocal %17 {approx = true} : vector<5x1xf32> -> vector<5x1xf32>
    %19 = vector.broadcast %18 : vector<5x1xf32> to vector<5x5xf32>
    %20 = arith.mulf %15, %19 : vector<5x5xf32>
    %21 = arith.truncf %20 : vector<5x5xf32> to vector<5x5xbf16>
    %22 = arith.truncf %4 : vector<5x8xf32> to vector<5x8xbf16>
    %cst_5 = arith.constant dense<0.000000e+00> : vector<5x8xf32>
    %23 = tpu.matmul %21, %22, %cst_5 {dimension_numbers = #tpu.dot_dimension_numbers<[1], [0], [0], [1], [0, 0, 1, 1], [], []>} : vector<5x5xbf16>, vector<5x8xbf16>, vector<5x8xf32> -> vector<5x8xf32>
    %24 = vector.extract_strided_slice %1 {offsets = [0, 8], sizes = [5, 8], strides = [1, 1]} : vector<5x96xf32> to vector<5x8xf32>
    %25 = vector.extract_strided_slice %1 {offsets = [0, 40], sizes = [5, 8], strides = [1, 1]} : vector<5x96xf32> to vector<5x8xf32>
    %26 = vector.extract_strided_slice %1 {offsets = [0, 72], sizes = [5, 8], strides = [1, 1]} : vector<5x96xf32> to vector<5x8xf32>
    %27 = arith.truncf %24 : vector<5x8xf32> to vector<5x8xbf16>
    %28 = arith.truncf %25 : vector<5x8xf32> to vector<5x8xbf16>
    %29 = tpu.transpose %28, [1, 0] : vector<5x8xbf16> -> vector<8x5xbf16>
    %cst_6 = arith.constant dense<0.000000e+00> : vector<5x5xf32>
    %30 = tpu.matmul %27, %29, %cst_6 {dimension_numbers = #tpu.dot_dimension_numbers<[1], [0], [0], [1], [0, 0, 1, 1], [], []>} : vector<5x8xbf16>, vector<8x5xbf16>, vector<5x5xf32> -> vector<5x5xf32>
    %cst_7 = arith.constant 0.353553385 : f32
    %31 = vector.broadcast %cst_7 : f32 to vector<5x5xf32>
    %32 = arith.mulf %30, %31 : vector<5x5xf32>
    %cst_8 = arith.constant dense<0xFF800000> : vector<5xf32>
    %33 = vector.multi_reduction <maximumf>, %32, %cst_8 [1] : vector<5x5xf32> to vector<5xf32>
    %34 = vector.shape_cast %33 : vector<5xf32> to vector<5x1xf32>
    %35 = vector.broadcast %34 : vector<5x1xf32> to vector<5x5xf32>
    %36 = arith.subf %32, %35 : vector<5x5xf32>
    %37 = math.exp %36 : vector<5x5xf32>
    %cst_9 = arith.constant dense<0.000000e+00> : vector<5xf32>
    %38 = vector.multi_reduction <add>, %37, %cst_9 [1] : vector<5x5xf32> to vector<5xf32>
    %39 = vector.shape_cast %38 : vector<5xf32> to vector<5x1xf32>
    %40 = tpu.reciprocal %39 {approx = true} : vector<5x1xf32> -> vector<5x1xf32>
    %41 = vector.broadcast %40 : vector<5x1xf32> to vector<5x5xf32>
    %42 = arith.mulf %37, %41 : vector<5x5xf32>
    %43 = arith.truncf %42 : vector<5x5xf32> to vector<5x5xbf16>
    %44 = arith.truncf %26 : vector<5x8xf32> to vector<5x8xbf16>
    %cst_10 = arith.constant dense<0.000000e+00> : vector<5x8xf32>
    %45 = tpu.matmul %43, %44, %cst_10 {dimension_numbers = #tpu.dot_dimension_numbers<[1], [0], [0], [1], [0, 0, 1, 1], [], []>} : vector<5x5xbf16>, vector<5x8xbf16>, vector<5x8xf32> -> vector<5x8xf32>
    %46 = vector.extract_strided_slice %1 {offsets = [0, 16], sizes = [5, 8], strides = [1, 1]} : vector<5x96xf32> to vector<5x8xf32>
    %47 = vector.extract_strided_slice %1 {offsets = [0, 48], sizes = [5, 8], strides = [1, 1]} : vector<5x96xf32> to vector<5x8xf32>
    %48 = vector.extract_strided_slice %1 {offsets = [0, 80], sizes = [5, 8], strides = [1, 1]} : vector<5x96xf32> to vector<5x8xf32>
    %49 = arith.truncf %46 : vector<5x8xf32> to vector<5x8xbf16>
    %50 = arith.truncf %47 : vector<5x8xf32> to vector<5x8xbf16>
    %51 = tpu.transpose %50, [1, 0] : vector<5x8xbf16> -> vector<8x5xbf16>
    %cst_11 = arith.constant dense<0.000000e+00> : vector<5x5xf32>
    %52 = tpu.matmul %49, %51, %cst_11 {dimension_numbers = #tpu.dot_dimension_numbers<[1], [0], [0], [1], [0, 0, 1, 1], [], []>} : vector<5x8xbf16>, vector<8x5xbf16>, vector<5x5xf32> -> vector<5x5xf32>
    %cst_12 = arith.constant 0.353553385 : f32
    %53 = vector.broadcast %cst_12 : f32 to vector<5x5xf32>
    %54 = arith.mulf %52, %53 : vector<5x5xf32>
    %cst_13 = arith.constant dense<0xFF800000> : vector<5xf32>
    %55 = vector.multi_reduction <maximumf>, %54, %cst_13 [1] : vector<5x5xf32> to vector<5xf32>
    %56 = vector.shape_cast %55 : vector<5xf32> to vector<5x1xf32>
    %57 = vector.broadcast %56 : vector<5x1xf32> to vector<5x5xf32>
    %58 = arith.subf %54, %57 : vector<5x5xf32>
    %59 = math.exp %58 : vector<5x5xf32>
    %cst_14 = arith.constant dense<0.000000e+00> : vector<5xf32>
    %60 = vector.multi_reduction <add>, %59, %cst_14 [1] : vector<5x5xf32> to vector<5xf32>
    %61 = vector.shape_cast %60 : vector<5xf32> to vector<5x1xf32>
    %62 = tpu.reciprocal %61 {approx = true} : vector<5x1xf32> -> vector<5x1xf32>
    %63 = vector.broadcast %62 : vector<5x1xf32> to vector<5x5xf32>
    %64 = arith.mulf %59, %63 : vector<5x5xf32>
    %65 = arith.truncf %64 : vector<5x5xf32> to vector<5x5xbf16>
    %66 = arith.truncf %48 : vector<5x8xf32> to vector<5x8xbf16>
    %cst_15 = arith.constant dense<0.000000e+00> : vector<5x8xf32>
    %67 = tpu.matmul %65, %66, %cst_15 {dimension_numbers = #tpu.dot_dimension_numbers<[1], [0], [0], [1], [0, 0, 1, 1], [], []>} : vector<5x5xbf16>, vector<5x8xbf16>, vector<5x8xf32> -> vector<5x8xf32>
    %68 = vector.extract_strided_slice %1 {offsets = [0, 24], sizes = [5, 8], strides = [1, 1]} : vector<5x96xf32> to vector<5x8xf32>
    %69 = vector.extract_strided_slice %1 {offsets = [0, 56], sizes = [5, 8], strides = [1, 1]} : vector<5x96xf32> to vector<5x8xf32>
    %70 = vector.extract_strided_slice %1 {offsets = [0, 88], sizes = [5, 8], strides = [1, 1]} : vector<5x96xf32> to vector<5x8xf32>
    %71 = arith.truncf %68 : vector<5x8xf32> to vector<5x8xbf16>
    %72 = arith.truncf %69 : vector<5x8xf32> to vector<5x8xbf16>
    %73 = tpu.transpose %72, [1, 0] : vector<5x8xbf16> -> vector<8x5xbf16>
    %cst_16 = arith.constant dense<0.000000e+00> : vector<5x5xf32>
    %74 = tpu.matmul %71, %73, %cst_16 {dimension_numbers = #tpu.dot_dimension_numbers<[1], [0], [0], [1], [0, 0, 1, 1], [], []>} : vector<5x8xbf16>, vector<8x5xbf16>, vector<5x5xf32> -> vector<5x5xf32>
    %cst_17 = arith.constant 0.353553385 : f32
    %75 = vector.broadcast %cst_17 : f32 to vector<5x5xf32>
    %76 = arith.mulf %74, %75 : vector<5x5xf32>
    %cst_18 = arith.constant dense<0xFF800000> : vector<5xf32>
    %77 = vector.multi_reduction <maximumf>, %76, %cst_18 [1] : vector<5x5xf32> to vector<5xf32>
    %78 = vector.shape_cast %77 : vector<5xf32> to vector<5x1xf32>
    %79 = vector.broadcast %78 : vector<5x1xf32> to vector<5x5xf32>
    %80 = arith.subf %76, %79 : vector<5x5xf32>
    %81 = math.exp %80 : vector<5x5xf32>
    %cst_19 = arith.constant dense<0.000000e+00> : vector<5xf32>
    %82 = vector.multi_reduction <add>, %81, %cst_19 [1] : vector<5x5xf32> to vector<5xf32>
    %83 = vector.shape_cast %82 : vector<5xf32> to vector<5x1xf32>
    %84 = tpu.reciprocal %83 {approx = true} : vector<5x1xf32> -> vector<5x1xf32>
    %85 = vector.broadcast %84 : vector<5x1xf32> to vector<5x5xf32>
    %86 = arith.mulf %81, %85 : vector<5x5xf32>
    %87 = arith.truncf %86 : vector<5x5xf32> to vector<5x5xbf16>
    %88 = arith.truncf %70 : vector<5x8xf32> to vector<5x8xbf16>
    %cst_20 = arith.constant dense<0.000000e+00> : vector<5x8xf32>
    %89 = tpu.matmul %87, %88, %cst_20 {dimension_numbers = #tpu.dot_dimension_numbers<[1], [0], [0], [1], [0, 0, 1, 1], [], []>} : vector<5x5xbf16>, vector<5x8xbf16>, vector<5x8xf32> -> vector<5x8xf32>
    %90 = tpu.concatenate %23, %45, %67, %89 in 1 : vector<5x8xf32>, vector<5x8xf32>, vector<5x8xf32>, vector<5x8xf32> -> vector<5x32xf32>
    %c0_21 = arith.constant 0 : index
    %c0_22 = arith.constant 0 : index
    %c0_23 = arith.constant 0 : index
    %91 = vector.load %arg2[%c0_21, %c0_22, %c0_23] : memref<1x5x32xf32, #tpu.memory_space<vmem>>, vector<1x5x32xf32>
    %92 = vector.shape_cast %91 : vector<1x5x32xf32> to vector<5x32xf32>
    %93 = vector.shape_cast %90 : vector<5x32xf32> to vector<1x5x32xf32>
    tpu.vector_store %arg2[%c0_21, %c0_22, %c0_23], %93 {strides = array<i32>} : memref<1x5x32xf32, #tpu.memory_space<vmem>>, vector<1x5x32xf32>,
    return
  }
  func.func @transform_0(%arg0: i32) -> (i32, i32, i32) {
    %c0_i32 = arith.constant 0 : i32
    %c0_i32_0 = arith.constant 0 : i32
    %c0_i32_1 = arith.constant 0 : i32
    return %arg0, %c0_i32, %c0_i32_0 : i32, i32, i32
  }
  func.func @transform_1(%arg0: i32) -> (i32, i32, i32) {
    %c0_i32 = arith.constant 0 : i32
    %c0_i32_0 = arith.constant 0 : i32
    %c0_i32_1 = arith.constant 0 : i32
    return %arg0, %c0_i32, %c0_i32_0 : i32, i32, i32
  }
}

module attributes {stable_mosaic.version = 11 : i64} {
  func.func @_fused_linear_kernel(%arg0: i32, %arg1: i32, %arg2: memref<20x32xf32, #tpu.memory_space<vmem>>, %arg3: memref<32x128xf32, #tpu.memory_space<vmem>>, %arg4: memref<1x32xf32, #tpu.memory_space<vmem>>, %arg5: memref<1x32xf32, #tpu.memory_space<vmem>>, %arg6: memref<1x128xf32, #tpu.memory_space<vmem>>, %arg7: memref<20x128xf32, #tpu.memory_space<vmem>>) attributes {dimension_semantics = [#tpu.dimension_semantics<parallel>, #tpu.dimension_semantics<parallel>], iteration_bounds = array<i64: 1, 1>, scalar_prefetch = 0 : i64, scratch_operands = 0 : i64, tpu.core_type = #tpu.core_type<tc>, window_params = [{transform_indices = @transform_0, window_bounds = array<i64: 20, 32>}, {transform_indices = @transform_1, window_bounds = array<i64: 32, 128>}, {pipeline_mode = #tpu.pipeline_mode<synchronous>, transform_indices = @transform_2, window_bounds = array<i64: 1, 32>}, {pipeline_mode = #tpu.pipeline_mode<synchronous>, transform_indices = @transform_3, window_bounds = array<i64: 1, 32>}, {transform_indices = @transform_4, window_bounds = array<i64: 1, 128>}, {transform_indices = @transform_5, window_bounds = array<i64: 20, 128>}]} {
    %c0 = arith.constant 0 : index
    %c0_0 = arith.constant 0 : index
    %0 = vector.load %arg2[%c0, %c0_0] : memref<20x32xf32, #tpu.memory_space<vmem>>, vector<20x32xf32>
    %cst = arith.constant dense<0.000000e+00> : vector<20xf32>
    %1 = vector.multi_reduction <add>, %0, %cst [1] : vector<20x32xf32> to vector<20xf32>
    %2 = vector.shape_cast %1 : vector<20xf32> to vector<20x1xf32>
    %cst_1 = arith.constant 3.200000e+01 : f32
    %3 = vector.broadcast %cst_1 : f32 to vector<20x1xf32>
    %4 = arith.divf %2, %3 : vector<20x1xf32>
    %5 = vector.broadcast %4 : vector<20x1xf32> to vector<20x32xf32>
    %6 = arith.subf %0, %5 : vector<20x32xf32>
    %7 = arith.mulf %6, %6 : vector<20x32xf32>
    %cst_2 = arith.constant dense<0.000000e+00> : vector<20xf32>
    %8 = vector.multi_reduction <add>, %7, %cst_2 [1] : vector<20x32xf32> to vector<20xf32>
    %9 = vector.shape_cast %8 : vector<20xf32> to vector<20x1xf32>
    %cst_3 = arith.constant 3.200000e+01 : f32
    %10 = vector.broadcast %cst_3 : f32 to vector<20x1xf32>
    %11 = arith.divf %9, %10 : vector<20x1xf32>
    %12 = vector.broadcast %4 : vector<20x1xf32> to vector<20x32xf32>
    %13 = arith.subf %0, %12 : vector<20x32xf32>
    %cst_4 = arith.constant 9.99999974E-6 : f32
    %14 = vector.broadcast %cst_4 : f32 to vector<20x1xf32>
    %15 = arith.addf %11, %14 : vector<20x1xf32>
    %16 = math.rsqrt %15 : vector<20x1xf32>
    %17 = vector.broadcast %16 : vector<20x1xf32> to vector<20x32xf32>
    %18 = arith.mulf %13, %17 : vector<20x32xf32>
    %c0_5 = arith.constant 0 : index
    %c0_6 = arith.constant 0 : index
    %19 = vector.load %arg4[%c0_5, %c0_6] : memref<1x32xf32, #tpu.memory_space<vmem>>, vector<1x32xf32>
    %20 = vector.broadcast %19 : vector<1x32xf32> to vector<20x32xf32>
    %21 = arith.mulf %18, %20 : vector<20x32xf32>
    %c0_7 = arith.constant 0 : index
    %c0_8 = arith.constant 0 : index
    %22 = vector.load %arg5[%c0_7, %c0_8] : memref<1x32xf32, #tpu.memory_space<vmem>>, vector<1x32xf32>
    %23 = vector.broadcast %22 : vector<1x32xf32> to vector<20x32xf32>
    %24 = arith.addf %21, %23 : vector<20x32xf32>
    %25 = arith.truncf %24 : vector<20x32xf32> to vector<20x32xbf16>
    %c0_9 = arith.constant 0 : index
    %c0_10 = arith.constant 0 : index
    %26 = vector.load %arg3[%c0_9, %c0_10] : memref<32x128xf32, #tpu.memory_space<vmem>>, vector<32x128xf32>
    %27 = arith.truncf %26 : vector<32x128xf32> to vector<32x128xbf16>
    %cst_11 = arith.constant dense<0.000000e+00> : vector<20x128xf32>
    %28 = tpu.matmul %25, %27, %cst_11 {dimension_numbers = #tpu.dot_dimension_numbers<[1], [0], [0], [1], [0, 0, 1, 1], [], []>} : vector<20x32xbf16>, vector<32x128xbf16>, vector<20x128xf32> -> vector<20x128xf32>
    %c0_12 = arith.constant 0 : index
    %c0_13 = arith.constant 0 : index
    %29 = vector.load %arg6[%c0_12, %c0_13] : memref<1x128xf32, #tpu.memory_space<vmem>>, vector<1x128xf32>
    %30 = vector.broadcast %29 : vector<1x128xf32> to vector<20x128xf32>
    %31 = arith.addf %28, %30 : vector<20x128xf32>
    %cst_14 = arith.constant 1.702000e+00 : f32
    %32 = vector.broadcast %cst_14 : f32 to vector<20x128xf32>
    %33 = arith.mulf %32, %31 : vector<20x128xf32>
    %34 = arith.negf %33 : vector<20x128xf32>
    %35 = math.exp %34 : vector<20x128xf32>
    %cst_15 = arith.constant 1.000000e+00 : f32
    %36 = vector.broadcast %cst_15 : f32 to vector<20x128xf32>
    %37 = arith.addf %36, %35 : vector<20x128xf32>
    %38 = arith.divf %36, %37 : vector<20x128xf32>
    %39 = arith.mulf %31, %38 : vector<20x128xf32>
    %c0_16 = arith.constant 0 : index
    %c0_17 = arith.constant 0 : index
    %40 = vector.load %arg7[%c0_16, %c0_17] : memref<20x128xf32, #tpu.memory_space<vmem>>, vector<20x128xf32>
    tpu.vector_store %arg7[%c0_16, %c0_17], %39 {strides = array<i32>} : memref<20x128xf32, #tpu.memory_space<vmem>>, vector<20x128xf32>,
    return
  }
  func.func @transform_0(%arg0: i32, %arg1: i32) -> (i32, i32) {
    %c0_i32 = arith.constant 0 : i32
    %c0_i32_0 = arith.constant 0 : i32
    return %arg0, %c0_i32 : i32, i32
  }
  func.func @transform_1(%arg0: i32, %arg1: i32) -> (i32, i32) {
    %c0_i32 = arith.constant 0 : i32
    %c0_i32_0 = arith.constant 0 : i32
    return %c0_i32, %arg1 : i32, i32
  }
  func.func @transform_2(%arg0: i32, %arg1: i32) -> (i32, i32) {
    %c0_i32 = arith.constant 0 : i32
    %c0_i32_0 = arith.constant 0 : i32
    %c0_i32_1 = arith.constant 0 : i32
    return %c0_i32, %c0_i32_0 : i32, i32
  }
  func.func @transform_3(%arg0: i32, %arg1: i32) -> (i32, i32) {
    %c0_i32 = arith.constant 0 : i32
    %c0_i32_0 = arith.constant 0 : i32
    %c0_i32_1 = arith.constant 0 : i32
    return %c0_i32, %c0_i32_0 : i32, i32
  }
  func.func @transform_4(%arg0: i32, %arg1: i32) -> (i32, i32) {
    %c0_i32 = arith.constant 0 : i32
    %c0_i32_0 = arith.constant 0 : i32
    return %c0_i32, %arg1 : i32, i32
  }
  func.func @transform_5(%arg0: i32, %arg1: i32) -> (i32, i32) {
    %c0_i32 = arith.constant 0 : i32
    return %arg0, %arg1 : i32, i32
  }
}

module attributes {stable_mosaic.version = 11 : i64} {
  func.func @_fused_linear_kernel(%arg0: i32, %arg1: i32, %arg2: memref<20x128xf32, #tpu.memory_space<vmem>>, %arg3: memref<128x32xf32, #tpu.memory_space<vmem>>, %arg4: memref<1x32xf32, #tpu.memory_space<vmem>>, %arg5: memref<20x32xf32, #tpu.memory_space<vmem>>, %arg6: memref<20x32xf32, #tpu.memory_space<vmem>>) attributes {dimension_semantics = [#tpu.dimension_semantics<parallel>, #tpu.dimension_semantics<parallel>], iteration_bounds = array<i64: 1, 1>, scalar_prefetch = 0 : i64, scratch_operands = 0 : i64, tpu.core_type = #tpu.core_type<tc>, window_params = [{transform_indices = @transform_0, window_bounds = array<i64: 20, 128>}, {transform_indices = @transform_1, window_bounds = array<i64: 128, 32>}, {transform_indices = @transform_2, window_bounds = array<i64: 1, 32>}, {transform_indices = @transform_3, window_bounds = array<i64: 20, 32>}, {transform_indices = @transform_4, window_bounds = array<i64: 20, 32>}]} {
    %c0 = arith.constant 0 : index
    %c0_0 = arith.constant 0 : index
    %0 = vector.load %arg2[%c0, %c0_0] : memref<20x128xf32, #tpu.memory_space<vmem>>, vector<20x128xf32>
    %1 = arith.truncf %0 : vector<20x128xf32> to vector<20x128xbf16>
    %c0_1 = arith.constant 0 : index
    %c0_2 = arith.constant 0 : index
    %2 = vector.load %arg3[%c0_1, %c0_2] : memref<128x32xf32, #tpu.memory_space<vmem>>, vector<128x32xf32>
    %3 = arith.truncf %2 : vector<128x32xf32> to vector<128x32xbf16>
    %cst = arith.constant dense<0.000000e+00> : vector<20x32xf32>
    %4 = tpu.matmul %1, %3, %cst {dimension_numbers = #tpu.dot_dimension_numbers<[1], [0], [0], [1], [0, 0, 1, 1], [], []>} : vector<20x128xbf16>, vector<128x32xbf16>, vector<20x32xf32> -> vector<20x32xf32>
    %c0_3 = arith.constant 0 : index
    %c0_4 = arith.constant 0 : index
    %5 = vector.load %arg4[%c0_3, %c0_4] : memref<1x32xf32, #tpu.memory_space<vmem>>, vector<1x32xf32>
    %6 = vector.broadcast %5 : vector<1x32xf32> to vector<20x32xf32>
    %7 = arith.addf %4, %6 : vector<20x32xf32>
    %c0_5 = arith.constant 0 : index
    %c0_6 = arith.constant 0 : index
    %8 = vector.load %arg5[%c0_5, %c0_6] : memref<20x32xf32, #tpu.memory_space<vmem>>, vector<20x32xf32>
    %9 = arith.addf %7, %8 : vector<20x32xf32>
    %c0_7 = arith.constant 0 : index
    %c0_8 = arith.constant 0 : index
    %10 = vector.load %arg6[%c0_7, %c0_8] : memref<20x32xf32, #tpu.memory_space<vmem>>, vector<20x32xf32>
    tpu.vector_store %arg6[%c0_7, %c0_8], %9 {strides = array<i32>} : memref<20x32xf32, #tpu.memory_space<vmem>>, vector<20x32xf32>,
    return
  }
  func.func @transform_0(%arg0: i32, %arg1: i32) -> (i32, i32) {
    %c0_i32 = arith.constant 0 : i32
    %c0_i32_0 = arith.constant 0 : i32
    return %arg0, %c0_i32 : i32, i32
  }
  func.func @transform_1(%arg0: i32, %arg1: i32) -> (i32, i32) {
    %c0_i32 = arith.constant 0 : i32
    %c0_i32_0 = arith.constant 0 : i32
    return %c0_i32, %arg1 : i32, i32
  }
  func.func @transform_2(%arg0: i32, %arg1: i32) -> (i32, i32) {
    %c0_i32 = arith.constant 0 : i32
    %c0_i32_0 = arith.constant 0 : i32
    return %c0_i32, %arg1 : i32, i32
  }
  func.func @transform_3(%arg0: i32, %arg1: i32) -> (i32, i32) {
    %c0_i32 = arith.constant 0 : i32
    return %arg0, %arg1 : i32, i32
  }
  func.func @transform_4(%arg0: i32, %arg1: i32) -> (i32, i32) {
    %c0_i32 = arith.constant 0 : i32
    return %arg0, %arg1 : i32, i32
  }
}

module attributes {stable_mosaic.version = 11 : i64} {
  func.func @_fused_linear_kernel(%arg0: i32, %arg1: i32, %arg2: memref<20x32xf32, #tpu.memory_space<vmem>>, %arg3: memref<32x32xf32, #tpu.memory_space<vmem>>, %arg4: memref<1x32xf32, #tpu.memory_space<vmem>>, %arg5: memref<20x32xf32, #tpu.memory_space<vmem>>, %arg6: memref<20x32xf32, #tpu.memory_space<vmem>>) attributes {dimension_semantics = [#tpu.dimension_semantics<parallel>, #tpu.dimension_semantics<parallel>], iteration_bounds = array<i64: 1, 1>, scalar_prefetch = 0 : i64, scratch_operands = 0 : i64, tpu.core_type = #tpu.core_type<tc>, window_params = [{transform_indices = @transform_0, window_bounds = array<i64: 20, 32>}, {transform_indices = @transform_1, window_bounds = array<i64: 32, 32>}, {transform_indices = @transform_2, window_bounds = array<i64: 1, 32>}, {transform_indices = @transform_3, window_bounds = array<i64: 20, 32>}, {transform_indices = @transform_4, window_bounds = array<i64: 20, 32>}]} {
    %c0 = arith.constant 0 : index
    %c0_0 = arith.constant 0 : index
    %0 = vector.load %arg2[%c0, %c0_0] : memref<20x32xf32, #tpu.memory_space<vmem>>, vector<20x32xf32>
    %1 = arith.truncf %0 : vector<20x32xf32> to vector<20x32xbf16>
    %c0_1 = arith.constant 0 : index
    %c0_2 = arith.constant 0 : index
    %2 = vector.load %arg3[%c0_1, %c0_2] : memref<32x32xf32, #tpu.memory_space<vmem>>, vector<32x32xf32>
    %3 = arith.truncf %2 : vector<32x32xf32> to vector<32x32xbf16>
    %cst = arith.constant dense<0.000000e+00> : vector<20x32xf32>
    %4 = tpu.matmul %1, %3, %cst {dimension_numbers = #tpu.dot_dimension_numbers<[1], [0], [0], [1], [0, 0, 1, 1], [], []>} : vector<20x32xbf16>, vector<32x32xbf16>, vector<20x32xf32> -> vector<20x32xf32>
    %c0_3 = arith.constant 0 : index
    %c0_4 = arith.constant 0 : index
    %5 = vector.load %arg4[%c0_3, %c0_4] : memref<1x32xf32, #tpu.memory_space<vmem>>, vector<1x32xf32>
    %6 = vector.broadcast %5 : vector<1x32xf32> to vector<20x32xf32>
    %7 = arith.addf %4, %6 : vector<20x32xf32>
    %c0_5 = arith.constant 0 : index
    %c0_6 = arith.constant 0 : index
    %8 = vector.load %arg5[%c0_5, %c0_6] : memref<20x32xf32, #tpu.memory_space<vmem>>, vector<20x32xf32>
    %9 = arith.addf %7, %8 : vector<20x32xf32>
    %c0_7 = arith.constant 0 : index
    %c0_8 = arith.constant 0 : index
    %10 = vector.load %arg6[%c0_7, %c0_8] : memref<20x32xf32, #tpu.memory_space<vmem>>, vector<20x32xf32>
    tpu.vector_store %arg6[%c0_7, %c0_8], %9 {strides = array<i32>} : memref<20x32xf32, #tpu.memory_space<vmem>>, vector<20x32xf32>,
    return
  }
  func.func @transform_0(%arg0: i32, %arg1: i32) -> (i32, i32) {
    %c0_i32 = arith.constant 0 : i32
    %c0_i32_0 = arith.constant 0 : i32
    return %arg0, %c0_i32 : i32, i32
  }
  func.func @transform_1(%arg0: i32, %arg1: i32) -> (i32, i32) {
    %c0_i32 = arith.constant 0 : i32
    %c0_i32_0 = arith.constant 0 : i32
    return %c0_i32, %arg1 : i32, i32
  }
  func.func @transform_2(%arg0: i32, %arg1: i32) -> (i32, i32) {
    %c0_i32 = arith.constant 0 : i32
    %c0_i32_0 = arith.constant 0 : i32
    return %c0_i32, %arg1 : i32, i32
  }
  func.func @transform_3(%arg0: i32, %arg1: i32) -> (i32, i32) {
    %c0_i32 = arith.constant 0 : i32
    return %arg0, %arg1 : i32, i32
  }
  func.func @transform_4(%arg0: i32, %arg1: i32) -> (i32, i32) {
    %c0_i32 = arith.constant 0 : i32
    return %arg0, %arg1 : i32, i32
  }
}

module attributes {stable_mosaic.version = 11 : i64} {
  func.func @_fused_linear_kernel(%arg0: i32, %arg1: i32, %arg2: memref<20x32xf32, #tpu.memory_space<vmem>>, %arg3: memref<32x16xf32, #tpu.memory_space<vmem>>, %arg4: memref<1x32xf32, #tpu.memory_space<vmem>>, %arg5: memref<1x32xf32, #tpu.memory_space<vmem>>, %arg6: memref<20x16xf32, #tpu.memory_space<vmem>>) attributes {dimension_semantics = [#tpu.dimension_semantics<parallel>, #tpu.dimension_semantics<parallel>], iteration_bounds = array<i64: 1, 1>, scalar_prefetch = 0 : i64, scratch_operands = 0 : i64, tpu.core_type = #tpu.core_type<tc>, window_params = [{transform_indices = @transform_0, window_bounds = array<i64: 20, 32>}, {transform_indices = @transform_1, window_bounds = array<i64: 32, 16>}, {pipeline_mode = #tpu.pipeline_mode<synchronous>, transform_indices = @transform_2, window_bounds = array<i64: 1, 32>}, {pipeline_mode = #tpu.pipeline_mode<synchronous>, transform_indices = @transform_3, window_bounds = array<i64: 1, 32>}, {transform_indices = @transform_4, window_bounds = array<i64: 20, 16>}]} {
    %c0 = arith.constant 0 : index
    %c0_0 = arith.constant 0 : index
    %0 = vector.load %arg2[%c0, %c0_0] : memref<20x32xf32, #tpu.memory_space<vmem>>, vector<20x32xf32>
    %cst = arith.constant dense<0.000000e+00> : vector<20xf32>
    %1 = vector.multi_reduction <add>, %0, %cst [1] : vector<20x32xf32> to vector<20xf32>
    %2 = vector.shape_cast %1 : vector<20xf32> to vector<20x1xf32>
    %cst_1 = arith.constant 3.200000e+01 : f32
    %3 = vector.broadcast %cst_1 : f32 to vector<20x1xf32>
    %4 = arith.divf %2, %3 : vector<20x1xf32>
    %5 = vector.broadcast %4 : vector<20x1xf32> to vector<20x32xf32>
    %6 = arith.subf %0, %5 : vector<20x32xf32>
    %7 = arith.mulf %6, %6 : vector<20x32xf32>
    %cst_2 = arith.constant dense<0.000000e+00> : vector<20xf32>
    %8 = vector.multi_reduction <add>, %7, %cst_2 [1] : vector<20x32xf32> to vector<20xf32>
    %9 = vector.shape_cast %8 : vector<20xf32> to vector<20x1xf32>
    %cst_3 = arith.constant 3.200000e+01 : f32
    %10 = vector.broadcast %cst_3 : f32 to vector<20x1xf32>
    %11 = arith.divf %9, %10 : vector<20x1xf32>
    %12 = vector.broadcast %4 : vector<20x1xf32> to vector<20x32xf32>
    %13 = arith.subf %0, %12 : vector<20x32xf32>
    %cst_4 = arith.constant 9.99999974E-6 : f32
    %14 = vector.broadcast %cst_4 : f32 to vector<20x1xf32>
    %15 = arith.addf %11, %14 : vector<20x1xf32>
    %16 = math.rsqrt %15 : vector<20x1xf32>
    %17 = vector.broadcast %16 : vector<20x1xf32> to vector<20x32xf32>
    %18 = arith.mulf %13, %17 : vector<20x32xf32>
    %c0_5 = arith.constant 0 : index
    %c0_6 = arith.constant 0 : index
    %19 = vector.load %arg4[%c0_5, %c0_6] : memref<1x32xf32, #tpu.memory_space<vmem>>, vector<1x32xf32>
    %20 = vector.broadcast %19 : vector<1x32xf32> to vector<20x32xf32>
    %21 = arith.mulf %18, %20 : vector<20x32xf32>
    %c0_7 = arith.constant 0 : index
    %c0_8 = arith.constant 0 : index
    %22 = vector.load %arg5[%c0_7, %c0_8] : memref<1x32xf32, #tpu.memory_space<vmem>>, vector<1x32xf32>
    %23 = vector.broadcast %22 : vector<1x32xf32> to vector<20x32xf32>
    %24 = arith.addf %21, %23 : vector<20x32xf32>
    %25 = arith.truncf %24 : vector<20x32xf32> to vector<20x32xbf16>
    %c0_9 = arith.constant 0 : index
    %c0_10 = arith.constant 0 : index
    %26 = vector.load %arg3[%c0_9, %c0_10] : memref<32x16xf32, #tpu.memory_space<vmem>>, vector<32x16xf32>
    %27 = arith.truncf %26 : vector<32x16xf32> to vector<32x16xbf16>
    %cst_11 = arith.constant dense<0.000000e+00> : vector<20x16xf32>
    %28 = tpu.matmul %25, %27, %cst_11 {dimension_numbers = #tpu.dot_dimension_numbers<[1], [0], [0], [1], [0, 0, 1, 1], [], []>} : vector<20x32xbf16>, vector<32x16xbf16>, vector<20x16xf32> -> vector<20x16xf32>
    %c0_12 = arith.constant 0 : index
    %c0_13 = arith.constant 0 : index
    %29 = vector.load %arg6[%c0_12, %c0_13] : memref<20x16xf32, #tpu.memory_space<vmem>>, vector<20x16xf32>
    tpu.vector_store %arg6[%c0_12, %c0_13], %28 {strides = array<i32>} : memref<20x16xf32, #tpu.memory_space<vmem>>, vector<20x16xf32>,
    return
  }
  func.func @transform_0(%arg0: i32, %arg1: i32) -> (i32, i32) {
    %c0_i32 = arith.constant 0 : i32
    %c0_i32_0 = arith.constant 0 : i32
    return %arg0, %c0_i32 : i32, i32
  }
  func.func @transform_1(%arg0: i32, %arg1: i32) -> (i32, i32) {
    %c0_i32 = arith.constant 0 : i32
    %c0_i32_0 = arith.constant 0 : i32
    return %c0_i32, %arg1 : i32, i32
  }
  func.func @transform_2(%arg0: i32, %arg1: i32) -> (i32, i32) {
    %c0_i32 = arith.constant 0 : i32
    %c0_i32_0 = arith.constant 0 : i32
    %c0_i32_1 = arith.constant 0 : i32
    return %c0_i32, %c0_i32_0 : i32, i32
  }
  func.func @transform_3(%arg0: i32, %arg1: i32) -> (i32, i32) {
    %c0_i32 = arith.constant 0 : i32
    %c0_i32_0 = arith.constant 0 : i32
    %c0_i32_1 = arith.constant 0 : i32
    return %c0_i32, %c0_i32_0 : i32, i32
  }
  func.func @transform_4(%arg0: i32, %arg1: i32) -> (i32, i32) {
    %c0_i32 = arith.constant 0 : i32
    return %arg0, %arg1 : i32, i32
  }
}

module attributes {stable_mosaic.version = 11 : i64} {
  func.func @_fused_linear_kernel(%arg0: i32, %arg1: i32, %arg2: memref<32x16xf32, #tpu.memory_space<vmem>>, %arg3: memref<16x48xf32, #tpu.memory_space<vmem>>, %arg4: memref<1x16xf32, #tpu.memory_space<vmem>>, %arg5: memref<1x16xf32, #tpu.memory_space<vmem>>, %arg6: memref<1x48xf32, #tpu.memory_space<vmem>>, %arg7: memref<32x48xf32, #tpu.memory_space<vmem>>) attributes {dimension_semantics = [#tpu.dimension_semantics<parallel>, #tpu.dimension_semantics<parallel>], iteration_bounds = array<i64: 1, 1>, scalar_prefetch = 0 : i64, scratch_operands = 0 : i64, tpu.core_type = #tpu.core_type<tc>, window_params = [{transform_indices = @transform_0, window_bounds = array<i64: 32, 16>}, {transform_indices = @transform_1, window_bounds = array<i64: 16, 48>}, {pipeline_mode = #tpu.pipeline_mode<synchronous>, transform_indices = @transform_2, window_bounds = array<i64: 1, 16>}, {pipeline_mode = #tpu.pipeline_mode<synchronous>, transform_indices = @transform_3, window_bounds = array<i64: 1, 16>}, {transform_indices = @transform_4, window_bounds = array<i64: 1, 48>}, {transform_indices = @transform_5, window_bounds = array<i64: 32, 48>}]} {
    %c0 = arith.constant 0 : index
    %c0_0 = arith.constant 0 : index
    %0 = vector.load %arg2[%c0, %c0_0] : memref<32x16xf32, #tpu.memory_space<vmem>>, vector<32x16xf32>
    %cst = arith.constant dense<0.000000e+00> : vector<32xf32>
    %1 = vector.multi_reduction <add>, %0, %cst [1] : vector<32x16xf32> to vector<32xf32>
    %2 = vector.shape_cast %1 : vector<32xf32> to vector<32x1xf32>
    %cst_1 = arith.constant 1.600000e+01 : f32
    %3 = vector.broadcast %cst_1 : f32 to vector<32x1xf32>
    %4 = arith.divf %2, %3 : vector<32x1xf32>
    %5 = vector.broadcast %4 : vector<32x1xf32> to vector<32x16xf32>
    %6 = arith.subf %0, %5 : vector<32x16xf32>
    %7 = arith.mulf %6, %6 : vector<32x16xf32>
    %cst_2 = arith.constant dense<0.000000e+00> : vector<32xf32>
    %8 = vector.multi_reduction <add>, %7, %cst_2 [1] : vector<32x16xf32> to vector<32xf32>
    %9 = vector.shape_cast %8 : vector<32xf32> to vector<32x1xf32>
    %cst_3 = arith.constant 1.600000e+01 : f32
    %10 = vector.broadcast %cst_3 : f32 to vector<32x1xf32>
    %11 = arith.divf %9, %10 : vector<32x1xf32>
    %12 = vector.broadcast %4 : vector<32x1xf32> to vector<32x16xf32>
    %13 = arith.subf %0, %12 : vector<32x16xf32>
    %cst_4 = arith.constant 9.99999974E-6 : f32
    %14 = vector.broadcast %cst_4 : f32 to vector<32x1xf32>
    %15 = arith.addf %11, %14 : vector<32x1xf32>
    %16 = math.rsqrt %15 : vector<32x1xf32>
    %17 = vector.broadcast %16 : vector<32x1xf32> to vector<32x16xf32>
    %18 = arith.mulf %13, %17 : vector<32x16xf32>
    %c0_5 = arith.constant 0 : index
    %c0_6 = arith.constant 0 : index
    %19 = vector.load %arg4[%c0_5, %c0_6] : memref<1x16xf32, #tpu.memory_space<vmem>>, vector<1x16xf32>
    %20 = vector.broadcast %19 : vector<1x16xf32> to vector<32x16xf32>
    %21 = arith.mulf %18, %20 : vector<32x16xf32>
    %c0_7 = arith.constant 0 : index
    %c0_8 = arith.constant 0 : index
    %22 = vector.load %arg5[%c0_7, %c0_8] : memref<1x16xf32, #tpu.memory_space<vmem>>, vector<1x16xf32>
    %23 = vector.broadcast %22 : vector<1x16xf32> to vector<32x16xf32>
    %24 = arith.addf %21, %23 : vector<32x16xf32>
    %25 = arith.truncf %24 : vector<32x16xf32> to vector<32x16xbf16>
    %c0_9 = arith.constant 0 : index
    %c0_10 = arith.constant 0 : index
    %26 = vector.load %arg3[%c0_9, %c0_10] : memref<16x48xf32, #tpu.memory_space<vmem>>, vector<16x48xf32>
    %27 = arith.truncf %26 : vector<16x48xf32> to vector<16x48xbf16>
    %cst_11 = arith.constant dense<0.000000e+00> : vector<32x48xf32>
    %28 = tpu.matmul %25, %27, %cst_11 {dimension_numbers = #tpu.dot_dimension_numbers<[1], [0], [0], [1], [0, 0, 1, 1], [], []>} : vector<32x16xbf16>, vector<16x48xbf16>, vector<32x48xf32> -> vector<32x48xf32>
    %c0_12 = arith.constant 0 : index
    %c0_13 = arith.constant 0 : index
    %29 = vector.load %arg6[%c0_12, %c0_13] : memref<1x48xf32, #tpu.memory_space<vmem>>, vector<1x48xf32>
    %30 = vector.broadcast %29 : vector<1x48xf32> to vector<32x48xf32>
    %31 = arith.addf %28, %30 : vector<32x48xf32>
    %c0_14 = arith.constant 0 : index
    %c0_15 = arith.constant 0 : index
    %32 = vector.load %arg7[%c0_14, %c0_15] : memref<32x48xf32, #tpu.memory_space<vmem>>, vector<32x48xf32>
    tpu.vector_store %arg7[%c0_14, %c0_15], %31 {strides = array<i32>} : memref<32x48xf32, #tpu.memory_space<vmem>>, vector<32x48xf32>,
    return
  }
  func.func @transform_0(%arg0: i32, %arg1: i32) -> (i32, i32) {
    %c0_i32 = arith.constant 0 : i32
    %c0_i32_0 = arith.constant 0 : i32
    return %arg0, %c0_i32 : i32, i32
  }
  func.func @transform_1(%arg0: i32, %arg1: i32) -> (i32, i32) {
    %c0_i32 = arith.constant 0 : i32
    %c0_i32_0 = arith.constant 0 : i32
    return %c0_i32, %arg1 : i32, i32
  }
  func.func @transform_2(%arg0: i32, %arg1: i32) -> (i32, i32) {
    %c0_i32 = arith.constant 0 : i32
    %c0_i32_0 = arith.constant 0 : i32
    %c0_i32_1 = arith.constant 0 : i32
    return %c0_i32, %c0_i32_0 : i32, i32
  }
  func.func @transform_3(%arg0: i32, %arg1: i32) -> (i32, i32) {
    %c0_i32 = arith.constant 0 : i32
    %c0_i32_0 = arith.constant 0 : i32
    %c0_i32_1 = arith.constant 0 : i32
    return %c0_i32, %c0_i32_0 : i32, i32
  }
  func.func @transform_4(%arg0: i32, %arg1: i32) -> (i32, i32) {
    %c0_i32 = arith.constant 0 : i32
    %c0_i32_0 = arith.constant 0 : i32
    return %c0_i32, %arg1 : i32, i32
  }
  func.func @transform_5(%arg0: i32, %arg1: i32) -> (i32, i32) {
    %c0_i32 = arith.constant 0 : i32
    return %arg0, %arg1 : i32, i32
  }
}

module attributes {stable_mosaic.version = 11 : i64} {
  func.func @_attn_fused_kernel(%arg0: i32, %arg1: memref<1x8x48xf32, #tpu.memory_space<vmem>>, %arg2: memref<1x8x8xf32, #tpu.memory_space<vmem>>, %arg3: memref<1x8x16xf32, #tpu.memory_space<vmem>>) attributes {dimension_semantics = [#tpu.dimension_semantics<parallel>], iteration_bounds = array<i64: 4>, scalar_prefetch = 0 : i64, scratch_operands = 0 : i64, tpu.core_type = #tpu.core_type<tc>, window_params = [{transform_indices = @transform_0, window_bounds = array<i64: 1, 8, 48>}, {pipeline_mode = #tpu.pipeline_mode<synchronous>, transform_indices = @transform_1, window_bounds = array<i64: 1, 8, 8>}, {transform_indices = @transform_2, window_bounds = array<i64: 1, 8, 16>}]} {
    %c0 = arith.constant 0 : index
    %c0_0 = arith.constant 0 : index
    %c0_1 = arith.constant 0 : index
    %0 = vector.load %arg1[%c0, %c0_0, %c0_1] : memref<1x8x48xf32, #tpu.memory_space<vmem>>, vector<1x8x48xf32>
    %1 = vector.shape_cast %0 : vector<1x8x48xf32> to vector<8x48xf32>
    %2 = vector.extract_strided_slice %1 {offsets = [0, 0], sizes = [8, 8], strides = [1, 1]} : vector<8x48xf32> to vector<8x8xf32>
    %3 = vector.extract_strided_slice %1 {offsets = [0, 16], sizes = [8, 8], strides = [1, 1]} : vector<8x48xf32> to vector<8x8xf32>
    %4 = vector.extract_strided_slice %1 {offsets = [0, 32], sizes = [8, 8], strides = [1, 1]} : vector<8x48xf32> to vector<8x8xf32>
    %5 = arith.truncf %2 : vector<8x8xf32> to vector<8x8xbf16>
    %6 = arith.truncf %3 : vector<8x8xf32> to vector<8x8xbf16>
    %7 = tpu.transpose %6, [1, 0] : vector<8x8xbf16> -> vector<8x8xbf16>
    %cst = arith.constant dense<0.000000e+00> : vector<8x8xf32>
    %8 = tpu.matmul %5, %7, %cst {dimension_numbers = #tpu.dot_dimension_numbers<[1], [0], [0], [1], [0, 0, 1, 1], [], []>} : vector<8x8xbf16>, vector<8x8xbf16>, vector<8x8xf32> -> vector<8x8xf32>
    %cst_2 = arith.constant 0.353553385 : f32
    %9 = vector.broadcast %cst_2 : f32 to vector<8x8xf32>
    %10 = arith.mulf %8, %9 : vector<8x8xf32>
    %c0_3 = arith.constant 0 : index
    %c0_4 = arith.constant 0 : index
    %c0_5 = arith.constant 0 : index
    %11 = vector.load %arg2[%c0_3, %c0_4, %c0_5] : memref<1x8x8xf32, #tpu.memory_space<vmem>>, vector<1x8x8xf32>
    %12 = vector.shape_cast %11 : vector<1x8x8xf32> to vector<8x8xf32>
    %13 = arith.addf %10, %12 : vector<8x8xf32>
    %cst_6 = arith.constant dense<0xFF800000> : vector<8xf32>
    %14 = vector.multi_reduction <maximumf>, %13, %cst_6 [1] : vector<8x8xf32> to vector<8xf32>
    %15 = vector.shape_cast %14 : vector<8xf32> to vector<8x1xf32>
    %16 = vector.broadcast %15 : vector<8x1xf32> to vector<8x8xf32>
    %17 = arith.subf %13, %16 : vector<8x8xf32>
    %18 = math.exp %17 : vector<8x8xf32>
    %cst_7 = arith.constant dense<0.000000e+00> : vector<8xf32>
    %19 = vector.multi_reduction <add>, %18, %cst_7 [1] : vector<8x8xf32> to vector<8xf32>
    %20 = vector.shape_cast %19 : vector<8xf32> to vector<8x1xf32>
    %21 = tpu.reciprocal %20 {approx = true} : vector<8x1xf32> -> vector<8x1xf32>
    %22 = vector.broadcast %21 : vector<8x1xf32> to vector<8x8xf32>
    %23 = arith.mulf %18, %22 : vector<8x8xf32>
    %24 = arith.truncf %23 : vector<8x8xf32> to vector<8x8xbf16>
    %25 = arith.truncf %4 : vector<8x8xf32> to vector<8x8xbf16>
    %cst_8 = arith.constant dense<0.000000e+00> : vector<8x8xf32>
    %26 = tpu.matmul %24, %25, %cst_8 {dimension_numbers = #tpu.dot_dimension_numbers<[1], [0], [0], [1], [0, 0, 1, 1], [], []>} : vector<8x8xbf16>, vector<8x8xbf16>, vector<8x8xf32> -> vector<8x8xf32>
    %27 = vector.extract_strided_slice %1 {offsets = [0, 8], sizes = [8, 8], strides = [1, 1]} : vector<8x48xf32> to vector<8x8xf32>
    %28 = vector.extract_strided_slice %1 {offsets = [0, 24], sizes = [8, 8], strides = [1, 1]} : vector<8x48xf32> to vector<8x8xf32>
    %29 = vector.extract_strided_slice %1 {offsets = [0, 40], sizes = [8, 8], strides = [1, 1]} : vector<8x48xf32> to vector<8x8xf32>
    %30 = arith.truncf %27 : vector<8x8xf32> to vector<8x8xbf16>
    %31 = arith.truncf %28 : vector<8x8xf32> to vector<8x8xbf16>
    %32 = tpu.transpose %31, [1, 0] : vector<8x8xbf16> -> vector<8x8xbf16>
    %cst_9 = arith.constant dense<0.000000e+00> : vector<8x8xf32>
    %33 = tpu.matmul %30, %32, %cst_9 {dimension_numbers = #tpu.dot_dimension_numbers<[1], [0], [0], [1], [0, 0, 1, 1], [], []>} : vector<8x8xbf16>, vector<8x8xbf16>, vector<8x8xf32> -> vector<8x8xf32>
    %cst_10 = arith.constant 0.353553385 : f32
    %34 = vector.broadcast %cst_10 : f32 to vector<8x8xf32>
    %35 = arith.mulf %33, %34 : vector<8x8xf32>
    %c0_11 = arith.constant 0 : index
    %c0_12 = arith.constant 0 : index
    %c0_13 = arith.constant 0 : index
    %36 = vector.load %arg2[%c0_11, %c0_12, %c0_13] : memref<1x8x8xf32, #tpu.memory_space<vmem>>, vector<1x8x8xf32>
    %37 = vector.shape_cast %36 : vector<1x8x8xf32> to vector<8x8xf32>
    %38 = arith.addf %35, %37 : vector<8x8xf32>
    %cst_14 = arith.constant dense<0xFF800000> : vector<8xf32>
    %39 = vector.multi_reduction <maximumf>, %38, %cst_14 [1] : vector<8x8xf32> to vector<8xf32>
    %40 = vector.shape_cast %39 : vector<8xf32> to vector<8x1xf32>
    %41 = vector.broadcast %40 : vector<8x1xf32> to vector<8x8xf32>
    %42 = arith.subf %38, %41 : vector<8x8xf32>
    %43 = math.exp %42 : vector<8x8xf32>
    %cst_15 = arith.constant dense<0.000000e+00> : vector<8xf32>
    %44 = vector.multi_reduction <add>, %43, %cst_15 [1] : vector<8x8xf32> to vector<8xf32>
    %45 = vector.shape_cast %44 : vector<8xf32> to vector<8x1xf32>
    %46 = tpu.reciprocal %45 {approx = true} : vector<8x1xf32> -> vector<8x1xf32>
    %47 = vector.broadcast %46 : vector<8x1xf32> to vector<8x8xf32>
    %48 = arith.mulf %43, %47 : vector<8x8xf32>
    %49 = arith.truncf %48 : vector<8x8xf32> to vector<8x8xbf16>
    %50 = arith.truncf %29 : vector<8x8xf32> to vector<8x8xbf16>
    %cst_16 = arith.constant dense<0.000000e+00> : vector<8x8xf32>
    %51 = tpu.matmul %49, %50, %cst_16 {dimension_numbers = #tpu.dot_dimension_numbers<[1], [0], [0], [1], [0, 0, 1, 1], [], []>} : vector<8x8xbf16>, vector<8x8xbf16>, vector<8x8xf32> -> vector<8x8xf32>
    %52 = tpu.concatenate %26, %51 in 1 : vector<8x8xf32>, vector<8x8xf32> -> vector<8x16xf32>
    %c0_17 = arith.constant 0 : index
    %c0_18 = arith.constant 0 : index
    %c0_19 = arith.constant 0 : index
    %53 = vector.load %arg3[%c0_17, %c0_18, %c0_19] : memref<1x8x16xf32, #tpu.memory_space<vmem>>, vector<1x8x16xf32>
    %54 = vector.shape_cast %53 : vector<1x8x16xf32> to vector<8x16xf32>
    %55 = vector.shape_cast %52 : vector<8x16xf32> to vector<1x8x16xf32>
    tpu.vector_store %arg3[%c0_17, %c0_18, %c0_19], %55 {strides = array<i32>} : memref<1x8x16xf32, #tpu.memory_space<vmem>>, vector<1x8x16xf32>,
    return
  }
  func.func @transform_0(%arg0: i32) -> (i32, i32, i32) {
    %c0_i32 = arith.constant 0 : i32
    %c0_i32_0 = arith.constant 0 : i32
    %c0_i32_1 = arith.constant 0 : i32
    return %arg0, %c0_i32, %c0_i32_0 : i32, i32, i32
  }
  func.func @transform_1(%arg0: i32) -> (i32, i32, i32) {
    %c0_i32 = arith.constant 0 : i32
    %c0_i32_0 = arith.constant 0 : i32
    %c0_i32_1 = arith.constant 0 : i32
    %c0_i32_2 = arith.constant 0 : i32
    return %c0_i32, %c0_i32_0, %c0_i32_1 : i32, i32, i32
  }
  func.func @transform_2(%arg0: i32) -> (i32, i32, i32) {
    %c0_i32 = arith.constant 0 : i32
    %c0_i32_0 = arith.constant 0 : i32
    %c0_i32_1 = arith.constant 0 : i32
    return %arg0, %c0_i32, %c0_i32_0 : i32, i32, i32
  }
}

module attributes {stable_mosaic.version = 11 : i64} {
  func.func @_fused_linear_kernel(%arg0: i32, %arg1: i32, %arg2: memref<32x16xf32, #tpu.memory_space<vmem>>, %arg3: memref<16x16xf32, #tpu.memory_space<vmem>>, %arg4: memref<1x16xf32, #tpu.memory_space<vmem>>, %arg5: memref<32x16xf32, #tpu.memory_space<vmem>>, %arg6: memref<32x16xf32, #tpu.memory_space<vmem>>) attributes {dimension_semantics = [#tpu.dimension_semantics<parallel>, #tpu.dimension_semantics<parallel>], iteration_bounds = array<i64: 1, 1>, scalar_prefetch = 0 : i64, scratch_operands = 0 : i64, tpu.core_type = #tpu.core_type<tc>, window_params = [{transform_indices = @transform_0, window_bounds = array<i64: 32, 16>}, {transform_indices = @transform_1, window_bounds = array<i64: 16, 16>}, {transform_indices = @transform_2, window_bounds = array<i64: 1, 16>}, {transform_indices = @transform_3, window_bounds = array<i64: 32, 16>}, {transform_indices = @transform_4, window_bounds = array<i64: 32, 16>}]} {
    %c0 = arith.constant 0 : index
    %c0_0 = arith.constant 0 : index
    %0 = vector.load %arg2[%c0, %c0_0] : memref<32x16xf32, #tpu.memory_space<vmem>>, vector<32x16xf32>
    %1 = arith.truncf %0 : vector<32x16xf32> to vector<32x16xbf16>
    %c0_1 = arith.constant 0 : index
    %c0_2 = arith.constant 0 : index
    %2 = vector.load %arg3[%c0_1, %c0_2] : memref<16x16xf32, #tpu.memory_space<vmem>>, vector<16x16xf32>
    %3 = arith.truncf %2 : vector<16x16xf32> to vector<16x16xbf16>
    %cst = arith.constant dense<0.000000e+00> : vector<32x16xf32>
    %4 = tpu.matmul %1, %3, %cst {dimension_numbers = #tpu.dot_dimension_numbers<[1], [0], [0], [1], [0, 0, 1, 1], [], []>} : vector<32x16xbf16>, vector<16x16xbf16>, vector<32x16xf32> -> vector<32x16xf32>
    %c0_3 = arith.constant 0 : index
    %c0_4 = arith.constant 0 : index
    %5 = vector.load %arg4[%c0_3, %c0_4] : memref<1x16xf32, #tpu.memory_space<vmem>>, vector<1x16xf32>
    %6 = vector.broadcast %5 : vector<1x16xf32> to vector<32x16xf32>
    %7 = arith.addf %4, %6 : vector<32x16xf32>
    %c0_5 = arith.constant 0 : index
    %c0_6 = arith.constant 0 : index
    %8 = vector.load %arg5[%c0_5, %c0_6] : memref<32x16xf32, #tpu.memory_space<vmem>>, vector<32x16xf32>
    %9 = arith.addf %7, %8 : vector<32x16xf32>
    %c0_7 = arith.constant 0 : index
    %c0_8 = arith.constant 0 : index
    %10 = vector.load %arg6[%c0_7, %c0_8] : memref<32x16xf32, #tpu.memory_space<vmem>>, vector<32x16xf32>
    tpu.vector_store %arg6[%c0_7, %c0_8], %9 {strides = array<i32>} : memref<32x16xf32, #tpu.memory_space<vmem>>, vector<32x16xf32>,
    return
  }
  func.func @transform_0(%arg0: i32, %arg1: i32) -> (i32, i32) {
    %c0_i32 = arith.constant 0 : i32
    %c0_i32_0 = arith.constant 0 : i32
    return %arg0, %c0_i32 : i32, i32
  }
  func.func @transform_1(%arg0: i32, %arg1: i32) -> (i32, i32) {
    %c0_i32 = arith.constant 0 : i32
    %c0_i32_0 = arith.constant 0 : i32
    return %c0_i32, %arg1 : i32, i32
  }
  func.func @transform_2(%arg0: i32, %arg1: i32) -> (i32, i32) {
    %c0_i32 = arith.constant 0 : i32
    %c0_i32_0 = arith.constant 0 : i32
    return %c0_i32, %arg1 : i32, i32
  }
  func.func @transform_3(%arg0: i32, %arg1: i32) -> (i32, i32) {
    %c0_i32 = arith.constant 0 : i32
    return %arg0, %arg1 : i32, i32
  }
  func.func @transform_4(%arg0: i32, %arg1: i32) -> (i32, i32) {
    %c0_i32 = arith.constant 0 : i32
    return %arg0, %arg1 : i32, i32
  }
}

module attributes {stable_mosaic.version = 11 : i64} {
  func.func @_fused_linear_kernel(%arg0: i32, %arg1: i32, %arg2: memref<32x16xf32, #tpu.memory_space<vmem>>, %arg3: memref<16x64xf32, #tpu.memory_space<vmem>>, %arg4: memref<1x16xf32, #tpu.memory_space<vmem>>, %arg5: memref<1x16xf32, #tpu.memory_space<vmem>>, %arg6: memref<1x64xf32, #tpu.memory_space<vmem>>, %arg7: memref<32x64xf32, #tpu.memory_space<vmem>>) attributes {dimension_semantics = [#tpu.dimension_semantics<parallel>, #tpu.dimension_semantics<parallel>], iteration_bounds = array<i64: 1, 1>, scalar_prefetch = 0 : i64, scratch_operands = 0 : i64, tpu.core_type = #tpu.core_type<tc>, window_params = [{transform_indices = @transform_0, window_bounds = array<i64: 32, 16>}, {transform_indices = @transform_1, window_bounds = array<i64: 16, 64>}, {pipeline_mode = #tpu.pipeline_mode<synchronous>, transform_indices = @transform_2, window_bounds = array<i64: 1, 16>}, {pipeline_mode = #tpu.pipeline_mode<synchronous>, transform_indices = @transform_3, window_bounds = array<i64: 1, 16>}, {transform_indices = @transform_4, window_bounds = array<i64: 1, 64>}, {transform_indices = @transform_5, window_bounds = array<i64: 32, 64>}]} {
    %c0 = arith.constant 0 : index
    %c0_0 = arith.constant 0 : index
    %0 = vector.load %arg2[%c0, %c0_0] : memref<32x16xf32, #tpu.memory_space<vmem>>, vector<32x16xf32>
    %cst = arith.constant dense<0.000000e+00> : vector<32xf32>
    %1 = vector.multi_reduction <add>, %0, %cst [1] : vector<32x16xf32> to vector<32xf32>
    %2 = vector.shape_cast %1 : vector<32xf32> to vector<32x1xf32>
    %cst_1 = arith.constant 1.600000e+01 : f32
    %3 = vector.broadcast %cst_1 : f32 to vector<32x1xf32>
    %4 = arith.divf %2, %3 : vector<32x1xf32>
    %5 = vector.broadcast %4 : vector<32x1xf32> to vector<32x16xf32>
    %6 = arith.subf %0, %5 : vector<32x16xf32>
    %7 = arith.mulf %6, %6 : vector<32x16xf32>
    %cst_2 = arith.constant dense<0.000000e+00> : vector<32xf32>
    %8 = vector.multi_reduction <add>, %7, %cst_2 [1] : vector<32x16xf32> to vector<32xf32>
    %9 = vector.shape_cast %8 : vector<32xf32> to vector<32x1xf32>
    %cst_3 = arith.constant 1.600000e+01 : f32
    %10 = vector.broadcast %cst_3 : f32 to vector<32x1xf32>
    %11 = arith.divf %9, %10 : vector<32x1xf32>
    %12 = vector.broadcast %4 : vector<32x1xf32> to vector<32x16xf32>
    %13 = arith.subf %0, %12 : vector<32x16xf32>
    %cst_4 = arith.constant 9.99999974E-6 : f32
    %14 = vector.broadcast %cst_4 : f32 to vector<32x1xf32>
    %15 = arith.addf %11, %14 : vector<32x1xf32>
    %16 = math.rsqrt %15 : vector<32x1xf32>
    %17 = vector.broadcast %16 : vector<32x1xf32> to vector<32x16xf32>
    %18 = arith.mulf %13, %17 : vector<32x16xf32>
    %c0_5 = arith.constant 0 : index
    %c0_6 = arith.constant 0 : index
    %19 = vector.load %arg4[%c0_5, %c0_6] : memref<1x16xf32, #tpu.memory_space<vmem>>, vector<1x16xf32>
    %20 = vector.broadcast %19 : vector<1x16xf32> to vector<32x16xf32>
    %21 = arith.mulf %18, %20 : vector<32x16xf32>
    %c0_7 = arith.constant 0 : index
    %c0_8 = arith.constant 0 : index
    %22 = vector.load %arg5[%c0_7, %c0_8] : memref<1x16xf32, #tpu.memory_space<vmem>>, vector<1x16xf32>
    %23 = vector.broadcast %22 : vector<1x16xf32> to vector<32x16xf32>
    %24 = arith.addf %21, %23 : vector<32x16xf32>
    %25 = arith.truncf %24 : vector<32x16xf32> to vector<32x16xbf16>
    %c0_9 = arith.constant 0 : index
    %c0_10 = arith.constant 0 : index
    %26 = vector.load %arg3[%c0_9, %c0_10] : memref<16x64xf32, #tpu.memory_space<vmem>>, vector<16x64xf32>
    %27 = arith.truncf %26 : vector<16x64xf32> to vector<16x64xbf16>
    %cst_11 = arith.constant dense<0.000000e+00> : vector<32x64xf32>
    %28 = tpu.matmul %25, %27, %cst_11 {dimension_numbers = #tpu.dot_dimension_numbers<[1], [0], [0], [1], [0, 0, 1, 1], [], []>} : vector<32x16xbf16>, vector<16x64xbf16>, vector<32x64xf32> -> vector<32x64xf32>
    %c0_12 = arith.constant 0 : index
    %c0_13 = arith.constant 0 : index
    %29 = vector.load %arg6[%c0_12, %c0_13] : memref<1x64xf32, #tpu.memory_space<vmem>>, vector<1x64xf32>
    %30 = vector.broadcast %29 : vector<1x64xf32> to vector<32x64xf32>
    %31 = arith.addf %28, %30 : vector<32x64xf32>
    %cst_14 = arith.constant 1.702000e+00 : f32
    %32 = vector.broadcast %cst_14 : f32 to vector<32x64xf32>
    %33 = arith.mulf %32, %31 : vector<32x64xf32>
    %34 = arith.negf %33 : vector<32x64xf32>
    %35 = math.exp %34 : vector<32x64xf32>
    %cst_15 = arith.constant 1.000000e+00 : f32
    %36 = vector.broadcast %cst_15 : f32 to vector<32x64xf32>
    %37 = arith.addf %36, %35 : vector<32x64xf32>
    %38 = arith.divf %36, %37 : vector<32x64xf32>
    %39 = arith.mulf %31, %38 : vector<32x64xf32>
    %c0_16 = arith.constant 0 : index
    %c0_17 = arith.constant 0 : index
    %40 = vector.load %arg7[%c0_16, %c0_17] : memref<32x64xf32, #tpu.memory_space<vmem>>, vector<32x64xf32>
    tpu.vector_store %arg7[%c0_16, %c0_17], %39 {strides = array<i32>} : memref<32x64xf32, #tpu.memory_space<vmem>>, vector<32x64xf32>,
    return
  }
  func.func @transform_0(%arg0: i32, %arg1: i32) -> (i32, i32) {
    %c0_i32 = arith.constant 0 : i32
    %c0_i32_0 = arith.constant 0 : i32
    return %arg0, %c0_i32 : i32, i32
  }
  func.func @transform_1(%arg0: i32, %arg1: i32) -> (i32, i32) {
    %c0_i32 = arith.constant 0 : i32
    %c0_i32_0 = arith.constant 0 : i32
    return %c0_i32, %arg1 : i32, i32
  }
  func.func @transform_2(%arg0: i32, %arg1: i32) -> (i32, i32) {
    %c0_i32 = arith.constant 0 : i32
    %c0_i32_0 = arith.constant 0 : i32
    %c0_i32_1 = arith.constant 0 : i32
    return %c0_i32, %c0_i32_0 : i32, i32
  }
  func.func @transform_3(%arg0: i32, %arg1: i32) -> (i32, i32) {
    %c0_i32 = arith.constant 0 : i32
    %c0_i32_0 = arith.constant 0 : i32
    %c0_i32_1 = arith.constant 0 : i32
    return %c0_i32, %c0_i32_0 : i32, i32
  }
  func.func @transform_4(%arg0: i32, %arg1: i32) -> (i32, i32) {
    %c0_i32 = arith.constant 0 : i32
    %c0_i32_0 = arith.constant 0 : i32
    return %c0_i32, %arg1 : i32, i32
  }
  func.func @transform_5(%arg0: i32, %arg1: i32) -> (i32, i32) {
    %c0_i32 = arith.constant 0 : i32
    return %arg0, %arg1 : i32, i32
  }
}

module attributes {stable_mosaic.version = 11 : i64} {
  func.func @_fused_linear_kernel(%arg0: i32, %arg1: i32, %arg2: memref<32x64xf32, #tpu.memory_space<vmem>>, %arg3: memref<64x16xf32, #tpu.memory_space<vmem>>, %arg4: memref<1x16xf32, #tpu.memory_space<vmem>>, %arg5: memref<32x16xf32, #tpu.memory_space<vmem>>, %arg6: memref<32x16xf32, #tpu.memory_space<vmem>>) attributes {dimension_semantics = [#tpu.dimension_semantics<parallel>, #tpu.dimension_semantics<parallel>], iteration_bounds = array<i64: 1, 1>, scalar_prefetch = 0 : i64, scratch_operands = 0 : i64, tpu.core_type = #tpu.core_type<tc>, window_params = [{transform_indices = @transform_0, window_bounds = array<i64: 32, 64>}, {transform_indices = @transform_1, window_bounds = array<i64: 64, 16>}, {transform_indices = @transform_2, window_bounds = array<i64: 1, 16>}, {transform_indices = @transform_3, window_bounds = array<i64: 32, 16>}, {transform_indices = @transform_4, window_bounds = array<i64: 32, 16>}]} {
    %c0 = arith.constant 0 : index
    %c0_0 = arith.constant 0 : index
    %0 = vector.load %arg2[%c0, %c0_0] : memref<32x64xf32, #tpu.memory_space<vmem>>, vector<32x64xf32>
    %1 = arith.truncf %0 : vector<32x64xf32> to vector<32x64xbf16>
    %c0_1 = arith.constant 0 : index
    %c0_2 = arith.constant 0 : index
    %2 = vector.load %arg3[%c0_1, %c0_2] : memref<64x16xf32, #tpu.memory_space<vmem>>, vector<64x16xf32>
    %3 = arith.truncf %2 : vector<64x16xf32> to vector<64x16xbf16>
    %cst = arith.constant dense<0.000000e+00> : vector<32x16xf32>
    %4 = tpu.matmul %1, %3, %cst {dimension_numbers = #tpu.dot_dimension_numbers<[1], [0], [0], [1], [0, 0, 1, 1], [], []>} : vector<32x64xbf16>, vector<64x16xbf16>, vector<32x16xf32> -> vector<32x16xf32>
    %c0_3 = arith.constant 0 : index
    %c0_4 = arith.constant 0 : index
    %5 = vector.load %arg4[%c0_3, %c0_4] : memref<1x16xf32, #tpu.memory_space<vmem>>, vector<1x16xf32>
    %6 = vector.broadcast %5 : vector<1x16xf32> to vector<32x16xf32>
    %7 = arith.addf %4, %6 : vector<32x16xf32>
    %c0_5 = arith.constant 0 : index
    %c0_6 = arith.constant 0 : index
    %8 = vector.load %arg5[%c0_5, %c0_6] : memref<32x16xf32, #tpu.memory_space<vmem>>, vector<32x16xf32>
    %9 = arith.addf %7, %8 : vector<32x16xf32>
    %c0_7 = arith.constant 0 : index
    %c0_8 = arith.constant 0 : index
    %10 = vector.load %arg6[%c0_7, %c0_8] : memref<32x16xf32, #tpu.memory_space<vmem>>, vector<32x16xf32>
    tpu.vector_store %arg6[%c0_7, %c0_8], %9 {strides = array<i32>} : memref<32x16xf32, #tpu.memory_space<vmem>>, vector<32x16xf32>,
    return
  }
  func.func @transform_0(%arg0: i32, %arg1: i32) -> (i32, i32) {
    %c0_i32 = arith.constant 0 : i32
    %c0_i32_0 = arith.constant 0 : i32
    return %arg0, %c0_i32 : i32, i32
  }
  func.func @transform_1(%arg0: i32, %arg1: i32) -> (i32, i32) {
    %c0_i32 = arith.constant 0 : i32
    %c0_i32_0 = arith.constant 0 : i32
    return %c0_i32, %arg1 : i32, i32
  }
  func.func @transform_2(%arg0: i32, %arg1: i32) -> (i32, i32) {
    %c0_i32 = arith.constant 0 : i32
    %c0_i32_0 = arith.constant 0 : i32
    return %c0_i32, %arg1 : i32, i32
  }
  func.func @transform_3(%arg0: i32, %arg1: i32) -> (i32, i32) {
    %c0_i32 = arith.constant 0 : i32
    return %arg0, %arg1 : i32, i32
  }
  func.func @transform_4(%arg0: i32, %arg1: i32) -> (i32, i32) {
    %c0_i32 = arith.constant 0 : i32
    return %arg0, %arg1 : i32, i32
  }
}

module attributes {stable_mosaic.version = 11 : i64} {
  func.func @_layernorm_kernel(%arg0: i32, %arg1: memref<32x16xf32, #tpu.memory_space<vmem>>, %arg2: memref<1x16xf32, #tpu.memory_space<vmem>>, %arg3: memref<1x16xf32, #tpu.memory_space<vmem>>, %arg4: memref<32x16xf32, #tpu.memory_space<vmem>>) attributes {dimension_semantics = [#tpu.dimension_semantics<parallel>], iteration_bounds = array<i64: 1>, scalar_prefetch = 0 : i64, scratch_operands = 0 : i64, tpu.core_type = #tpu.core_type<tc>, window_params = [{transform_indices = @transform_0, window_bounds = array<i64: 32, 16>}, {pipeline_mode = #tpu.pipeline_mode<synchronous>, transform_indices = @transform_1, window_bounds = array<i64: 1, 16>}, {pipeline_mode = #tpu.pipeline_mode<synchronous>, transform_indices = @transform_2, window_bounds = array<i64: 1, 16>}, {transform_indices = @transform_3, window_bounds = array<i64: 32, 16>}]} {
    %c0 = arith.constant 0 : index
    %c0_0 = arith.constant 0 : index
    %0 = vector.load %arg1[%c0, %c0_0] : memref<32x16xf32, #tpu.memory_space<vmem>>, vector<32x16xf32>
    %cst = arith.constant dense<0.000000e+00> : vector<32xf32>
    %1 = vector.multi_reduction <add>, %0, %cst [1] : vector<32x16xf32> to vector<32xf32>
    %2 = vector.shape_cast %1 : vector<32xf32> to vector<32x1xf32>
    %cst_1 = arith.constant 1.600000e+01 : f32
    %3 = vector.broadcast %cst_1 : f32 to vector<32x1xf32>
    %4 = arith.divf %2, %3 : vector<32x1xf32>
    %5 = vector.broadcast %4 : vector<32x1xf32> to vector<32x16xf32>
    %6 = arith.subf %0, %5 : vector<32x16xf32>
    %7 = arith.mulf %6, %6 : vector<32x16xf32>
    %cst_2 = arith.constant dense<0.000000e+00> : vector<32xf32>
    %8 = vector.multi_reduction <add>, %7, %cst_2 [1] : vector<32x16xf32> to vector<32xf32>
    %9 = vector.shape_cast %8 : vector<32xf32> to vector<32x1xf32>
    %cst_3 = arith.constant 1.600000e+01 : f32
    %10 = vector.broadcast %cst_3 : f32 to vector<32x1xf32>
    %11 = arith.divf %9, %10 : vector<32x1xf32>
    %12 = vector.broadcast %4 : vector<32x1xf32> to vector<32x16xf32>
    %13 = arith.subf %0, %12 : vector<32x16xf32>
    %cst_4 = arith.constant 9.99999974E-6 : f32
    %14 = vector.broadcast %cst_4 : f32 to vector<32x1xf32>
    %15 = arith.addf %11, %14 : vector<32x1xf32>
    %16 = math.rsqrt %15 : vector<32x1xf32>
    %17 = vector.broadcast %16 : vector<32x1xf32> to vector<32x16xf32>
    %18 = arith.mulf %13, %17 : vector<32x16xf32>
    %c0_5 = arith.constant 0 : index
    %c0_6 = arith.constant 0 : index
    %19 = vector.load %arg2[%c0_5, %c0_6] : memref<1x16xf32, #tpu.memory_space<vmem>>, vector<1x16xf32>
    %20 = vector.broadcast %19 : vector<1x16xf32> to vector<32x16xf32>
    %21 = arith.mulf %18, %20 : vector<32x16xf32>
    %c0_7 = arith.constant 0 : index
    %c0_8 = arith.constant 0 : index
    %22 = vector.load %arg3[%c0_7, %c0_8] : memref<1x16xf32, #tpu.memory_space<vmem>>, vector<1x16xf32>
    %23 = vector.broadcast %22 : vector<1x16xf32> to vector<32x16xf32>
    %24 = arith.addf %21, %23 : vector<32x16xf32>
    %c0_9 = arith.constant 0 : index
    %c0_10 = arith.constant 0 : index
    %25 = vector.load %arg4[%c0_9, %c0_10] : memref<32x16xf32, #tpu.memory_space<vmem>>, vector<32x16xf32>
    tpu.vector_store %arg4[%c0_9, %c0_10], %24 {strides = array<i32>} : memref<32x16xf32, #tpu.memory_space<vmem>>, vector<32x16xf32>,
    return
  }
  func.func @transform_0(%arg0: i32) -> (i32, i32) {
    %c0_i32 = arith.constant 0 : i32
    %c0_i32_0 = arith.constant 0 : i32
    return %arg0, %c0_i32 : i32, i32
  }
  func.func @transform_1(%arg0: i32) -> (i32, i32) {
    %c0_i32 = arith.constant 0 : i32
    %c0_i32_0 = arith.constant 0 : i32
    %c0_i32_1 = arith.constant 0 : i32
    return %c0_i32, %c0_i32_0 : i32, i32
  }
  func.func @transform_2(%arg0: i32) -> (i32, i32) {
    %c0_i32 = arith.constant 0 : i32
    %c0_i32_0 = arith.constant 0 : i32
    %c0_i32_1 = arith.constant 0 : i32
    return %c0_i32, %c0_i32_0 : i32, i32
  }
  func.func @transform_3(%arg0: i32) -> (i32, i32) {
    %c0_i32 = arith.constant 0 : i32
    %c0_i32_0 = arith.constant 0 : i32
    return %arg0, %c0_i32 : i32, i32
  }
}

module attributes {stable_mosaic.version = 11 : i64} {
  func.func @_fused_linear_kernel(%arg0: i32, %arg1: i32, %arg2: memref<52x16xf32, #tpu.memory_space<vmem>>, %arg3: memref<16x96xf32, #tpu.memory_space<vmem>>, %arg4: memref<1x16xf32, #tpu.memory_space<vmem>>, %arg5: memref<52x96xf32, #tpu.memory_space<vmem>>) attributes {dimension_semantics = [#tpu.dimension_semantics<parallel>, #tpu.dimension_semantics<parallel>], iteration_bounds = array<i64: 1, 1>, scalar_prefetch = 0 : i64, scratch_operands = 0 : i64, tpu.core_type = #tpu.core_type<tc>, window_params = [{transform_indices = @transform_0, window_bounds = array<i64: 52, 16>}, {transform_indices = @transform_1, window_bounds = array<i64: 16, 96>}, {pipeline_mode = #tpu.pipeline_mode<synchronous>, transform_indices = @transform_2, window_bounds = array<i64: 1, 16>}, {transform_indices = @transform_3, window_bounds = array<i64: 52, 96>}]} {
    %c0 = arith.constant 0 : index
    %c0_0 = arith.constant 0 : index
    %0 = vector.load %arg2[%c0, %c0_0] : memref<52x16xf32, #tpu.memory_space<vmem>>, vector<52x16xf32>
    %1 = arith.mulf %0, %0 : vector<52x16xf32>
    %cst = arith.constant dense<0.000000e+00> : vector<52xf32>
    %2 = vector.multi_reduction <add>, %1, %cst [1] : vector<52x16xf32> to vector<52xf32>
    %3 = vector.shape_cast %2 : vector<52xf32> to vector<52x1xf32>
    %cst_1 = arith.constant 1.600000e+01 : f32
    %4 = vector.broadcast %cst_1 : f32 to vector<52x1xf32>
    %5 = arith.divf %3, %4 : vector<52x1xf32>
    %cst_2 = arith.constant 9.99999997E-7 : f32
    %6 = vector.broadcast %cst_2 : f32 to vector<52x1xf32>
    %7 = arith.addf %5, %6 : vector<52x1xf32>
    %8 = math.rsqrt %7 : vector<52x1xf32>
    %9 = vector.broadcast %8 : vector<52x1xf32> to vector<52x16xf32>
    %10 = arith.mulf %0, %9 : vector<52x16xf32>
    %c0_3 = arith.constant 0 : index
    %c0_4 = arith.constant 0 : index
    %11 = vector.load %arg4[%c0_3, %c0_4] : memref<1x16xf32, #tpu.memory_space<vmem>>, vector<1x16xf32>
    %12 = vector.broadcast %11 : vector<1x16xf32> to vector<52x16xf32>
    %13 = arith.mulf %10, %12 : vector<52x16xf32>
    %14 = arith.truncf %13 : vector<52x16xf32> to vector<52x16xbf16>
    %c0_5 = arith.constant 0 : index
    %c0_6 = arith.constant 0 : index
    %15 = vector.load %arg3[%c0_5, %c0_6] : memref<16x96xf32, #tpu.memory_space<vmem>>, vector<16x96xf32>
    %16 = arith.truncf %15 : vector<16x96xf32> to vector<16x96xbf16>
    %cst_7 = arith.constant dense<0.000000e+00> : vector<52x96xf32>
    %17 = tpu.matmul %14, %16, %cst_7 {dimension_numbers = #tpu.dot_dimension_numbers<[1], [0], [0], [1], [0, 0, 1, 1], [], []>} : vector<52x16xbf16>, vector<16x96xbf16>, vector<52x96xf32> -> vector<52x96xf32>
    %c0_8 = arith.constant 0 : index
    %c0_9 = arith.constant 0 : index
    %18 = vector.load %arg5[%c0_8, %c0_9] : memref<52x96xf32, #tpu.memory_space<vmem>>, vector<52x96xf32>
    tpu.vector_store %arg5[%c0_8, %c0_9], %17 {strides = array<i32>} : memref<52x96xf32, #tpu.memory_space<vmem>>, vector<52x96xf32>,
    return
  }
  func.func @transform_0(%arg0: i32, %arg1: i32) -> (i32, i32) {
    %c0_i32 = arith.constant 0 : i32
    %c0_i32_0 = arith.constant 0 : i32
    return %arg0, %c0_i32 : i32, i32
  }
  func.func @transform_1(%arg0: i32, %arg1: i32) -> (i32, i32) {
    %c0_i32 = arith.constant 0 : i32
    %c0_i32_0 = arith.constant 0 : i32
    return %c0_i32, %arg1 : i32, i32
  }
  func.func @transform_2(%arg0: i32, %arg1: i32) -> (i32, i32) {
    %c0_i32 = arith.constant 0 : i32
    %c0_i32_0 = arith.constant 0 : i32
    %c0_i32_1 = arith.constant 0 : i32
    return %c0_i32, %c0_i32_0 : i32, i32
  }
  func.func @transform_3(%arg0: i32, %arg1: i32) -> (i32, i32) {
    %c0_i32 = arith.constant 0 : i32
    return %arg0, %arg1 : i32, i32
  }
}

module attributes {stable_mosaic.version = 11 : i64} {
  func.func @_attn_fused_kernel(%arg0: i32, %arg1: memref<1x13x96xf32, #tpu.memory_space<vmem>>, %arg2: memref<4x13x13xf32, #tpu.memory_space<vmem>>, %arg3: memref<1x13x32xf32, #tpu.memory_space<vmem>>) attributes {dimension_semantics = [#tpu.dimension_semantics<parallel>], iteration_bounds = array<i64: 4>, scalar_prefetch = 0 : i64, scratch_operands = 0 : i64, tpu.core_type = #tpu.core_type<tc>, window_params = [{transform_indices = @transform_0, window_bounds = array<i64: 1, 13, 96>}, {pipeline_mode = #tpu.pipeline_mode<synchronous>, transform_indices = @transform_1, window_bounds = array<i64: 4, 13, 13>}, {transform_indices = @transform_2, window_bounds = array<i64: 1, 13, 32>}]} {
    %c0 = arith.constant 0 : index
    %c0_0 = arith.constant 0 : index
    %c0_1 = arith.constant 0 : index
    %0 = vector.load %arg1[%c0, %c0_0, %c0_1] : memref<1x13x96xf32, #tpu.memory_space<vmem>>, vector<1x13x96xf32>
    %1 = vector.shape_cast %0 : vector<1x13x96xf32> to vector<13x96xf32>
    %2 = vector.extract_strided_slice %1 {offsets = [0, 0], sizes = [13, 8], strides = [1, 1]} : vector<13x96xf32> to vector<13x8xf32>
    %3 = vector.extract_strided_slice %1 {offsets = [0, 32], sizes = [13, 8], strides = [1, 1]} : vector<13x96xf32> to vector<13x8xf32>
    %4 = vector.extract_strided_slice %1 {offsets = [0, 64], sizes = [13, 8], strides = [1, 1]} : vector<13x96xf32> to vector<13x8xf32>
    %5 = arith.truncf %2 : vector<13x8xf32> to vector<13x8xbf16>
    %6 = arith.truncf %3 : vector<13x8xf32> to vector<13x8xbf16>
    %7 = tpu.transpose %6, [1, 0] : vector<13x8xbf16> -> vector<8x13xbf16>
    %cst = arith.constant dense<0.000000e+00> : vector<13x13xf32>
    %8 = tpu.matmul %5, %7, %cst {dimension_numbers = #tpu.dot_dimension_numbers<[1], [0], [0], [1], [0, 0, 1, 1], [], []>} : vector<13x8xbf16>, vector<8x13xbf16>, vector<13x13xf32> -> vector<13x13xf32>
    %cst_2 = arith.constant 1.000000e+00 : f32
    %9 = vector.broadcast %cst_2 : f32 to vector<13x13xf32>
    %10 = arith.mulf %8, %9 : vector<13x13xf32>
    %c0_3 = arith.constant 0 : index
    %c0_4 = arith.constant 0 : index
    %c0_5 = arith.constant 0 : index
    %11 = vector.load %arg2[%c0_3, %c0_4, %c0_5] : memref<4x13x13xf32, #tpu.memory_space<vmem>>, vector<1x13x13xf32>
    %12 = vector.shape_cast %11 : vector<1x13x13xf32> to vector<13x13xf32>
    %13 = arith.addf %10, %12 : vector<13x13xf32>
    %cst_6 = arith.constant dense<0xFF800000> : vector<13xf32>
    %14 = vector.multi_reduction <maximumf>, %13, %cst_6 [1] : vector<13x13xf32> to vector<13xf32>
    %15 = vector.shape_cast %14 : vector<13xf32> to vector<13x1xf32>
    %16 = vector.broadcast %15 : vector<13x1xf32> to vector<13x13xf32>
    %17 = arith.subf %13, %16 : vector<13x13xf32>
    %18 = math.exp %17 : vector<13x13xf32>
    %cst_7 = arith.constant dense<0.000000e+00> : vector<13xf32>
    %19 = vector.multi_reduction <add>, %18, %cst_7 [1] : vector<13x13xf32> to vector<13xf32>
    %20 = vector.shape_cast %19 : vector<13xf32> to vector<13x1xf32>
    %21 = tpu.reciprocal %20 {approx = true} : vector<13x1xf32> -> vector<13x1xf32>
    %22 = vector.broadcast %21 : vector<13x1xf32> to vector<13x13xf32>
    %23 = arith.mulf %18, %22 : vector<13x13xf32>
    %24 = arith.truncf %23 : vector<13x13xf32> to vector<13x13xbf16>
    %25 = arith.truncf %4 : vector<13x8xf32> to vector<13x8xbf16>
    %cst_8 = arith.constant dense<0.000000e+00> : vector<13x8xf32>
    %26 = tpu.matmul %24, %25, %cst_8 {dimension_numbers = #tpu.dot_dimension_numbers<[1], [0], [0], [1], [0, 0, 1, 1], [], []>} : vector<13x13xbf16>, vector<13x8xbf16>, vector<13x8xf32> -> vector<13x8xf32>
    %27 = vector.extract_strided_slice %1 {offsets = [0, 8], sizes = [13, 8], strides = [1, 1]} : vector<13x96xf32> to vector<13x8xf32>
    %28 = vector.extract_strided_slice %1 {offsets = [0, 40], sizes = [13, 8], strides = [1, 1]} : vector<13x96xf32> to vector<13x8xf32>
    %29 = vector.extract_strided_slice %1 {offsets = [0, 72], sizes = [13, 8], strides = [1, 1]} : vector<13x96xf32> to vector<13x8xf32>
    %30 = arith.truncf %27 : vector<13x8xf32> to vector<13x8xbf16>
    %31 = arith.truncf %28 : vector<13x8xf32> to vector<13x8xbf16>
    %32 = tpu.transpose %31, [1, 0] : vector<13x8xbf16> -> vector<8x13xbf16>
    %cst_9 = arith.constant dense<0.000000e+00> : vector<13x13xf32>
    %33 = tpu.matmul %30, %32, %cst_9 {dimension_numbers = #tpu.dot_dimension_numbers<[1], [0], [0], [1], [0, 0, 1, 1], [], []>} : vector<13x8xbf16>, vector<8x13xbf16>, vector<13x13xf32> -> vector<13x13xf32>
    %cst_10 = arith.constant 1.000000e+00 : f32
    %34 = vector.broadcast %cst_10 : f32 to vector<13x13xf32>
    %35 = arith.mulf %33, %34 : vector<13x13xf32>
    %c1 = arith.constant 1 : index
    %c0_11 = arith.constant 0 : index
    %c0_12 = arith.constant 0 : index
    %36 = vector.load %arg2[%c1, %c0_11, %c0_12] : memref<4x13x13xf32, #tpu.memory_space<vmem>>, vector<1x13x13xf32>
    %37 = vector.shape_cast %36 : vector<1x13x13xf32> to vector<13x13xf32>
    %38 = arith.addf %35, %37 : vector<13x13xf32>
    %cst_13 = arith.constant dense<0xFF800000> : vector<13xf32>
    %39 = vector.multi_reduction <maximumf>, %38, %cst_13 [1] : vector<13x13xf32> to vector<13xf32>
    %40 = vector.shape_cast %39 : vector<13xf32> to vector<13x1xf32>
    %41 = vector.broadcast %40 : vector<13x1xf32> to vector<13x13xf32>
    %42 = arith.subf %38, %41 : vector<13x13xf32>
    %43 = math.exp %42 : vector<13x13xf32>
    %cst_14 = arith.constant dense<0.000000e+00> : vector<13xf32>
    %44 = vector.multi_reduction <add>, %43, %cst_14 [1] : vector<13x13xf32> to vector<13xf32>
    %45 = vector.shape_cast %44 : vector<13xf32> to vector<13x1xf32>
    %46 = tpu.reciprocal %45 {approx = true} : vector<13x1xf32> -> vector<13x1xf32>
    %47 = vector.broadcast %46 : vector<13x1xf32> to vector<13x13xf32>
    %48 = arith.mulf %43, %47 : vector<13x13xf32>
    %49 = arith.truncf %48 : vector<13x13xf32> to vector<13x13xbf16>
    %50 = arith.truncf %29 : vector<13x8xf32> to vector<13x8xbf16>
    %cst_15 = arith.constant dense<0.000000e+00> : vector<13x8xf32>
    %51 = tpu.matmul %49, %50, %cst_15 {dimension_numbers = #tpu.dot_dimension_numbers<[1], [0], [0], [1], [0, 0, 1, 1], [], []>} : vector<13x13xbf16>, vector<13x8xbf16>, vector<13x8xf32> -> vector<13x8xf32>
    %52 = vector.extract_strided_slice %1 {offsets = [0, 16], sizes = [13, 8], strides = [1, 1]} : vector<13x96xf32> to vector<13x8xf32>
    %53 = vector.extract_strided_slice %1 {offsets = [0, 48], sizes = [13, 8], strides = [1, 1]} : vector<13x96xf32> to vector<13x8xf32>
    %54 = vector.extract_strided_slice %1 {offsets = [0, 80], sizes = [13, 8], strides = [1, 1]} : vector<13x96xf32> to vector<13x8xf32>
    %55 = arith.truncf %52 : vector<13x8xf32> to vector<13x8xbf16>
    %56 = arith.truncf %53 : vector<13x8xf32> to vector<13x8xbf16>
    %57 = tpu.transpose %56, [1, 0] : vector<13x8xbf16> -> vector<8x13xbf16>
    %cst_16 = arith.constant dense<0.000000e+00> : vector<13x13xf32>
    %58 = tpu.matmul %55, %57, %cst_16 {dimension_numbers = #tpu.dot_dimension_numbers<[1], [0], [0], [1], [0, 0, 1, 1], [], []>} : vector<13x8xbf16>, vector<8x13xbf16>, vector<13x13xf32> -> vector<13x13xf32>
    %cst_17 = arith.constant 1.000000e+00 : f32
    %59 = vector.broadcast %cst_17 : f32 to vector<13x13xf32>
    %60 = arith.mulf %58, %59 : vector<13x13xf32>
    %c2 = arith.constant 2 : index
    %c0_18 = arith.constant 0 : index
    %c0_19 = arith.constant 0 : index
    %61 = vector.load %arg2[%c2, %c0_18, %c0_19] : memref<4x13x13xf32, #tpu.memory_space<vmem>>, vector<1x13x13xf32>
    %62 = vector.shape_cast %61 : vector<1x13x13xf32> to vector<13x13xf32>
    %63 = arith.addf %60, %62 : vector<13x13xf32>
    %cst_20 = arith.constant dense<0xFF800000> : vector<13xf32>
    %64 = vector.multi_reduction <maximumf>, %63, %cst_20 [1] : vector<13x13xf32> to vector<13xf32>
    %65 = vector.shape_cast %64 : vector<13xf32> to vector<13x1xf32>
    %66 = vector.broadcast %65 : vector<13x1xf32> to vector<13x13xf32>
    %67 = arith.subf %63, %66 : vector<13x13xf32>
    %68 = math.exp %67 : vector<13x13xf32>
    %cst_21 = arith.constant dense<0.000000e+00> : vector<13xf32>
    %69 = vector.multi_reduction <add>, %68, %cst_21 [1] : vector<13x13xf32> to vector<13xf32>
    %70 = vector.shape_cast %69 : vector<13xf32> to vector<13x1xf32>
    %71 = tpu.reciprocal %70 {approx = true} : vector<13x1xf32> -> vector<13x1xf32>
    %72 = vector.broadcast %71 : vector<13x1xf32> to vector<13x13xf32>
    %73 = arith.mulf %68, %72 : vector<13x13xf32>
    %74 = arith.truncf %73 : vector<13x13xf32> to vector<13x13xbf16>
    %75 = arith.truncf %54 : vector<13x8xf32> to vector<13x8xbf16>
    %cst_22 = arith.constant dense<0.000000e+00> : vector<13x8xf32>
    %76 = tpu.matmul %74, %75, %cst_22 {dimension_numbers = #tpu.dot_dimension_numbers<[1], [0], [0], [1], [0, 0, 1, 1], [], []>} : vector<13x13xbf16>, vector<13x8xbf16>, vector<13x8xf32> -> vector<13x8xf32>
    %77 = vector.extract_strided_slice %1 {offsets = [0, 24], sizes = [13, 8], strides = [1, 1]} : vector<13x96xf32> to vector<13x8xf32>
    %78 = vector.extract_strided_slice %1 {offsets = [0, 56], sizes = [13, 8], strides = [1, 1]} : vector<13x96xf32> to vector<13x8xf32>
    %79 = vector.extract_strided_slice %1 {offsets = [0, 88], sizes = [13, 8], strides = [1, 1]} : vector<13x96xf32> to vector<13x8xf32>
    %80 = arith.truncf %77 : vector<13x8xf32> to vector<13x8xbf16>
    %81 = arith.truncf %78 : vector<13x8xf32> to vector<13x8xbf16>
    %82 = tpu.transpose %81, [1, 0] : vector<13x8xbf16> -> vector<8x13xbf16>
    %cst_23 = arith.constant dense<0.000000e+00> : vector<13x13xf32>
    %83 = tpu.matmul %80, %82, %cst_23 {dimension_numbers = #tpu.dot_dimension_numbers<[1], [0], [0], [1], [0, 0, 1, 1], [], []>} : vector<13x8xbf16>, vector<8x13xbf16>, vector<13x13xf32> -> vector<13x13xf32>
    %cst_24 = arith.constant 1.000000e+00 : f32
    %84 = vector.broadcast %cst_24 : f32 to vector<13x13xf32>
    %85 = arith.mulf %83, %84 : vector<13x13xf32>
    %c3 = arith.constant 3 : index
    %c0_25 = arith.constant 0 : index
    %c0_26 = arith.constant 0 : index
    %86 = vector.load %arg2[%c3, %c0_25, %c0_26] : memref<4x13x13xf32, #tpu.memory_space<vmem>>, vector<1x13x13xf32>
    %87 = vector.shape_cast %86 : vector<1x13x13xf32> to vector<13x13xf32>
    %88 = arith.addf %85, %87 : vector<13x13xf32>
    %cst_27 = arith.constant dense<0xFF800000> : vector<13xf32>
    %89 = vector.multi_reduction <maximumf>, %88, %cst_27 [1] : vector<13x13xf32> to vector<13xf32>
    %90 = vector.shape_cast %89 : vector<13xf32> to vector<13x1xf32>
    %91 = vector.broadcast %90 : vector<13x1xf32> to vector<13x13xf32>
    %92 = arith.subf %88, %91 : vector<13x13xf32>
    %93 = math.exp %92 : vector<13x13xf32>
    %cst_28 = arith.constant dense<0.000000e+00> : vector<13xf32>
    %94 = vector.multi_reduction <add>, %93, %cst_28 [1] : vector<13x13xf32> to vector<13xf32>
    %95 = vector.shape_cast %94 : vector<13xf32> to vector<13x1xf32>
    %96 = tpu.reciprocal %95 {approx = true} : vector<13x1xf32> -> vector<13x1xf32>
    %97 = vector.broadcast %96 : vector<13x1xf32> to vector<13x13xf32>
    %98 = arith.mulf %93, %97 : vector<13x13xf32>
    %99 = arith.truncf %98 : vector<13x13xf32> to vector<13x13xbf16>
    %100 = arith.truncf %79 : vector<13x8xf32> to vector<13x8xbf16>
    %cst_29 = arith.constant dense<0.000000e+00> : vector<13x8xf32>
    %101 = tpu.matmul %99, %100, %cst_29 {dimension_numbers = #tpu.dot_dimension_numbers<[1], [0], [0], [1], [0, 0, 1, 1], [], []>} : vector<13x13xbf16>, vector<13x8xbf16>, vector<13x8xf32> -> vector<13x8xf32>
    %102 = tpu.concatenate %26, %51, %76, %101 in 1 : vector<13x8xf32>, vector<13x8xf32>, vector<13x8xf32>, vector<13x8xf32> -> vector<13x32xf32>
    %c0_30 = arith.constant 0 : index
    %c0_31 = arith.constant 0 : index
    %c0_32 = arith.constant 0 : index
    %103 = vector.load %arg3[%c0_30, %c0_31, %c0_32] : memref<1x13x32xf32, #tpu.memory_space<vmem>>, vector<1x13x32xf32>
    %104 = vector.shape_cast %103 : vector<1x13x32xf32> to vector<13x32xf32>
    %105 = vector.shape_cast %102 : vector<13x32xf32> to vector<1x13x32xf32>
    tpu.vector_store %arg3[%c0_30, %c0_31, %c0_32], %105 {strides = array<i32>} : memref<1x13x32xf32, #tpu.memory_space<vmem>>, vector<1x13x32xf32>,
    return
  }
  func.func @transform_0(%arg0: i32) -> (i32, i32, i32) {
    %c0_i32 = arith.constant 0 : i32
    %c0_i32_0 = arith.constant 0 : i32
    %c0_i32_1 = arith.constant 0 : i32
    return %arg0, %c0_i32, %c0_i32_0 : i32, i32, i32
  }
  func.func @transform_1(%arg0: i32) -> (i32, i32, i32) {
    %c0_i32 = arith.constant 0 : i32
    %c0_i32_0 = arith.constant 0 : i32
    %c0_i32_1 = arith.constant 0 : i32
    %c0_i32_2 = arith.constant 0 : i32
    return %c0_i32, %c0_i32_0, %c0_i32_1 : i32, i32, i32
  }
  func.func @transform_2(%arg0: i32) -> (i32, i32, i32) {
    %c0_i32 = arith.constant 0 : i32
    %c0_i32_0 = arith.constant 0 : i32
    %c0_i32_1 = arith.constant 0 : i32
    return %arg0, %c0_i32, %c0_i32_0 : i32, i32, i32
  }
}

module attributes {stable_mosaic.version = 11 : i64} {
  func.func @_fused_linear_kernel(%arg0: i32, %arg1: i32, %arg2: memref<52x32xf32, #tpu.memory_space<vmem>>, %arg3: memref<32x16xf32, #tpu.memory_space<vmem>>, %arg4: memref<52x16xf32, #tpu.memory_space<vmem>>, %arg5: memref<52x16xf32, #tpu.memory_space<vmem>>) attributes {dimension_semantics = [#tpu.dimension_semantics<parallel>, #tpu.dimension_semantics<parallel>], iteration_bounds = array<i64: 1, 1>, scalar_prefetch = 0 : i64, scratch_operands = 0 : i64, tpu.core_type = #tpu.core_type<tc>, window_params = [{transform_indices = @transform_0, window_bounds = array<i64: 52, 32>}, {transform_indices = @transform_1, window_bounds = array<i64: 32, 16>}, {transform_indices = @transform_2, window_bounds = array<i64: 52, 16>}, {transform_indices = @transform_3, window_bounds = array<i64: 52, 16>}]} {
    %c0 = arith.constant 0 : index
    %c0_0 = arith.constant 0 : index
    %0 = vector.load %arg2[%c0, %c0_0] : memref<52x32xf32, #tpu.memory_space<vmem>>, vector<52x32xf32>
    %1 = arith.truncf %0 : vector<52x32xf32> to vector<52x32xbf16>
    %c0_1 = arith.constant 0 : index
    %c0_2 = arith.constant 0 : index
    %2 = vector.load %arg3[%c0_1, %c0_2] : memref<32x16xf32, #tpu.memory_space<vmem>>, vector<32x16xf32>
    %3 = arith.truncf %2 : vector<32x16xf32> to vector<32x16xbf16>
    %cst = arith.constant dense<0.000000e+00> : vector<52x16xf32>
    %4 = tpu.matmul %1, %3, %cst {dimension_numbers = #tpu.dot_dimension_numbers<[1], [0], [0], [1], [0, 0, 1, 1], [], []>} : vector<52x32xbf16>, vector<32x16xbf16>, vector<52x16xf32> -> vector<52x16xf32>
    %c0_3 = arith.constant 0 : index
    %c0_4 = arith.constant 0 : index
    %5 = vector.load %arg4[%c0_3, %c0_4] : memref<52x16xf32, #tpu.memory_space<vmem>>, vector<52x16xf32>
    %6 = arith.addf %4, %5 : vector<52x16xf32>
    %c0_5 = arith.constant 0 : index
    %c0_6 = arith.constant 0 : index
    %7 = vector.load %arg5[%c0_5, %c0_6] : memref<52x16xf32, #tpu.memory_space<vmem>>, vector<52x16xf32>
    tpu.vector_store %arg5[%c0_5, %c0_6], %6 {strides = array<i32>} : memref<52x16xf32, #tpu.memory_space<vmem>>, vector<52x16xf32>,
    return
  }
  func.func @transform_0(%arg0: i32, %arg1: i32) -> (i32, i32) {
    %c0_i32 = arith.constant 0 : i32
    %c0_i32_0 = arith.constant 0 : i32
    return %arg0, %c0_i32 : i32, i32
  }
  func.func @transform_1(%arg0: i32, %arg1: i32) -> (i32, i32) {
    %c0_i32 = arith.constant 0 : i32
    %c0_i32_0 = arith.constant 0 : i32
    return %c0_i32, %arg1 : i32, i32
  }
  func.func @transform_2(%arg0: i32, %arg1: i32) -> (i32, i32) {
    %c0_i32 = arith.constant 0 : i32
    return %arg0, %arg1 : i32, i32
  }
  func.func @transform_3(%arg0: i32, %arg1: i32) -> (i32, i32) {
    %c0_i32 = arith.constant 0 : i32
    return %arg0, %arg1 : i32, i32
  }
}

module attributes {stable_mosaic.version = 11 : i64} {
  func.func @_fused_linear_kernel(%arg0: i32, %arg1: i32, %arg2: memref<52x16xf32, #tpu.memory_space<vmem>>, %arg3: memref<16x32xf32, #tpu.memory_space<vmem>>, %arg4: memref<1x16xf32, #tpu.memory_space<vmem>>, %arg5: memref<52x32xf32, #tpu.memory_space<vmem>>) attributes {dimension_semantics = [#tpu.dimension_semantics<parallel>, #tpu.dimension_semantics<parallel>], iteration_bounds = array<i64: 1, 1>, scalar_prefetch = 0 : i64, scratch_operands = 0 : i64, tpu.core_type = #tpu.core_type<tc>, window_params = [{transform_indices = @transform_0, window_bounds = array<i64: 52, 16>}, {transform_indices = @transform_1, window_bounds = array<i64: 16, 32>}, {pipeline_mode = #tpu.pipeline_mode<synchronous>, transform_indices = @transform_2, window_bounds = array<i64: 1, 16>}, {transform_indices = @transform_3, window_bounds = array<i64: 52, 32>}]} {
    %c0 = arith.constant 0 : index
    %c0_0 = arith.constant 0 : index
    %0 = vector.load %arg2[%c0, %c0_0] : memref<52x16xf32, #tpu.memory_space<vmem>>, vector<52x16xf32>
    %1 = arith.mulf %0, %0 : vector<52x16xf32>
    %cst = arith.constant dense<0.000000e+00> : vector<52xf32>
    %2 = vector.multi_reduction <add>, %1, %cst [1] : vector<52x16xf32> to vector<52xf32>
    %3 = vector.shape_cast %2 : vector<52xf32> to vector<52x1xf32>
    %cst_1 = arith.constant 1.600000e+01 : f32
    %4 = vector.broadcast %cst_1 : f32 to vector<52x1xf32>
    %5 = arith.divf %3, %4 : vector<52x1xf32>
    %cst_2 = arith.constant 9.99999997E-7 : f32
    %6 = vector.broadcast %cst_2 : f32 to vector<52x1xf32>
    %7 = arith.addf %5, %6 : vector<52x1xf32>
    %8 = math.rsqrt %7 : vector<52x1xf32>
    %9 = vector.broadcast %8 : vector<52x1xf32> to vector<52x16xf32>
    %10 = arith.mulf %0, %9 : vector<52x16xf32>
    %c0_3 = arith.constant 0 : index
    %c0_4 = arith.constant 0 : index
    %11 = vector.load %arg4[%c0_3, %c0_4] : memref<1x16xf32, #tpu.memory_space<vmem>>, vector<1x16xf32>
    %12 = vector.broadcast %11 : vector<1x16xf32> to vector<52x16xf32>
    %13 = arith.mulf %10, %12 : vector<52x16xf32>
    %14 = arith.truncf %13 : vector<52x16xf32> to vector<52x16xbf16>
    %c0_5 = arith.constant 0 : index
    %c0_6 = arith.constant 0 : index
    %15 = vector.load %arg3[%c0_5, %c0_6] : memref<16x32xf32, #tpu.memory_space<vmem>>, vector<16x32xf32>
    %16 = arith.truncf %15 : vector<16x32xf32> to vector<16x32xbf16>
    %cst_7 = arith.constant dense<0.000000e+00> : vector<52x32xf32>
    %17 = tpu.matmul %14, %16, %cst_7 {dimension_numbers = #tpu.dot_dimension_numbers<[1], [0], [0], [1], [0, 0, 1, 1], [], []>} : vector<52x16xbf16>, vector<16x32xbf16>, vector<52x32xf32> -> vector<52x32xf32>
    %cst_8 = arith.constant 0.000000e+00 : f32
    %18 = vector.broadcast %cst_8 : f32 to vector<52x32xf32>
    %19 = arith.maximumf %17, %18 : vector<52x32xf32>
    %c0_9 = arith.constant 0 : index
    %c0_10 = arith.constant 0 : index
    %20 = vector.load %arg5[%c0_9, %c0_10] : memref<52x32xf32, #tpu.memory_space<vmem>>, vector<52x32xf32>
    tpu.vector_store %arg5[%c0_9, %c0_10], %19 {strides = array<i32>} : memref<52x32xf32, #tpu.memory_space<vmem>>, vector<52x32xf32>,
    return
  }
  func.func @transform_0(%arg0: i32, %arg1: i32) -> (i32, i32) {
    %c0_i32 = arith.constant 0 : i32
    %c0_i32_0 = arith.constant 0 : i32
    return %arg0, %c0_i32 : i32, i32
  }
  func.func @transform_1(%arg0: i32, %arg1: i32) -> (i32, i32) {
    %c0_i32 = arith.constant 0 : i32
    %c0_i32_0 = arith.constant 0 : i32
    return %c0_i32, %arg1 : i32, i32
  }
  func.func @transform_2(%arg0: i32, %arg1: i32) -> (i32, i32) {
    %c0_i32 = arith.constant 0 : i32
    %c0_i32_0 = arith.constant 0 : i32
    %c0_i32_1 = arith.constant 0 : i32
    return %c0_i32, %c0_i32_0 : i32, i32
  }
  func.func @transform_3(%arg0: i32, %arg1: i32) -> (i32, i32) {
    %c0_i32 = arith.constant 0 : i32
    return %arg0, %arg1 : i32, i32
  }
}

module attributes {stable_mosaic.version = 11 : i64} {
  func.func @_rms_meanpool_kernel(%arg0: memref<4x13x16xf32, #tpu.memory_space<vmem>>, %arg1: memref<1x1x16xf32, #tpu.memory_space<vmem>>, %arg2: memref<4x16xf32, #tpu.memory_space<vmem>>) attributes {dimension_semantics = [], scalar_prefetch = 0 : i64, scratch_operands = 0 : i64, tpu.core_type = #tpu.core_type<tc>} {
    %c0 = arith.constant 0 : index
    %c0_0 = arith.constant 0 : index
    %c0_1 = arith.constant 0 : index
    %0 = vector.load %arg0[%c0, %c0_0, %c0_1] : memref<4x13x16xf32, #tpu.memory_space<vmem>>, vector<4x13x16xf32>
    %1 = arith.mulf %0, %0 : vector<4x13x16xf32>
    %cst = arith.constant dense<0.000000e+00> : vector<4x13xf32>
    %2 = vector.multi_reduction <add>, %1, %cst [2] : vector<4x13x16xf32> to vector<4x13xf32>
    %3 = vector.shape_cast %2 : vector<4x13xf32> to vector<4x13x1xf32>
    %cst_2 = arith.constant 1.600000e+01 : f32
    %4 = vector.broadcast %cst_2 : f32 to vector<4x13x1xf32>
    %5 = arith.divf %3, %4 : vector<4x13x1xf32>
    %cst_3 = arith.constant 9.99999997E-7 : f32
    %6 = vector.broadcast %cst_3 : f32 to vector<4x13x1xf32>
    %7 = arith.addf %5, %6 : vector<4x13x1xf32>
    %8 = math.rsqrt %7 : vector<4x13x1xf32>
    %9 = vector.broadcast %8 : vector<4x13x1xf32> to vector<4x13x16xf32>
    %10 = arith.mulf %0, %9 : vector<4x13x16xf32>
    %c0_4 = arith.constant 0 : index
    %c0_5 = arith.constant 0 : index
    %c0_6 = arith.constant 0 : index
    %11 = vector.load %arg1[%c0_4, %c0_5, %c0_6] : memref<1x1x16xf32, #tpu.memory_space<vmem>>, vector<1x1x16xf32>
    %12 = vector.broadcast %11 : vector<1x1x16xf32> to vector<4x13x16xf32>
    %13 = arith.mulf %10, %12 : vector<4x13x16xf32>
    %cst_7 = arith.constant dense<0.000000e+00> : vector<4x16xf32>
    %14 = vector.multi_reduction <add>, %13, %cst_7 [1] : vector<4x13x16xf32> to vector<4x16xf32>
    %cst_8 = arith.constant 1.300000e+01 : f32
    %15 = vector.broadcast %cst_8 : f32 to vector<4x16xf32>
    %16 = arith.divf %14, %15 : vector<4x16xf32>
    %c0_9 = arith.constant 0 : index
    %c0_10 = arith.constant 0 : index
    %17 = vector.load %arg2[%c0_9, %c0_10] : memref<4x16xf32, #tpu.memory_space<vmem>>, vector<4x16xf32>
    tpu.vector_store %arg2[%c0_9, %c0_10], %16 {strides = array<i32>} : memref<4x16xf32, #tpu.memory_space<vmem>>, vector<4x16xf32>,
    return
  }
}

module attributes {stable_mosaic.version = 11 : i64} {
  func.func @_score_kernel(%arg0: memref<2x16xf32, #tpu.memory_space<vmem>>, %arg1: memref<2x16xf32, #tpu.memory_space<vmem>>, %arg2: memref<1xf32, #tpu.memory_space<smem>>, %arg3: memref<2x2xf32, #tpu.memory_space<vmem>>) attributes {dimension_semantics = [], scalar_prefetch = 0 : i64, scratch_operands = 0 : i64, tpu.core_type = #tpu.core_type<tc>} {
    %c0 = arith.constant 0 : index
    %c0_0 = arith.constant 0 : index
    %0 = vector.load %arg0[%c0, %c0_0] : memref<2x16xf32, #tpu.memory_space<vmem>>, vector<2x16xf32>
    %c0_1 = arith.constant 0 : index
    %c0_2 = arith.constant 0 : index
    %1 = vector.load %arg1[%c0_1, %c0_2] : memref<2x16xf32, #tpu.memory_space<vmem>>, vector<2x16xf32>
    %2 = arith.mulf %0, %0 : vector<2x16xf32>
    %cst = arith.constant dense<0.000000e+00> : vector<2xf32>
    %3 = vector.multi_reduction <add>, %2, %cst [1] : vector<2x16xf32> to vector<2xf32>
    %4 = vector.shape_cast %3 : vector<2xf32> to vector<2x1xf32>
    %cst_3 = arith.constant 1.000000e-24 : f32
    %5 = vector.broadcast %cst_3 : f32 to vector<2x1xf32>
    %6 = arith.maximumf %4, %5 : vector<2x1xf32>
    %7 = math.rsqrt %6 : vector<2x1xf32>
    %8 = vector.broadcast %7 : vector<2x1xf32> to vector<2x16xf32>
    %9 = arith.mulf %0, %8 : vector<2x16xf32>
    %10 = arith.mulf %1, %1 : vector<2x16xf32>
    %cst_4 = arith.constant dense<0.000000e+00> : vector<2xf32>
    %11 = vector.multi_reduction <add>, %10, %cst_4 [1] : vector<2x16xf32> to vector<2xf32>
    %12 = vector.shape_cast %11 : vector<2xf32> to vector<2x1xf32>
    %cst_5 = arith.constant 1.000000e-24 : f32
    %13 = vector.broadcast %cst_5 : f32 to vector<2x1xf32>
    %14 = arith.maximumf %12, %13 : vector<2x1xf32>
    %15 = math.rsqrt %14 : vector<2x1xf32>
    %16 = vector.broadcast %15 : vector<2x1xf32> to vector<2x16xf32>
    %17 = arith.mulf %1, %16 : vector<2x16xf32>
    %18 = tpu.transpose %17, [1, 0] : vector<2x16xf32> -> vector<16x2xf32>
    %cst_6 = arith.constant dense<0.000000e+00> : vector<2x2xf32>
    %19 = tpu.matmul %9, %18, %cst_6 {dimension_numbers = #tpu.dot_dimension_numbers<[1], [0], [0], [1], [0, 0, 1, 1], [], []>} : vector<2x16xf32>, vector<16x2xf32>, vector<2x2xf32> -> vector<2x2xf32>
    %c0_7 = arith.constant 0 : index
    %20 = memref.load %arg2[%c0_7] : memref<1xf32, #tpu.memory_space<smem>>
    %21 = vector.broadcast %20 : f32 to vector<2x2xf32>
    %22 = arith.mulf %19, %21 : vector<2x2xf32>
    %c0_8 = arith.constant 0 : index
    %c0_9 = arith.constant 0 : index
    %23 = vector.load %arg3[%c0_8, %c0_9] : memref<2x2xf32, #tpu.memory_space<vmem>>, vector<2x2xf32>
    tpu.vector_store %arg3[%c0_8, %c0_9], %22 {strides = array<i32>} : memref<2x2xf32, #tpu.memory_space<vmem>>, vector<2x2xf32>,
    return
  }
}

</mosaic_0001>

<bundles_post_ra>
// kernel: compute_inbatch_contrastive_loss.48
= control target key start
LH: loop header
LB: loop body
LE: loop exit
PB: predicated region body
PF: predicated region fallthrough
CT: control target
= control target key end

     0   :  { %vm17_vm0 = vcmask 261120   ;;  %vm24_vm1 = vcmask 257024   ;;  %s147_s0 = inlined_call_operand.vmem [shape: f32[20,32], index: 0, kind: input, shape index: {}]   ;;  %s148_s1 = inlined_call_operand.vmem [shape: f32[1,32], index: 1, kind: input, shape index: {}]   ;;  %s149_s2 = inlined_call_operand.vmem [shape: f32[1,32], index: 2, kind: input, shape index: {}]   ;;  %s150_s3 = inlined_call_operand.vmem [shape: f32[20,32], index: 3, kind: output, shape index: {}]  }
   0x1   :  { %v14_v0 = vld [vmem:[%s147_s0] sm:$0xff]  ;;  %v16_v1 = vld [vmem:[%s147_s0 + $0x10] sm:$0xf]  ;;  %v15_v2 = vld [vmem:[%s147_s0 + $0x8] sm:$0xff] }
   0x2   :  { %v18_v3 = vsel %vm17_vm0, %v14_v0, 0.0  ;;  %v25_v4 = vsel %vm24_vm1, %v16_v1, 0.0  ;;  %v21_v5 = vsel %vm17_vm0, %v15_v2, 0.0  ;;  %v86_v31 = vld [vmem:[%s148_s1] ss:$0 sm:$0xff] }
   0x3   :  { %19 = vadd.xlane.f32.xlu0 %v18_v3  ;;  %26 = vadd.xlane.f32.xlu1 %v25_v4  ;;  %v87_v33 = vld [vmem:[%s149_s2] ss:$0 sm:$0xff] }
   0x7   :  { %22 = vadd.xlane.f32.xlu0 %v21_v5 }
  0x8c   :  { %v20_v6 = vpop.xlane.xlu0 %19  ;;  %v27_v7 = vpop.xlane.xlu1 %26 }
  0x8d   :  { %v29_v8 = vmul.f32 0.03125, %v20_v6  ;;  %v31_v9 = vmul.f32 0.03125, %v27_v7 }
  0x8f   :  { %v32_v10 = vsub.f32 %v14_v0, %v29_v8  ;;  %v34_v11 = vsub.f32 %v16_v1, %v31_v9 }
  0x90   :  { %v23_v12 = vpop.xlane.xlu0 %22 }
  0x91   :  { %v30_v13 = vmul.f32 0.03125, %v23_v12  ;;  %v35_v14 = vmul.f32 %v32_v10, %v32_v10  ;;  %v37_v15 = vmul.f32 %v34_v11, %v34_v11 }
  0x93   :  { %v33_v16 = vsub.f32 %v15_v2, %v30_v13  ;;  %v38_v17 = vsel %vm17_vm0, %v35_v14, 0.0  ;;  %v44_v18 = vsel %vm24_vm1, %v37_v15, 0.0 }
  0x94   :  { %39 = vadd.xlane.f32.xlu1 %v38_v17 }
  0x95   :  { %v36_v19 = vmul.f32 %v33_v16, %v33_v16 }
  0x97   :  { %v41_v20 = vsel %vm17_vm0, %v36_v19, 0.0 }
  0x98   :  { %45 = vadd.xlane.f32.xlu1 %v44_v18  ;;  %42 = vadd.xlane.f32.xlu0 %v41_v20 }
 0x11d   :  { %v40_v21 = vpop.xlane.xlu1 %39 }
 0x11e   :  { %v47_v22 = vmul.f32 0.03125, %v40_v21 }
 0x120   :  { %v50_v23 = vadd.f32 1e-05, %v47_v22 }
 0x121   :  { %v46_v24 = vpop.xlane.xlu1 %45  ;;  %v43_v25 = vpop.xlane.xlu0 %42 }
 0x122   :  { %88 = vrsqrt.f32 %v50_v23  ;;  %v49_v26 = vmul.f32 0.03125, %v46_v24  ;;  %v48_v27 = vmul.f32 0.03125, %v43_v25 }
 0x124   :  { %v52_v28 = vadd.f32 1e-05, %v49_v26  ;;  %v51_v29 = vadd.f32 1e-05, %v48_v27 }
 0x126   :  { %90 = vrsqrt.f32 %v52_v28 }
 0x127   :  { %92 = vrsqrt.f32 %v51_v29 }
 0x12f   :  { %v89_v30 = vpop.eup %88 }
 0x130   :  { %v56_v32 = vmul.f32 %v89_v30, %v32_v10 }
 0x132   :  { %v66_v34 = vmul.f32 %v86_v31, %v56_v32 }
 0x133   :  { %v91_v35 = vpop.eup %90 }
 0x134   :  { %v93_v36 = vpop.eup %92  ;;  %v76_v37 = vadd.f32 %v87_v33, %v66_v34  ;;  %v58_v38 = vmul.f32 %v91_v35, %v34_v11 }
 0x135   :  { %v57_v39 = vmul.f32 %v93_v36, %v33_v16 }
 0x136   :  { %79 = vst.msk [vmem:[%s150_s3] sm:$0xff] %vm17_vm0, %v76_v37  ;;  %v68_v40 = vmul.f32 %v86_v31, %v58_v38 }
 0x137   :  { %v67_v41 = vmul.f32 %v86_v31, %v57_v39 }
 0x138   :  { %v78_v42 = vadd.f32 %v87_v33, %v68_v40 }
 0x139   :  { %v77_v43 = vadd.f32 %v87_v33, %v67_v41 }
 0x13a   :  { %81 = vst.msk [vmem:[%s150_s3 + $0x10] sm:$0xf] %vm24_vm1, %v78_v42 }
 0x13b   :  { %80 = vst.msk [vmem:[%s150_s3 + $0x8] sm:$0xff] %vm17_vm0, %v77_v43 }

// kernel: compute_inbatch_contrastive_loss.47
= control target key start
LH: loop header
LB: loop body
LE: loop exit
PB: predicated region body
PF: predicated region fallthrough
CT: control target
= control target key end

     0   :  { %v108_v0 = vmov 0   ;;  %vm54_vm0 = vcmask 523264   ;;  %vm99_vm1 = vcmask 261120   ;;  %s226_s1 = inlined_call_operand.vmem [shape: f32[192,32], index: 1, kind: input, shape index: {}]   ;;  %s227_s0 = inlined_call_operand.vmem [shape: f32[16,192], index: 0, kind: input, shape index: {}]   ;;  %s228_s2 = inlined_call_operand.vmem [shape: f32[16,32], index: 2, kind: output, shape index: {}]  }
   0x1   :  { %58 = vmatprep.subr.bf16.mxu0 %v108_v0  ;;  %v32_v1 = vld [vmem:[%s226_s1 + $0x70] sm:$0xff]  ;;  %v33_v2 = vld [vmem:[%s226_s1 + $0x78] sm:$0xff]  ;;  %v30_v3 = vld [vmem:[%s226_s1 + $0x60] sm:$0xff] }
   0x2   :  { %v49_v4 = vpack.c.bf16 %v33_v2, %v32_v1  ;;  %v31_v5 = vld [vmem:[%s226_s1 + $0x68] sm:$0xff]  ;;  %v28_v7 = vld [vmem:[%s226_s1 + $0x50] sm:$0xff]  ;;  %v29_v8 = vld [vmem:[%s226_s1 + $0x58] sm:$0xff] }
   0x3   :  { %v48_v6 = vpack.c.bf16 %v31_v5, %v30_v3  ;;  %v47_v9 = vpack.c.bf16 %v29_v8, %v28_v7  ;;  %v26_v10 = vld [vmem:[%s226_s1 + $0x40] sm:$0xff]  ;;  %v27_v11 = vld [vmem:[%s226_s1 + $0x48] sm:$0xff]  ;;  %v15_v13 = vld [vmem:[%s227_s0 + $0x18] sm:$0xff] }
   0x4   :  { %59 = vmatpush1.bf16.msra.mxu0 %v49_v4  ;;  %v13_v12 = vld [vmem:[%s227_s0 + $0x8] sm:$0xff]  ;;  %v46_v15 = vpack.c.bf16 %v27_v11, %v26_v10  ;;  %v24_v16 = vld [vmem:[%s226_s1 + $0x30] sm:$0xff]  ;;  %v25_v17 = vld [vmem:[%s226_s1 + $0x38] sm:$0xff] }
   0x5   :  { %60 = vmatprep.subr.bf16.mxu0 %v108_v0  ;;  %v17_v14 = vpack.c.bf16 %v15_v13, %v13_v12  ;;  %v45_v18 = vpack.c.bf16 %v25_v17, %v24_v16  ;;  %v22_v19 = vld [vmem:[%s226_s1 + $0x20] sm:$0xff]  ;;  %v23_v20 = vld [vmem:[%s226_s1 + $0x28] sm:$0xff]  ;;  %v20_v22 = vld [vmem:[%s226_s1 + $0x10] sm:$0xff] }
   0x6   :  { %v44_v21 = vpack.c.bf16 %v23_v20, %v22_v19  ;;  %v21_v23 = vld [vmem:[%s226_s1 + $0x18] sm:$0xff]  ;;  %v18_v25 = vld [vmem:[%s226_s1] sm:$0xff]  ;;  %v19_v26 = vld [vmem:[%s226_s1 + $0x8] sm:$0xff] }
   0x7   :  { %106 = vmatprep.mubr.msk.bf16.mxu0 %vm54_vm0, %v17_v14  ;;  %v43_v24 = vpack.c.bf16 %v21_v23, %v20_v22  ;;  %v42_v27 = vpack.c.bf16 %v19_v26, %v18_v25  ;;  %v40_v28 = vld [vmem:[%s226_s1 + $0xb0] sm:$0xff]  ;;  %v41_v29 = vld [vmem:[%s226_s1 + $0xb8] sm:$0xff]  ;;  %v38_v31 = vld [vmem:[%s226_s1 + $0xa0] sm:$0xff] }
   0x8   :  { %61 = vmatpush1.bf16.msra.mxu0 %v48_v6  ;;  %v53_v30 = vpack.c.bf16 %v41_v29, %v40_v28  ;;  %v39_v32 = vld [vmem:[%s226_s1 + $0xa8] sm:$0xff]  ;;  %v36_v34 = vld [vmem:[%s226_s1 + $0x90] sm:$0xff]  ;;  %v37_v35 = vld [vmem:[%s226_s1 + $0x98] sm:$0xff] }
   0x9   :  { %62 = vmatprep.subr.bf16.mxu0 %v108_v0  ;;  %v52_v33 = vpack.c.bf16 %v39_v32, %v38_v31  ;;  %v51_v36 = vpack.c.bf16 %v37_v35, %v36_v34  ;;  %v34_v37 = vld [vmem:[%s226_s1 + $0x80] sm:$0xff]  ;;  %v35_v38 = vld [vmem:[%s226_s1 + $0x88] sm:$0xff]  ;;  %v14_v41 = vld [vmem:[%s227_s0 + $0x10] sm:$0xff] }
   0xa   :  { %v50_v39 = vpack.c.bf16 %v35_v38, %v34_v37  ;;  %v12_v40 = vld [vmem:[%s227_s0] sm:$0xff] }
   0xb   :  { %v16_v42 = vpack.c.bf16 %v14_v41, %v12_v40 }
   0xc   :  { %63 = vmatpush1.bf16.msra.mxu0 %v47_v9 }
   0xd   :  { %64 = vmatprep.subr.bf16.mxu0 %v108_v0 }
  0x10   :  { %65 = vmatpush1.bf16.msra.mxu0 %v46_v15 }
  0x11   :  { %66 = vmatprep.subr.bf16.mxu0 %v108_v0 }
  0x14   :  { %67 = vmatpush1.bf16.msra.mxu0 %v45_v18 }
  0x15   :  { %68 = vmatprep.subr.bf16.mxu0 %v108_v0 }
  0x18   :  { %69 = vmatpush1.bf16.msra.mxu0 %v44_v21 }
  0x19   :  { %70 = vmatprep.subr.bf16.mxu0 %v108_v0 }
  0x1c   :  { %71 = vmatpush1.bf16.msra.mxu0 %v43_v24 }
  0x1d   :  { %72 = vmatprep.subr.bf16.mxu0 %v108_v0 }
  0x20   :  { %73 = vmatpush1.bf16.msra.mxu0 %v42_v27 }
  0x21   :  { %82 = vmatprep.subr.bf16.mxu0 %v108_v0 }
  0x24   :  { %83 = vmatpush2.bf16.msra.mxu0 %v53_v30 }
  0x25   :  { %84 = vmatprep.subr.bf16.mxu0 %v108_v0 }
  0x28   :  { %85 = vmatpush2.bf16.msra.mxu0 %v52_v33 }
  0x29   :  { %86 = vmatprep.subr.bf16.mxu0 %v108_v0 }
  0x2c   :  { %87 = vmatpush2.bf16.msra.mxu0 %v51_v36 }
  0x2d   :  { %88 = vmatprep.subr.bf16.mxu0 %v108_v0 }
  0x30   :  { %89 = vmatpush2.bf16.msra.mxu0 %v50_v39 }
  0x33   :  { %91 = vmatmul.mubr.bf16.vlgmr.msra.gmra.mxu0 %v16_v42 }
  0xf3   :  { %v92_v43 = vpop.f32.mrf.mxu0 }
  0xf4   :  { %100 = vst.msk [vmem:[%s228_s2] sm:$0xff] %vm99_vm1, %v92_v43 }
  0xf5   :  { %v94_v44 = vpop.f32.mrf.mxu0 }
  0xf7   :  { %v95_v45 = vpop.f32.mrf.mxu0 }
  0xf8   :  { %101 = vst.msk [vmem:[%s228_s2 + $0x8] sm:$0xff] %vm99_vm1, %v95_v45 }
  0xf9   :  { %v97_v46 = vpop.f32.mrf.mxu0 }

// kernel: compute_inbatch_contrastive_loss.49
= control target key start
LH: loop header
LB: loop body
LE: loop exit
PB: predicated region body
PF: predicated region fallthrough
CT: control target
= control target key end

     0   :  { %vm24_vm0 = vcmask 261120   ;;  %vm31_vm1 = vcmask 257024   ;;  %vm158_vm2 = vcmask 781312   ;;  %vm155_vm3 = vcmask 785408   ;;  %s264_s0 = inlined_call_operand.vmem [shape: f32[20,32], index: 0, kind: input, shape index: {}]   ;;  %s265_s1 = inlined_call_operand.vmem [shape: f32[32,96], index: 1, kind: input, shape index: {}]   ;;  %s266_s2 = inlined_call_operand.vmem [shape: f32[1,32], index: 2, kind: input, shape index: {}]   ;;  %s267_s3 = inlined_call_operand.vmem [shape: f32[1,32], index: 3, kind: input, shape index: {}]   ;;  %s268_s4 = inlined_call_operand.vmem [shape: f32[1,96], index: 4, kind: input, shape index: {}]   ;;  %s269_s5 = inlined_call_operand.vmem [shape: f32[20,96], index: 5, kind: output, shape index: {}]  }
   0x1   :  { %v21_v0 = vld [vmem:[%s264_s0] sm:$0xff]  ;;  %v23_v1 = vld [vmem:[%s264_s0 + $0x10] sm:$0xf]  ;;  %v22_v2 = vld [vmem:[%s264_s0 + $0x8] sm:$0xff] }
   0x2   :  { %v25_v3 = vsel %vm24_vm0, %v21_v0, 0.0  ;;  %v32_v4 = vsel %vm31_vm1, %v23_v1, 0.0  ;;  %v28_v5 = vsel %vm24_vm0, %v22_v2, 0.0  ;;  %v90_v21 = vld [vmem:[%s265_s1 + $0x10] sm:$0xff]  ;;  %v91_v22 = vld [vmem:[%s265_s1 + $0x18] sm:$0xff]  ;;  %v88_v23 = vld [vmem:[%s265_s1] sm:$0xff] }
   0x3   :  { %26 = vadd.xlane.f32.xlu0 %v25_v3  ;;  %33 = vadd.xlane.f32.xlu1 %v32_v4  ;;  %v93_v24 = vpack.c.bf16 %v91_v22, %v90_v21  ;;  %v89_v25 = vld [vmem:[%s265_s1 + $0x8] sm:$0xff]  ;;  %v164_v38 = vld [vmem:[%s266_s2] ss:$0 sm:$0xff] }
   0x4   :  { %v92_v26 = vpack.c.bf16 %v89_v25, %v88_v23  ;;  %v165_v44 = vld [vmem:[%s267_s3] ss:$0 sm:$0xff] }
   0x5   :  { %173 = vmatprep.subr.bf16.mxu0 %v93_v24  ;;  %v166_v52 = vld [vmem:[%s268_s4] ss:$0 sm:$0xff] }
   0x6   :  { %174 = vmatpush3.bf16.msra.mxu0 %v93_v24 }
   0x7   :  { %29 = vadd.xlane.f32.xlu0 %v28_v5  ;;  %175 = vmatprep.subr.bf16.mxu0 %v92_v26 }
   0xa   :  { %176 = vmatpush3.bf16.msra.mxu0 %v92_v26 }
  0x8c   :  { %v27_v6 = vpop.xlane.xlu0 %26  ;;  %v34_v7 = vpop.xlane.xlu1 %33 }
  0x8d   :  { %v36_v8 = vmul.f32 0.03125, %v27_v6  ;;  %v38_v9 = vmul.f32 0.03125, %v34_v7 }
  0x8f   :  { %v39_v10 = vsub.f32 %v21_v0, %v36_v8  ;;  %v41_v11 = vsub.f32 %v23_v1, %v38_v9 }
  0x90   :  { %v30_v12 = vpop.xlane.xlu0 %29 }
  0x91   :  { %v37_v13 = vmul.f32 0.03125, %v30_v12  ;;  %v42_v14 = vmul.f32 %v39_v10, %v39_v10  ;;  %v44_v15 = vmul.f32 %v41_v11, %v41_v11 }
  0x93   :  { %v40_v16 = vsub.f32 %v22_v2, %v37_v13  ;;  %v45_v17 = vsel %vm24_vm0, %v42_v14, 0.0  ;;  %v51_v18 = vsel %vm31_vm1, %v44_v15, 0.0 }
  0x94   :  { %46 = vadd.xlane.f32.xlu1 %v45_v17 }
  0x95   :  { %v43_v19 = vmul.f32 %v40_v16, %v40_v16 }
  0x97   :  { %v48_v20 = vsel %vm24_vm0, %v43_v19, 0.0 }
  0x98   :  { %52 = vadd.xlane.f32.xlu1 %v51_v18  ;;  %49 = vadd.xlane.f32.xlu0 %v48_v20 }
 0x11d   :  { %v47_v27 = vpop.xlane.xlu1 %46 }
 0x11e   :  { %v54_v28 = vmul.f32 0.03125, %v47_v27 }
 0x120   :  { %v57_v29 = vadd.f32 1e-05, %v54_v28 }
 0x121   :  { %v53_v30 = vpop.xlane.xlu1 %52  ;;  %v50_v31 = vpop.xlane.xlu0 %49 }
 0x122   :  { %181 = vrsqrt.f32 %v57_v29  ;;  %v56_v32 = vmul.f32 0.03125, %v53_v30  ;;  %v55_v33 = vmul.f32 0.03125, %v50_v31 }
 0x124   :  { %v59_v34 = vadd.f32 1e-05, %v56_v32  ;;  %v58_v35 = vadd.f32 1e-05, %v55_v33 }
 0x126   :  { %183 = vrsqrt.f32 %v59_v34 }
 0x127   :  { %185 = vrsqrt.f32 %v58_v35 }
 0x12f   :  { %v182_v36 = vpop.eup %181 }
 0x130   :  { %v63_v37 = vmul.f32 %v182_v36, %v39_v10 }
 0x132   :  { %v73_v43 = vmul.f32 %v164_v38, %v63_v37 }
 0x133   :  { %v184_v39 = vpop.eup %183 }
 0x134   :  { %v186_v40 = vpop.eup %185  ;;  %v65_v41 = vmul.f32 %v184_v39, %v41_v11  ;;  %v83_v48 = vadd.f32 %v165_v44, %v73_v43 }
 0x135   :  { %v64_v42 = vmul.f32 %v186_v40, %v40_v16 }
 0x136   :  { %v75_v45 = vmul.f32 %v164_v38, %v65_v41 }
 0x137   :  { %v74_v46 = vmul.f32 %v164_v38, %v64_v42 }
 0x138   :  { %v85_v47 = vadd.f32 %v165_v44, %v75_v45 }
 0x139   :  { %v84_v49 = vadd.f32 %v165_v44, %v74_v46 }
 0x13a   :  { %v87_v50 = vpack.c.bf16 %v85_v47, %v85_v47 }
 0x13b   :  { %v86_v51 = vpack.c.bf16 %v84_v49, %v83_v48 }
 0x13d   :  { %177 = vmatprep.mubr.msk.bf16.mxu0 %vm24_vm0, %v86_v51 }
 0x13e   :  { %178 = vmatmul.mubr.msk.bf16.vlgmr.msra.gmra.mxu0 %vm24_vm0, %v87_v50 }
 0x1fe   :  { %v179_v53 = vpop.f32.mrf.mxu0 }
 0x1ff   :  { %v150_v54 = vadd.f32 %v179_v53, %v166_v52 }
 0x200   :  { %v141_v55 = vpop.f32.mrf.mxu0 }
 0x201   :  { %159 = vst.msk [vmem:[%s269_s5 + $0x10] sm:$0xf] %vm158_vm2, %v150_v54  ;;  %v142_v56 = vadd.f32 %v166_v52, %v141_v55 }
 0x202   :  { %v180_v57 = vpop.f32.mrf.mxu0 }
 0x203   :  { %156 = vst.msk [vmem:[%s269_s5] sm:$0xff] %vm155_vm3, %v142_v56 }
 0x204   :  { %v144_v58 = vpop.f32.mrf.mxu0 }
 0x205   :  { %v145_v59 = vadd.f32 %v166_v52, %v144_v58 }
 0x207   :  { %157 = vst.msk [vmem:[%s269_s5 + $0x8] sm:$0xff] %vm155_vm3, %v145_v59 }

// kernel: compute_inbatch_contrastive_loss.50
= control target key start
LH: loop header
LB: loop body
LE: loop exit
PB: predicated region body
PF: predicated region fallthrough
CT: control target
= control target key end

     0   :  { %s794_s6 = smov 0   ;;  %s886_s0 = inlined_call_operand.vmem [shape: f32[4,5,96], index: 0, kind: input, shape index: {}]   ;;  %s887_s1 = inlined_call_operand.vmem [shape: f32[4,5,32], index: 1, kind: output, shape index: {}]  }
   0x1 LB: > { %s637_s7 = sadd.s32 4294967295, %s765_s6   ;;  %p641_p0 = scmp.ge.s32.totalorder %s765_s6, 1  ;;  %s765_s6 = sphi %s794_s6, %s11_s6  }
   0x2   : > { %p86_p1 = scmp.lt.s32.totalorder %s765_s6, 5 }
   0x4   : > { %p87_p2 = pnand %p641_p0, %p86_p1 }
   0x5   : > { %p104_p3 = scmp.lt.s32.totalorder (!%p87_p2), %s637_s7, 3  ;;  %s769_s12 = smov (!%p87_p2), 96  }
   0x6   : > { %90 = sbr.rel (%p87_p2) target bundleno = 1537 (0x601), region = 24  ;;  %s770_s13 = smov (!%p87_p2), 64  }
   0x7   : > { %s771_s14 = smov (!%p87_p2), 88   ;;  %s772_s15 = smov (!%p87_p2), 72  }
   0x8   : > { %s774_s16 = smov (!%p87_p2), 120   ;;  %s775_s17 = smov (!%p87_p2), 80  }
   0x9   : > { %s776_s18 = smov (!%p87_p2), 112   ;;  %s777_s19 = smov (!%p87_p2), 104  }
   0xa   : > { %s778_s20 = smov (!%p87_p2), 56   ;;  %s779_s21 = smov (!%p87_p2), 48  }
   0xb   : > { %v767_v0 = vmov 0.0   ;;  %vm768_vm0 = vmmov 0   ;;  %s889_s7 = smov (!%p104_p3, %s637_s7), 3  ;;  %vm118_vm1 = vcmask 64512   ;;  %vm166_vm2 = vcmask 36864   ;;  %s780_s22 = smov 40  }
   0xc   : > { %670 = vmatprep.subr.bf16.mxu0 %v767_v0  ;;  %672 = vmatprep.mubr.msk.bf16.mxu0 %vm768_vm0, %v767_v0  ;;  %s642_s8 = sshll.u32 %s889_s7, 3  ;;  %vm185_vm3 = vcmask 1041408   ;;  %vm186_vm4 = vcmask 1042432   ;;  %v773_v12 = vmov 65535   ;;  %vm181_vm5 = vcmask 39936   ;;  %s781_s23 = smov 8  }
   0xd   : > { %676 = vmatprep.subr.bf16.mxu1 %v767_v0  ;;  %678 = vmatprep.mubr.msk.bf16.mxu1 %vm768_vm0, %v767_v0  ;;  %s107_s11 = scalar_lea.vmem %s886_s0, %s642_s8  ;;  %v187_v13 = vsel %vm185_vm3, 4294967295, %v773_v12  ;;  %s782_s24 = smov 16   ;;  %vm578_vm6 = vcmask 130048   ;;  %vm580_vm7 = vcmask 195584   ;;  %vm582_vm8 = vcmask 258048  }
   0xe   : > { %v113_v1 = vld [vmem:[%s107_s11] sm:$0x1f]  ;;  %v829_v14 = vsel %vm186_vm4, %v187_v13, 0  ;;  %s783_s25 = smov 24   ;;  %s111_s28 = scalar_lea.vmem %s887_s1, %s642_s8 }
   0xf   : > { %v816_v2 = vpack.c.bf16 %v113_v1, %v113_v1 }
  0x11   : > { %116 = vrot.lane.b32.xlu0 %v816_v2, %s769_s12  ;;  %179 = vrot.lane.b32.xlu1 %v816_v2, %s770_s13 }
  0x15   : > { %234 = vrot.lane.b32.xlu1 %v816_v2, %s771_s14 }
  0x83   : > { %v117_v3 = vpop.permute.xlu0 %116  ;;  %v180_v11 = vpop.permute.xlu1 %179 }
  0x84   : > { %v123_v4 = vsel %vm118_vm1, %v117_v3, 0  ;;  %v190_v15 = vand.u32 %v829_v14, %v180_v11 }
  0x85   : > { %671 = vmatpush3.bf16.xpose.msra.mxu0 %v123_v4 }
  0x86   : > { %688 = vmatprep.subr.bf16.mxu0 %v767_v0  ;;  %677 = vmatpush3.bf16.msra.mxu1 %v190_v15 }
  0x87   : > { %682 = vmatprep.subr.bf16.mxu1 %v767_v0  ;;  %v235_v21 = vpop.permute.xlu1 %234 }
  0x88   : > { %v240_v27 = vsel %vm118_vm1, %v235_v21, 0 }
  0x8c   : > { %673 = vmatmul.mubr.msk.bf16.vlgmr.msra.gmra.mxu0 %vm118_vm1, %v816_v2 }
  0x8d   : > { %690 = vmatprep.mubr.msk.bf16.mxu0 %vm768_vm0, %v767_v0 }
 0x14c   : > { %v159_v5 = vpop.f32.mrf.mxu0 }
 0x14d   : > { %v165_v6 = vmul.f32 0.35355338, %v159_v5 }
 0x14e   : > { %v674_v7 = vpop.f32.mrf.mxu0 }
 0x14f   : > { %v167_v8 = vsel %vm166_vm2, %v165_v6, -inf }
 0x150   : > { %168 = vmax.xlane.f32.xlu0 %v167_v8  ;;  %v162_v9 = vpop.f32.mrf.mxu0 }
 0x152   : > { %v675_v10 = vpop.f32.mrf.mxu0 }
 0x166   : > { %456 = vrot.lane.b32.xlu0 %v816_v2, %s772_s15 }
 0x1d9   : > { %v169_v16 = vpop.xlane.xlu0 %168 }
 0x1da   : > { %v170_v17 = vsub.f32 %v165_v6, %v169_v16 }
 0x1dc   : > { %v171_v18 = vmul.f32 1.442695, %v170_v17 }
 0x1dd   : > { %v457_v30 = vpop.permute.xlu0 %456 }
 0x1de   : > { %743 = vpow2.f32 %v171_v18  ;;  %v462_v32 = vsel %vm118_vm1, %v457_v30, 0 }
 0x1eb   : > { %v744_v19 = vpop.eup %743 }
 0x1ec   : > { %v173_v20 = vsel %vm166_vm2, %v744_v19, 0.0 }
 0x1ed   : > { %174 = vadd.xlane.f32.xlu1 %v173_v20 }
 0x1fe   : > { %232 = vrot.lane.b32.xlu1 %v816_v2, %s774_s16 }
 0x202   : > { %345 = vrot.lane.b32.xlu1 %v816_v2, %s775_s17 }
 0x206   : > { %343 = vrot.lane.b32.xlu1 %v816_v2, %s776_s18 }
 0x20a   : > { %454 = vrot.lane.b32.xlu1 %v816_v2, %s777_s19 }
 0x276   : > { %v175_v22 = vpop.xlane.xlu1 %174 }
 0x277   : > { %745 = vrcp.f32 %v175_v22 }
 0x27a   : > { %v233_v25 = vpop.permute.xlu1 %232 }
 0x27e   : > { %v346_v28 = vpop.permute.xlu1 %345 }
 0x27f   : > { %v351_v29 = vsel %vm118_vm1, %v346_v28, 0 }
 0x282   : > { %v344_v31 = vpop.permute.xlu1 %343 }
 0x284   : > { %v746_v23 = vpop.eup %745 }
 0x285   : > { %v177_v24 = vmul.f32 %v746_v23, %v744_v19 }
 0x286   : > { %v455_v33 = vpop.permute.xlu1 %454 }
 0x287   : > { %v178_v26 = vpack.c.bf16 %v177_v24, %v177_v24 }
 0x289   : > { %679 = vmatmul.mubr.msk.bf16.vlgmr.msra.gmra.mxu1 %vm181_vm5, %v178_v26 }
 0x28a   : > { %683 = vmatpush3.bf16.xpose.msra.mxu1 %v240_v27  ;;  %684 = vmatprep.mubr.msk.bf16.mxu1 %vm768_vm0, %v767_v0 }
 0x28b   : > { %694 = vmatprep.subr.bf16.mxu1 %v767_v0 }
 0x291   : > { %685 = vmatmul.mubr.msk.bf16.vlgmr.msra.gmra.mxu1 %vm118_vm1, %v233_v25 }
 0x292   : > { %695 = vmatpush3.bf16.xpose.msra.mxu1 %v351_v29  ;;  %696 = vmatprep.mubr.msk.bf16.mxu1 %vm768_vm0, %v767_v0 }
 0x293   : > { %706 = vmatprep.subr.bf16.mxu1 %v767_v0 }
 0x299   : > { %697 = vmatmul.mubr.msk.bf16.vlgmr.msra.gmra.mxu1 %vm118_vm1, %v344_v31 }
 0x29a   : > { %707 = vmatpush3.bf16.xpose.msra.mxu1 %v462_v32  ;;  %708 = vmatprep.mubr.msk.bf16.mxu1 %vm768_vm0, %v767_v0 }
 0x2a1   : > { %709 = vmatmul.mubr.msk.bf16.vlgmr.msra.gmra.mxu1 %vm118_vm1, %v455_v33 }
 0x349   : > { %v853_v34 = vpop.f32.mrf.mxu1 }
 0x34b   : > { %v680_v35 = vpop.f32.mrf.mxu1 }
 0x34d   : > { %v229_v36 = vpop.f32.mrf.mxu1 }
 0x34f   : > { %v681_v37 = vpop.f32.mrf.mxu1 }
 0x351   : > { %v276_v38 = vpop.f32.mrf.mxu1 }
 0x352   : > { %v282_v39 = vmul.f32 0.35355338, %v276_v38 }
 0x353   : > { %v686_v40 = vpop.f32.mrf.mxu1 }
 0x354   : > { %v283_v41 = vsel %vm166_vm2, %v282_v39, -inf }
 0x355   : > { %284 = vmax.xlane.f32.xlu1 %v283_v41  ;;  %v279_v42 = vpop.f32.mrf.mxu1 }
 0x357   : > { %v687_v43 = vpop.f32.mrf.mxu1 }
 0x359   : > { %v387_v44 = vpop.f32.mrf.mxu1 }
 0x35a   : > { %v393_v45 = vmul.f32 0.35355338, %v387_v44 }
 0x35b   : > { %v698_v46 = vpop.f32.mrf.mxu1 }
 0x35c   : > { %v394_v47 = vsel %vm166_vm2, %v393_v45, -inf }
 0x35d   : > { %395 = vmax.xlane.f32.xlu0 %v394_v47  ;;  %v390_v48 = vpop.f32.mrf.mxu1 }
 0x35f   : > { %v699_v49 = vpop.f32.mrf.mxu1 }
 0x361   : > { %v498_v50 = vpop.f32.mrf.mxu1 }
 0x362   : > { %v504_v51 = vmul.f32 0.35355338, %v498_v50 }
 0x363   : > { %v710_v52 = vpop.f32.mrf.mxu1 }
 0x364   : > { %v505_v53 = vsel %vm166_vm2, %v504_v51, -inf }
 0x365   : > { %506 = vmax.xlane.f32.xlu1 %v505_v53  ;;  %v501_v54 = vpop.f32.mrf.mxu1 }
 0x367   : > { %v711_v55 = vpop.f32.mrf.mxu1 }
 0x3de   : > { %v285_v56 = vpop.xlane.xlu1 %284 }
 0x3df   : > { %v286_v57 = vsub.f32 %v282_v39, %v285_v56 }
 0x3e1   : > { %v287_v58 = vmul.f32 1.442695, %v286_v57 }
 0x3e3   : > { %747 = vpow2.f32 %v287_v58 }
 0x3e6   : > { %v396_v4 = vpop.xlane.xlu0 %395 }
 0x3e7   : > { %v397_v5 = vsub.f32 %v393_v45, %v396_v4 }
 0x3e9   : > { %v398_v6 = vmul.f32 1.442695, %v397_v5 }
 0x3ee   : > { %v507_v59 = vpop.xlane.xlu1 %506 }
 0x3ef   : > { %v508_v60 = vsub.f32 %v504_v51, %v507_v59 }
 0x3f0   : > { %v748_v61 = vpop.eup %747 }
 0x3f1   : > { %v509_v62 = vmul.f32 1.442695, %v508_v60  ;;  %v289_v63 = vsel %vm166_vm2, %v748_v61, 0.0 }
 0x3f2   : > { %290 = vadd.xlane.f32.xlu1 %v289_v63 }
 0x3f3   : > { %749 = vpow2.f32 %v509_v62 }
 0x3f4   : > { %751 = vpow2.f32 %v398_v6 }
 0x400   : > { %v750_v1 = vpop.eup %749 }
 0x401   : > { %v511_v3 = vsel %vm166_vm2, %v750_v1, 0.0  ;;  %v752_v7 = vpop.eup %751 }
 0x402   : > { %512 = vadd.xlane.f32.xlu0 %v511_v3  ;;  %v400_v8 = vsel %vm166_vm2, %v752_v7, 0.0 }
 0x403   : > { %295 = vrot.lane.b32.xlu1 %v816_v2, %s778_s20 }
 0x418   : > { %406 = vrot.lane.b32.xlu0 %v816_v2, %s779_s21 }
 0x427   : > { %401 = vadd.xlane.f32.xlu1 %v400_v8 }
 0x438   : > { %517 = vrot.lane.b32.xlu1 %v816_v2, %s780_s22 }
 0x47b   : > { %v291_v9 = vpop.xlane.xlu1 %290 }
 0x47c   : > { %753 = vrcp.f32 %v291_v9 }
 0x47f   : > { %v296_v10 = vpop.permute.xlu1 %295 }
 0x480   : > { %v301_v11 = vand.u32 %v296_v10, %v829_v14 }
 0x482   : > { %689 = vmatpush3.bf16.msra.mxu0 %v301_v11 }
 0x483   : > { %700 = vmatprep.subr.bf16.mxu0 %v767_v0 }
 0x489   : > { %v754_v12 = vpop.eup %753 }
 0x48a   : > { %v293_v13 = vmul.f32 %v754_v12, %v748_v61 }
 0x48b   : > { %v513_v15 = vpop.xlane.xlu0 %512 }
 0x48c   : > { %v294_v16 = vpack.c.bf16 %v293_v13, %v293_v13 }
 0x48e   : > { %691 = vmatmul.mubr.msk.bf16.vlgmr.msra.gmra.mxu0 %vm181_vm5, %v294_v16 }
 0x48f   : > { %v407_v17 = vpop.permute.xlu0 %406  ;;  %702 = vmatprep.mubr.msk.bf16.mxu0 %vm768_vm0, %v767_v0 }
 0x490   : > { %v412_v2 = vand.u32 %v407_v17, %v829_v14 }
 0x492   : > { %701 = vmatpush3.bf16.msra.mxu0 %v412_v2 }
 0x493   : > { %712 = vmatprep.subr.bf16.mxu0 %v767_v0 }
 0x4b0   : > { %v402_v18 = vpop.xlane.xlu1 %401 }
 0x4b1   : > { %755 = vrcp.f32 %v402_v18 }
 0x4b2   : > { %757 = vrcp.f32 %v513_v15 }
 0x4b4   : > { %v518_v19 = vpop.permute.xlu1 %517 }
 0x4b5   : > { %v523_v22 = vand.u32 %v518_v19, %v829_v14 }
 0x4be   : > { %v756_v20 = vpop.eup %755 }
 0x4bf   : > { %v404_v21 = vmul.f32 %v756_v20, %v752_v7  ;;  %v758_v24 = vpop.eup %757 }
 0x4c0   : > { %v515_v25 = vmul.f32 %v758_v24, %v750_v1 }
 0x4c1   : > { %v405_v23 = vpack.c.bf16 %v404_v21, %v404_v21 }
 0x4c2   : > { %v516_v26 = vpack.c.bf16 %v515_v25, %v515_v25 }
 0x4c3   : > { %703 = vmatmul.mubr.msk.bf16.vlgmr.msra.gmra.mxu0 %vm181_vm5, %v405_v23 }
 0x4c4   : > { %713 = vmatpush3.bf16.msra.mxu0 %v523_v22  ;;  %714 = vmatprep.mubr.msk.bf16.mxu0 %vm768_vm0, %v767_v0 }
 0x4cb   : > { %715 = vmatmul.mubr.msk.bf16.vlgmr.msra.gmra.mxu0 %vm181_vm5, %v516_v26 }
 0x54e   : > { %v337_v27 = vpop.f32.mrf.mxu0 }
 0x54f   : > { %566 = vrot.lane.b32.xlu1 %v337_v27, %s781_s23 }
 0x550   : > { %v692_v28 = vpop.f32.mrf.mxu0 }
 0x552   : > { %v340_v29 = vpop.f32.mrf.mxu0 }
 0x554   : > { %v693_v30 = vpop.f32.mrf.mxu0 }
 0x583   : > { %v448_v31 = vpop.f32.mrf.mxu0 }
 0x584   : > { %570 = vrot.lane.b32.xlu0 %v448_v31, %s782_s24 }
 0x585   : > { %v704_v14 = vpop.f32.mrf.mxu0 }
 0x587   : > { %v451_v32 = vpop.f32.mrf.mxu0 }
 0x589   : > { %v705_v33 = vpop.f32.mrf.mxu0 }
 0x58b   : > { %v559_v35 = vpop.f32.mrf.mxu0 }
 0x58c   : > { %574 = vrot.lane.b32.xlu1 %v559_v35, %s783_s25 }
 0x58d   : > { %v716_v0 = vpop.f32.mrf.mxu0 }
 0x58f   : > { %v562_v36 = vpop.f32.mrf.mxu0 }
 0x591   : > { %v717_v37 = vpop.f32.mrf.mxu0 }
 0x5c1   : > { %v567_v38 = vpop.permute.xlu1 %566 }
 0x5c2   : > { %v577_v40 = vsel %vm118_vm1, %v853_v34, %v567_v38 }
 0x5f6   : > { %v571_v39 = vpop.permute.xlu0 %570 }
 0x5f7   : > { %v579_v41 = vsel %vm578_vm6, %v577_v40, %v571_v39 }
 0x5fe   : > { %v575_v42 = vpop.permute.xlu1 %574 }
 0x5ff   : > { %v581_v43 = vsel %vm580_vm7, %v579_v41, %v575_v42 }
 0x600   : > { %583 = vst.msk [vmem:[%s111_s28] sm:$0x1f] %vm582_vm8, %v581_v43 }
 0x601 PF: > { %s11_s6 = sadd.s32 1, %s765_s6  }
 0x602   : > { %p8_p4 = scmp.ge.s32.totalorder %s11_s6, 6  }
 0x604   :  { %10 = sbr.rel (!%p8_p4) target bundleno = 1 (0x1), region = 54 }

// kernel: compute_inbatch_contrastive_loss.52
= control target key start
LH: loop header
LB: loop body
LE: loop exit
PB: predicated region body
PF: predicated region fallthrough
CT: control target
= control target key end

     0   :  { %vm24_vm0 = vcmask 261120   ;;  %vm31_vm1 = vcmask 257024   ;;  %s301_s0 = inlined_call_operand.vmem [shape: f32[20,32], index: 0, kind: input, shape index: {}]   ;;  %s302_s1 = inlined_call_operand.vmem [shape: f32[32,128], index: 1, kind: input, shape index: {}]   ;;  %s303_s2 = inlined_call_operand.vmem [shape: f32[1,32], index: 2, kind: input, shape index: {}]   ;;  %s304_s3 = inlined_call_operand.vmem [shape: f32[1,32], index: 3, kind: input, shape index: {}]   ;;  %s305_s4 = inlined_call_operand.vmem [shape: f32[1,128], index: 4, kind: input, shape index: {}]   ;;  %s306_s5 = inlined_call_operand.vmem [shape: f32[20,128], index: 5, kind: output, shape index: {}]  }
   0x1   :  { %v21_v0 = vld [vmem:[%s301_s0] sm:$0xff]  ;;  %v23_v1 = vld [vmem:[%s301_s0 + $0x10] sm:$0xf]  ;;  %v22_v2 = vld [vmem:[%s301_s0 + $0x8] sm:$0xff] }
   0x2   :  { %v25_v3 = vsel %vm24_vm0, %v21_v0, 0.0  ;;  %v32_v4 = vsel %vm31_vm1, %v23_v1, 0.0  ;;  %v28_v5 = vsel %vm24_vm0, %v22_v2, 0.0  ;;  %v90_v21 = vld [vmem:[%s302_s1 + $0x10] sm:$0xff]  ;;  %v91_v22 = vld [vmem:[%s302_s1 + $0x18] sm:$0xff]  ;;  %v88_v23 = vld [vmem:[%s302_s1] sm:$0xff] }
   0x3   :  { %26 = vadd.xlane.f32.xlu0 %v25_v3  ;;  %33 = vadd.xlane.f32.xlu1 %v32_v4  ;;  %v93_v24 = vpack.c.bf16 %v91_v22, %v90_v21  ;;  %v89_v25 = vld [vmem:[%s302_s1 + $0x8] sm:$0xff]  ;;  %v186_v38 = vld [vmem:[%s303_s2] ss:$0 sm:$0xff] }
   0x4   :  { %v92_v26 = vpack.c.bf16 %v89_v25, %v88_v23  ;;  %v187_v44 = vld [vmem:[%s304_s3] ss:$0 sm:$0xff] }
   0x5   :  { %198 = vmatprep.subr.bf16.mxu0 %v93_v24  ;;  %v188_v52 = vld [vmem:[%s305_s4] ss:$0 sm:$0xff] }
   0x6   :  { %199 = vmatpush3.bf16.msra.mxu0 %v93_v24 }
   0x7   :  { %29 = vadd.xlane.f32.xlu0 %v28_v5  ;;  %200 = vmatprep.subr.bf16.mxu0 %v92_v26 }
   0xa   :  { %201 = vmatpush3.bf16.msra.mxu0 %v92_v26 }
  0x8c   :  { %v27_v6 = vpop.xlane.xlu0 %26  ;;  %v34_v7 = vpop.xlane.xlu1 %33 }
  0x8d   :  { %v36_v8 = vmul.f32 0.03125, %v27_v6  ;;  %v38_v9 = vmul.f32 0.03125, %v34_v7 }
  0x8f   :  { %v39_v10 = vsub.f32 %v21_v0, %v36_v8  ;;  %v41_v11 = vsub.f32 %v23_v1, %v38_v9 }
  0x90   :  { %v30_v12 = vpop.xlane.xlu0 %29 }
  0x91   :  { %v37_v13 = vmul.f32 0.03125, %v30_v12  ;;  %v42_v14 = vmul.f32 %v39_v10, %v39_v10  ;;  %v44_v15 = vmul.f32 %v41_v11, %v41_v11 }
  0x93   :  { %v40_v16 = vsub.f32 %v22_v2, %v37_v13  ;;  %v45_v17 = vsel %vm24_vm0, %v42_v14, 0.0  ;;  %v51_v18 = vsel %vm31_vm1, %v44_v15, 0.0 }
  0x94   :  { %46 = vadd.xlane.f32.xlu1 %v45_v17 }
  0x95   :  { %v43_v19 = vmul.f32 %v40_v16, %v40_v16 }
  0x97   :  { %v48_v20 = vsel %vm24_vm0, %v43_v19, 0.0 }
  0x98   :  { %52 = vadd.xlane.f32.xlu1 %v51_v18  ;;  %49 = vadd.xlane.f32.xlu0 %v48_v20 }
 0x11d   :  { %v47_v27 = vpop.xlane.xlu1 %46 }
 0x11e   :  { %v54_v28 = vmul.f32 0.03125, %v47_v27 }
 0x120   :  { %v57_v29 = vadd.f32 1e-05, %v54_v28 }
 0x121   :  { %v53_v30 = vpop.xlane.xlu1 %52  ;;  %v50_v31 = vpop.xlane.xlu0 %49 }
 0x122   :  { %206 = vrsqrt.f32 %v57_v29  ;;  %v56_v32 = vmul.f32 0.03125, %v53_v30  ;;  %v55_v33 = vmul.f32 0.03125, %v50_v31 }
 0x124   :  { %v59_v34 = vadd.f32 1e-05, %v56_v32  ;;  %v58_v35 = vadd.f32 1e-05, %v55_v33 }
 0x126   :  { %208 = vrsqrt.f32 %v59_v34 }
 0x127   :  { %210 = vrsqrt.f32 %v58_v35 }
 0x12f   :  { %v207_v36 = vpop.eup %206 }
 0x130   :  { %v63_v37 = vmul.f32 %v207_v36, %v39_v10 }
 0x132   :  { %v73_v43 = vmul.f32 %v186_v38, %v63_v37 }
 0x133   :  { %v209_v39 = vpop.eup %208 }
 0x134   :  { %v211_v40 = vpop.eup %210  ;;  %v65_v41 = vmul.f32 %v209_v39, %v41_v11  ;;  %v83_v48 = vadd.f32 %v187_v44, %v73_v43 }
 0x135   :  { %v64_v42 = vmul.f32 %v211_v40, %v40_v16 }
 0x136   :  { %v75_v45 = vmul.f32 %v186_v38, %v65_v41 }
 0x137   :  { %v74_v46 = vmul.f32 %v186_v38, %v64_v42 }
 0x138   :  { %v85_v47 = vadd.f32 %v187_v44, %v75_v45 }
 0x139   :  { %v84_v49 = vadd.f32 %v187_v44, %v74_v46 }
 0x13a   :  { %v87_v50 = vpack.c.bf16 %v85_v47, %v85_v47 }
 0x13b   :  { %v86_v51 = vpack.c.bf16 %v84_v49, %v83_v48 }
 0x13d   :  { %202 = vmatprep.mubr.msk.bf16.mxu0 %vm24_vm0, %v86_v51 }
 0x13e   :  { %203 = vmatmul.mubr.msk.bf16.vlgmr.msra.gmra.mxu0 %vm24_vm0, %v87_v50 }
 0x1fe   :  { %v204_v53 = vpop.f32.mrf.mxu0 }
 0x1ff   :  { %v150_v54 = vadd.f32 %v204_v53, %v188_v52 }
 0x200   :  { %v141_v55 = vpop.f32.mrf.mxu0 }
 0x201   :  { %v193_v56 = vmul.f32 -1.702, %v150_v54  ;;  %v142_v57 = vadd.f32 %v188_v52, %v141_v55 }
 0x202   :  { %v205_v58 = vpop.f32.mrf.mxu0 }
 0x203   :  { %v165_v59 = vmul.f32 1.442695, %v193_v56  ;;  %v191_v60 = vmul.f32 -1.702, %v142_v57 }
 0x204   :  { %v144_v61 = vpop.f32.mrf.mxu0 }
 0x205   :  { %212 = vpow2.f32 %v165_v59  ;;  %v161_v62 = vmul.f32 1.442695, %v191_v60  ;;  %v145_v63 = vadd.f32 %v188_v52, %v144_v61 }
 0x207   :  { %214 = vpow2.f32 %v161_v62  ;;  %v192_v0 = vmul.f32 -1.702, %v145_v63 }
 0x209   :  { %v163_v1 = vmul.f32 1.442695, %v192_v0 }
 0x20b   :  { %216 = vpow2.f32 %v163_v1 }
 0x212   :  { %v213_v2 = vpop.eup %212 }
 0x213   :  { %v169_v3 = vadd.f32 1.0, %v213_v2 }
 0x214   :  { %v215_v4 = vpop.eup %214 }
 0x215   :  { %218 = vrcp.f32 %v169_v3  ;;  %v167_v5 = vadd.f32 1.0, %v215_v4 }
 0x217   :  { %220 = vrcp.f32 %v167_v5 }
 0x218   :  { %v217_v6 = vpop.eup %216 }
 0x219   :  { %v168_v7 = vadd.f32 1.0, %v217_v6 }
 0x21b   :  { %222 = vrcp.f32 %v168_v7 }
 0x222   :  { %v219_v8 = vpop.eup %218 }
 0x223   :  { %v178_v9 = vmul.f32 %v219_v8, %v150_v54 }
 0x224   :  { %v221_v10 = vpop.eup %220 }
 0x225   :  { %181 = vst [vmem:[%s306_s5 + $0x10] sm:$0xf] %v178_v9  ;;  %v176_v11 = vmul.f32 %v221_v10, %v142_v57 }
 0x227   :  { %179 = vst [vmem:[%s306_s5] sm:$0xff] %v176_v11 }
 0x228   :  { %v223_v12 = vpop.eup %222 }
 0x229   :  { %v177_v13 = vmul.f32 %v223_v12, %v145_v63 }
 0x22b   :  { %180 = vst [vmem:[%s306_s5 + $0x8] sm:$0xff] %v177_v13 }

// kernel: compute_inbatch_contrastive_loss.51
= control target key start
LH: loop header
LB: loop body
LE: loop exit
PB: predicated region body
PF: predicated region fallthrough
CT: control target
= control target key end

     0   :  { %vm36_vm0 = vcmask 261120   ;;  %vm99_vm1 = vcmask 257024   ;;  %s191_s1 = inlined_call_operand.vmem [shape: f32[32,32], index: 1, kind: input, shape index: {}]   ;;  %s192_s0 = inlined_call_operand.vmem [shape: f32[20,32], index: 0, kind: input, shape index: {}]   ;;  %s193_s2 = inlined_call_operand.vmem [shape: f32[1,32], index: 2, kind: input, shape index: {}]   ;;  %s194_s3 = inlined_call_operand.vmem [shape: f32[20,32], index: 3, kind: input, shape index: {}]   ;;  %s195_s4 = inlined_call_operand.vmem [shape: f32[20,32], index: 4, kind: output, shape index: {}]  }
   0x1   :  { %v25_v0 = vld [vmem:[%s191_s1 + $0x10] sm:$0xff]  ;;  %v26_v1 = vld [vmem:[%s191_s1 + $0x18] sm:$0xff]  ;;  %v23_v2 = vld [vmem:[%s191_s1] sm:$0xff] }
   0x2   :  { %v28_v3 = vpack.c.bf16 %v26_v1, %v25_v0  ;;  %v24_v4 = vld [vmem:[%s191_s1 + $0x8] sm:$0xff]  ;;  %v18_v5 = vld [vmem:[%s192_s0] sm:$0xff]  ;;  %v20_v9 = vld [vmem:[%s192_s0 + $0x10] sm:$0xf] }
   0x3   :  { %v19_v6 = vld [vmem:[%s192_s0 + $0x8] sm:$0xff]  ;;  %v27_v7 = vpack.c.bf16 %v24_v4, %v23_v2  ;;  %v22_v10 = vpack.c.bf16 %v20_v9, %v20_v9  ;;  %v105_v11 = vld [vmem:[%s193_s2] ss:$0 sm:$0xff]  ;;  %v93_v13 = vld [vmem:[%s194_s3 + $0x10] sm:$0xf] }
   0x4   :  { %v21_v8 = vpack.c.bf16 %v19_v6, %v18_v5  ;;  %112 = vmatprep.subr.bf16.mxu0 %v28_v3  ;;  %v91_v16 = vld [vmem:[%s194_s3] sm:$0xff]  ;;  %v92_v22 = vld [vmem:[%s194_s3 + $0x8] sm:$0xff] }
   0x5   :  { %113 = vmatpush3.bf16.msra.mxu0 %v28_v3 }
   0x6   :  { %116 = vmatprep.mubr.msk.bf16.mxu0 %vm36_vm0, %v21_v8  ;;  %114 = vmatprep.subr.bf16.mxu0 %v27_v7 }
   0x9   :  { %115 = vmatpush3.bf16.msra.mxu0 %v27_v7 }
   0xc   :  { %117 = vmatmul.mubr.msk.bf16.vlgmr.msra.gmra.mxu0 %vm36_vm0, %v22_v10 }
  0xcc   :  { %v118_v12 = vpop.f32.mrf.mxu0 }
  0xcd   :  { %v86_v14 = vadd.f32 %v118_v12, %v105_v11 }
  0xce   :  { %v77_v15 = vpop.f32.mrf.mxu0 }
  0xcf   :  { %v96_v17 = vadd.f32 %v93_v13, %v86_v14  ;;  %v78_v18 = vadd.f32 %v105_v11, %v77_v15 }
  0xd0   :  { %v119_v19 = vpop.f32.mrf.mxu0 }
  0xd1   :  { %100 = vst.msk [vmem:[%s195_s4 + $0x10] sm:$0xf] %vm99_vm1, %v96_v17  ;;  %v94_v20 = vadd.f32 %v91_v16, %v78_v18 }
  0xd2   :  { %v80_v21 = vpop.f32.mrf.mxu0 }
  0xd3   :  { %97 = vst.msk [vmem:[%s195_s4] sm:$0xff] %vm36_vm0, %v94_v20  ;;  %v81_v23 = vadd.f32 %v105_v11, %v80_v21 }
  0xd5   :  { %v95_v24 = vadd.f32 %v92_v22, %v81_v23 }
  0xd7   :  { %98 = vst.msk [vmem:[%s195_s4 + $0x8] sm:$0xff] %vm36_vm0, %v95_v24 }

// kernel: compute_inbatch_contrastive_loss.53
= control target key start
LH: loop header
LB: loop body
LE: loop exit
PB: predicated region body
PF: predicated region fallthrough
CT: control target
= control target key end

     0   :  { %vm111_vm0 = vcmask 257024   ;;  %vm108_vm1 = vcmask 261120   ;;  %s251_s1 = inlined_call_operand.vmem [shape: f32[128,32], index: 1, kind: input, shape index: {}]   ;;  %s252_s0 = inlined_call_operand.vmem [shape: f32[20,128], index: 0, kind: input, shape index: {}]   ;;  %s253_s2 = inlined_call_operand.vmem [shape: f32[1,32], index: 2, kind: input, shape index: {}]   ;;  %s254_s3 = inlined_call_operand.vmem [shape: f32[20,32], index: 3, kind: input, shape index: {}]   ;;  %s255_s4 = inlined_call_operand.vmem [shape: f32[20,32], index: 4, kind: output, shape index: {}]  }
   0x1   :  { %v37_v0 = vld [vmem:[%s251_s1 + $0x70] sm:$0xff]  ;;  %v38_v1 = vld [vmem:[%s251_s1 + $0x78] sm:$0xff]  ;;  %v35_v2 = vld [vmem:[%s251_s1 + $0x60] sm:$0xff] }
   0x2   :  { %v46_v3 = vpack.c.bf16 %v38_v1, %v37_v0  ;;  %v36_v4 = vld [vmem:[%s251_s1 + $0x68] sm:$0xff]  ;;  %v33_v6 = vld [vmem:[%s251_s1 + $0x50] sm:$0xff]  ;;  %v34_v7 = vld [vmem:[%s251_s1 + $0x58] sm:$0xff] }
   0x3   :  { %v45_v5 = vpack.c.bf16 %v36_v4, %v35_v2  ;;  %v44_v8 = vpack.c.bf16 %v34_v7, %v33_v6  ;;  %v18_v9 = vld [vmem:[%s252_s0] sm:$0xff]  ;;  %v19_v10 = vld [vmem:[%s252_s0 + $0x8] sm:$0xff]  ;;  %v29_v15 = vld [vmem:[%s251_s1 + $0x30] sm:$0xff] }
   0x4   :  { %128 = vmatprep.subr.bf16.mxu0 %v46_v3  ;;  %v31_v11 = vld [vmem:[%s251_s1 + $0x40] sm:$0xff]  ;;  %v32_v12 = vld [vmem:[%s251_s1 + $0x48] sm:$0xff]  ;;  %v21_v13 = vpack.c.bf16 %v19_v10, %v18_v9  ;;  %v30_v16 = vld [vmem:[%s251_s1 + $0x38] sm:$0xff] }
   0x5   :  { %129 = vmatpush3.bf16.msra.mxu0 %v46_v3  ;;  %v43_v14 = vpack.c.bf16 %v32_v12, %v31_v11  ;;  %v42_v17 = vpack.c.bf16 %v30_v16, %v29_v15  ;;  %v27_v18 = vld [vmem:[%s251_s1 + $0x20] sm:$0xff]  ;;  %v28_v19 = vld [vmem:[%s251_s1 + $0x28] sm:$0xff]  ;;  %v25_v21 = vld [vmem:[%s251_s1 + $0x10] sm:$0xff] }
   0x6   :  { %130 = vmatprep.subr.bf16.mxu0 %v45_v5  ;;  %144 = vmatprep.mubr.bf16.mxu0 %v21_v13  ;;  %v41_v20 = vpack.c.bf16 %v28_v19, %v27_v18  ;;  %v26_v22 = vld [vmem:[%s251_s1 + $0x18] sm:$0xff]  ;;  %v23_v24 = vld [vmem:[%s251_s1] sm:$0xff]  ;;  %v24_v25 = vld [vmem:[%s251_s1 + $0x8] sm:$0xff] }
   0x7   :  { %v40_v23 = vpack.c.bf16 %v26_v22, %v25_v21  ;;  %v39_v26 = vpack.c.bf16 %v24_v25, %v23_v24  ;;  %v20_v27 = vld [vmem:[%s252_s0 + $0x10] sm:$0xf]  ;;  %v117_v29 = vld [vmem:[%s253_s2] ss:$0 sm:$0xff]  ;;  %v103_v40 = vld [vmem:[%s254_s3 + $0x8] sm:$0xff] }
   0x8   :  { %v22_v28 = vpack.c.bf16 %v20_v27, %v20_v27  ;;  %v104_v31 = vld [vmem:[%s254_s3 + $0x10] sm:$0xf]  ;;  %v102_v34 = vld [vmem:[%s254_s3] sm:$0xff] }
   0x9   :  { %131 = vmatpush3.bf16.msra.mxu0 %v45_v5 }
   0xa   :  { %132 = vmatprep.subr.bf16.mxu0 %v44_v8 }
   0xd   :  { %133 = vmatpush3.bf16.msra.mxu0 %v44_v8 }
   0xe   :  { %134 = vmatprep.subr.bf16.mxu0 %v43_v14 }
  0x11   :  { %135 = vmatpush3.bf16.msra.mxu0 %v43_v14 }
  0x12   :  { %136 = vmatprep.subr.bf16.mxu0 %v42_v17 }
  0x15   :  { %137 = vmatpush3.bf16.msra.mxu0 %v42_v17 }
  0x16   :  { %138 = vmatprep.subr.bf16.mxu0 %v41_v20 }
  0x19   :  { %139 = vmatpush3.bf16.msra.mxu0 %v41_v20 }
  0x1a   :  { %140 = vmatprep.subr.bf16.mxu0 %v40_v23 }
  0x1d   :  { %141 = vmatpush3.bf16.msra.mxu0 %v40_v23 }
  0x1e   :  { %142 = vmatprep.subr.bf16.mxu0 %v39_v26 }
  0x21   :  { %143 = vmatpush3.bf16.msra.mxu0 %v39_v26 }
  0x24   :  { %145 = vmatmul.mubr.bf16.vlgmr.msra.gmra.mxu0 %v22_v28 }
  0xe4   :  { %v146_v30 = vpop.f32.mrf.mxu0 }
  0xe5   :  { %v97_v32 = vadd.f32 %v146_v30, %v117_v29 }
  0xe6   :  { %v88_v33 = vpop.f32.mrf.mxu0 }
  0xe7   :  { %v107_v35 = vadd.f32 %v104_v31, %v97_v32  ;;  %v89_v36 = vadd.f32 %v117_v29, %v88_v33 }
  0xe8   :  { %v147_v37 = vpop.f32.mrf.mxu0 }
  0xe9   :  { %112 = vst.msk [vmem:[%s255_s4 + $0x10] sm:$0xf] %vm111_vm0, %v107_v35  ;;  %v105_v38 = vadd.f32 %v102_v34, %v89_v36 }
  0xea   :  { %v91_v39 = vpop.f32.mrf.mxu0 }
  0xeb   :  { %109 = vst.msk [vmem:[%s255_s4] sm:$0xff] %vm108_vm1, %v105_v38  ;;  %v92_v41 = vadd.f32 %v117_v29, %v91_v39 }
  0xed   :  { %v106_v42 = vadd.f32 %v103_v40, %v92_v41 }
  0xef   :  { %110 = vst.msk [vmem:[%s255_s4 + $0x8] sm:$0xff] %vm108_vm1, %v106_v42 }

// kernel: compute_inbatch_contrastive_loss.59
= control target key start
LH: loop header
LB: loop body
LE: loop exit
PB: predicated region body
PF: predicated region fallthrough
CT: control target
= control target key end

     0   :  { %vm21_vm0 = vcmask 261120   ;;  %vm28_vm1 = vcmask 257024   ;;  %vm148_vm2 = vcmask 125952   ;;  %vm145_vm3 = vcmask 130048   ;;  %s245_s0 = inlined_call_operand.vmem [shape: f32[20,32], index: 0, kind: input, shape index: {}]   ;;  %s246_s1 = inlined_call_operand.vmem [shape: f32[32,16], index: 1, kind: input, shape index: {}]   ;;  %s247_s2 = inlined_call_operand.vmem [shape: f32[1,32], index: 2, kind: input, shape index: {}]   ;;  %s248_s3 = inlined_call_operand.vmem [shape: f32[1,32], index: 3, kind: input, shape index: {}]   ;;  %s249_s4 = inlined_call_operand.vmem [shape: f32[20,16], index: 4, kind: output, shape index: {}]  }
   0x1   :  { %v18_v0 = vld [vmem:[%s245_s0] sm:$0xff]  ;;  %v20_v1 = vld [vmem:[%s245_s0 + $0x10] sm:$0xf]  ;;  %v19_v2 = vld [vmem:[%s245_s0 + $0x8] sm:$0xff] }
   0x2   :  { %v22_v3 = vsel %vm21_vm0, %v18_v0, 0.0  ;;  %v29_v4 = vsel %vm28_vm1, %v20_v1, 0.0  ;;  %v25_v5 = vsel %vm21_vm0, %v19_v2, 0.0  ;;  %v87_v21 = vld [vmem:[%s246_s1 + $0x10] sm:$0xff]  ;;  %v88_v22 = vld [vmem:[%s246_s1 + $0x18] sm:$0xff]  ;;  %v85_v23 = vld [vmem:[%s246_s1] sm:$0xff] }
   0x3   :  { %23 = vadd.xlane.f32.xlu0 %v22_v3  ;;  %30 = vadd.xlane.f32.xlu1 %v29_v4  ;;  %v90_v24 = vpack.c.bf16 %v88_v22, %v87_v21  ;;  %v86_v25 = vld [vmem:[%s246_s1 + $0x8] sm:$0xff]  ;;  %v154_v38 = vld [vmem:[%s247_s2] ss:$0 sm:$0xff] }
   0x4   :  { %v89_v26 = vpack.c.bf16 %v86_v25, %v85_v23  ;;  %v155_v44 = vld [vmem:[%s248_s3] ss:$0 sm:$0xff] }
   0x5   :  { %162 = vmatprep.subr.bf16.mxu0 %v90_v24 }
   0x6   :  { %163 = vmatpush3.bf16.msra.mxu0 %v90_v24 }
   0x7   :  { %26 = vadd.xlane.f32.xlu0 %v25_v5  ;;  %164 = vmatprep.subr.bf16.mxu0 %v89_v26 }
   0xa   :  { %165 = vmatpush3.bf16.msra.mxu0 %v89_v26 }
  0x8c   :  { %v24_v6 = vpop.xlane.xlu0 %23  ;;  %v31_v7 = vpop.xlane.xlu1 %30 }
  0x8d   :  { %v33_v8 = vmul.f32 0.03125, %v24_v6  ;;  %v35_v9 = vmul.f32 0.03125, %v31_v7 }
  0x8f   :  { %v36_v10 = vsub.f32 %v18_v0, %v33_v8  ;;  %v38_v11 = vsub.f32 %v20_v1, %v35_v9 }
  0x90   :  { %v27_v12 = vpop.xlane.xlu0 %26 }
  0x91   :  { %v34_v13 = vmul.f32 0.03125, %v27_v12  ;;  %v39_v14 = vmul.f32 %v36_v10, %v36_v10  ;;  %v41_v15 = vmul.f32 %v38_v11, %v38_v11 }
  0x93   :  { %v37_v16 = vsub.f32 %v19_v2, %v34_v13  ;;  %v42_v17 = vsel %vm21_vm0, %v39_v14, 0.0  ;;  %v48_v18 = vsel %vm28_vm1, %v41_v15, 0.0 }
  0x94   :  { %43 = vadd.xlane.f32.xlu1 %v42_v17 }
  0x95   :  { %v40_v19 = vmul.f32 %v37_v16, %v37_v16 }
  0x97   :  { %v45_v20 = vsel %vm21_vm0, %v40_v19, 0.0 }
  0x98   :  { %49 = vadd.xlane.f32.xlu1 %v48_v18  ;;  %46 = vadd.xlane.f32.xlu0 %v45_v20 }
 0x11d   :  { %v44_v27 = vpop.xlane.xlu1 %43 }
 0x11e   :  { %v51_v28 = vmul.f32 0.03125, %v44_v27 }
 0x120   :  { %v54_v29 = vadd.f32 1e-05, %v51_v28 }
 0x121   :  { %v50_v30 = vpop.xlane.xlu1 %49  ;;  %v47_v31 = vpop.xlane.xlu0 %46 }
 0x122   :  { %170 = vrsqrt.f32 %v54_v29  ;;  %v53_v32 = vmul.f32 0.03125, %v50_v30  ;;  %v52_v33 = vmul.f32 0.03125, %v47_v31 }
 0x124   :  { %v56_v34 = vadd.f32 1e-05, %v53_v32  ;;  %v55_v35 = vadd.f32 1e-05, %v52_v33 }
 0x126   :  { %172 = vrsqrt.f32 %v56_v34 }
 0x127   :  { %174 = vrsqrt.f32 %v55_v35 }
 0x12f   :  { %v171_v36 = vpop.eup %170 }
 0x130   :  { %v60_v37 = vmul.f32 %v171_v36, %v36_v10 }
 0x132   :  { %v70_v43 = vmul.f32 %v154_v38, %v60_v37 }
 0x133   :  { %v173_v39 = vpop.eup %172 }
 0x134   :  { %v175_v40 = vpop.eup %174  ;;  %v62_v41 = vmul.f32 %v173_v39, %v38_v11  ;;  %v80_v48 = vadd.f32 %v155_v44, %v70_v43 }
 0x135   :  { %v61_v42 = vmul.f32 %v175_v40, %v37_v16 }
 0x136   :  { %v72_v45 = vmul.f32 %v154_v38, %v62_v41 }
 0x137   :  { %v71_v46 = vmul.f32 %v154_v38, %v61_v42 }
 0x138   :  { %v82_v47 = vadd.f32 %v155_v44, %v72_v45 }
 0x139   :  { %v81_v49 = vadd.f32 %v155_v44, %v71_v46 }
 0x13a   :  { %v84_v50 = vpack.c.bf16 %v82_v47, %v82_v47 }
 0x13b   :  { %v83_v51 = vpack.c.bf16 %v81_v49, %v80_v48 }
 0x13d   :  { %166 = vmatprep.mubr.msk.bf16.mxu0 %vm21_vm0, %v83_v51 }
 0x13e   :  { %167 = vmatmul.mubr.msk.bf16.vlgmr.msra.gmra.mxu0 %vm21_vm0, %v84_v50 }
 0x1fe   :  { %v168_v52 = vpop.f32.mrf.mxu0 }
 0x1ff   :  { %149 = vst.msk [vmem:[%s249_s4 + $0x10] sm:$0xf] %vm148_vm2, %v168_v52 }
 0x200   :  { %v131_v53 = vpop.f32.mrf.mxu0 }
 0x201   :  { %146 = vst.msk [vmem:[%s249_s4] sm:$0xff] %vm145_vm3, %v131_v53 }
 0x202   :  { %v169_v54 = vpop.f32.mrf.mxu0 }
 0x204   :  { %v134_v55 = vpop.f32.mrf.mxu0 }
 0x205   :  { %147 = vst.msk [vmem:[%s249_s4 + $0x8] sm:$0xff] %vm145_vm3, %v134_v55 }

// kernel: compute_inbatch_contrastive_loss.36
= control target key start
LH: loop header
LB: loop body
LE: loop exit
PB: predicated region body
PF: predicated region fallthrough
CT: control target
= control target key end

     0   :  { %vm25_vm0 = vcmask 130048   ;;  %vm168_vm1 = vcmask 392192   ;;  %s278_s0 = inlined_call_operand.vmem [shape: f32[32,16], index: 0, kind: input, shape index: {}]   ;;  %s279_s1 = inlined_call_operand.vmem [shape: f32[16,48], index: 1, kind: input, shape index: {}]   ;;  %s280_s2 = inlined_call_operand.vmem [shape: f32[1,16], index: 2, kind: input, shape index: {}]   ;;  %s281_s3 = inlined_call_operand.vmem [shape: f32[1,16], index: 3, kind: input, shape index: {}]   ;;  %s282_s4 = inlined_call_operand.vmem [shape: f32[1,48], index: 4, kind: input, shape index: {}]   ;;  %s283_s5 = inlined_call_operand.vmem [shape: f32[32,48], index: 5, kind: output, shape index: {}]  }
   0x1   :  { %v21_v0 = vld [vmem:[%s278_s0] sm:$0xff]  ;;  %v23_v1 = vld [vmem:[%s278_s0 + $0x10] sm:$0xff]  ;;  %v22_v2 = vld [vmem:[%s278_s0 + $0x8] sm:$0xff] }
   0x2   :  { %v26_v3 = vsel %vm25_vm0, %v21_v0, 0.0  ;;  %v32_v4 = vsel %vm25_vm0, %v23_v1, 0.0  ;;  %v24_v5 = vld [vmem:[%s278_s0 + $0x18] sm:$0xff]  ;;  %v29_v6 = vsel %vm25_vm0, %v22_v2, 0.0  ;;  %v103_v28 = vld [vmem:[%s279_s1] sm:$0xff]  ;;  %v104_v29 = vld [vmem:[%s279_s1 + $0x8] sm:$0xff] }
   0x3   :  { %27 = vadd.xlane.f32.xlu0 %v26_v3  ;;  %33 = vadd.xlane.f32.xlu1 %v32_v4  ;;  %v35_v7 = vsel %vm25_vm0, %v24_v5, 0.0  ;;  %v105_v30 = vpack.c.bf16 %v104_v29, %v103_v28  ;;  %v177_v45 = vld [vmem:[%s280_s2] ss:$0 sm:$0xff] }
   0x4   :  { %v178_v50 = vld [vmem:[%s281_s3] ss:$0 sm:$0xff] }
   0x5   :  { %185 = vmatprep.subr.bf16.mxu0 %v105_v30  ;;  %v179_v63 = vld [vmem:[%s282_s4] ss:$0 sm:$0xff] }
   0x6   :  { %186 = vmatpush3.bf16.msra.mxu0 %v105_v30 }
   0x7   :  { %30 = vadd.xlane.f32.xlu0 %v29_v6  ;;  %36 = vadd.xlane.f32.xlu1 %v35_v7 }
  0x8c   :  { %v28_v8 = vpop.xlane.xlu0 %27  ;;  %v34_v9 = vpop.xlane.xlu1 %33 }
  0x8d   :  { %v39_v10 = vmul.f32 0.0625, %v28_v8  ;;  %v41_v11 = vmul.f32 0.0625, %v34_v9 }
  0x8f   :  { %v43_v12 = vsub.f32 %v21_v0, %v39_v10  ;;  %v45_v13 = vsub.f32 %v23_v1, %v41_v11 }
  0x90   :  { %v31_v14 = vpop.xlane.xlu0 %30  ;;  %v37_v15 = vpop.xlane.xlu1 %36 }
  0x91   :  { %v40_v16 = vmul.f32 0.0625, %v31_v14  ;;  %v42_v17 = vmul.f32 0.0625, %v37_v15  ;;  %v47_v18 = vmul.f32 %v43_v12, %v43_v12  ;;  %v49_v19 = vmul.f32 %v45_v13, %v45_v13 }
  0x93   :  { %v44_v20 = vsub.f32 %v22_v2, %v40_v16  ;;  %v46_v21 = vsub.f32 %v24_v5, %v42_v17  ;;  %v51_v22 = vsel %vm25_vm0, %v47_v18, 0.0  ;;  %v57_v23 = vsel %vm25_vm0, %v49_v19, 0.0 }
  0x94   :  { %52 = vadd.xlane.f32.xlu0 %v51_v22 }
  0x95   :  { %v48_v24 = vmul.f32 %v44_v20, %v44_v20  ;;  %v50_v25 = vmul.f32 %v46_v21, %v46_v21 }
  0x97   :  { %v54_v26 = vsel %vm25_vm0, %v48_v24, 0.0  ;;  %v60_v27 = vsel %vm25_vm0, %v50_v25, 0.0 }
  0x98   :  { %58 = vadd.xlane.f32.xlu0 %v57_v23  ;;  %55 = vadd.xlane.f32.xlu1 %v54_v26 }
  0x9c   :  { %61 = vadd.xlane.f32.xlu1 %v60_v27 }
 0x11d   :  { %v53_v31 = vpop.xlane.xlu0 %52 }
 0x11e   :  { %v63_v32 = vmul.f32 0.0625, %v53_v31 }
 0x120   :  { %v67_v33 = vadd.f32 1e-05, %v63_v32 }
 0x121   :  { %v56_v34 = vpop.xlane.xlu1 %55  ;;  %v59_v35 = vpop.xlane.xlu0 %58 }
 0x122   :  { %191 = vrsqrt.f32 %v67_v33  ;;  %v64_v36 = vmul.f32 0.0625, %v56_v34  ;;  %v65_v37 = vmul.f32 0.0625, %v59_v35 }
 0x124   :  { %v68_v38 = vadd.f32 1e-05, %v64_v36  ;;  %v69_v39 = vadd.f32 1e-05, %v65_v37 }
 0x125   :  { %v62_v40 = vpop.xlane.xlu1 %61 }
 0x126   :  { %193 = vrsqrt.f32 %v68_v38  ;;  %v66_v41 = vmul.f32 0.0625, %v62_v40 }
 0x127   :  { %195 = vrsqrt.f32 %v69_v39 }
 0x128   :  { %v70_v42 = vadd.f32 1e-05, %v66_v41 }
 0x12a   :  { %197 = vrsqrt.f32 %v70_v42 }
 0x12f   :  { %v192_v43 = vpop.eup %191 }
 0x130   :  { %v75_v44 = vmul.f32 %v192_v43, %v43_v12 }
 0x132   :  { %v86_v49 = vmul.f32 %v177_v45, %v75_v44 }
 0x133   :  { %v194_v46 = vpop.eup %193 }
 0x134   :  { %v196_v47 = vpop.eup %195  ;;  %v76_v48 = vmul.f32 %v194_v46, %v44_v20  ;;  %v97_v54 = vadd.f32 %v178_v50, %v86_v49 }
 0x135   :  { %v77_v51 = vmul.f32 %v196_v47, %v45_v13 }
 0x136   :  { %v87_v52 = vmul.f32 %v177_v45, %v76_v48 }
 0x137   :  { %v198_v53 = vpop.eup %197  ;;  %v88_v57 = vmul.f32 %v177_v45, %v77_v51 }
 0x138   :  { %v98_v55 = vadd.f32 %v178_v50, %v87_v52  ;;  %v78_v56 = vmul.f32 %v198_v53, %v46_v21 }
 0x139   :  { %v99_v60 = vadd.f32 %v178_v50, %v88_v57 }
 0x13a   :  { %v101_v58 = vpack.c.bf16 %v98_v55, %v97_v54  ;;  %v89_v59 = vmul.f32 %v177_v45, %v78_v56 }
 0x13c   :  { %187 = vmatprep.mubr.msk.bf16.mxu0 %vm25_vm0, %v101_v58  ;;  %v100_v61 = vadd.f32 %v178_v50, %v89_v59 }
 0x13e   :  { %v102_v62 = vpack.c.bf16 %v100_v61, %v99_v60 }
 0x140   :  { %188 = vmatmul.mubr.msk.bf16.vlgmr.msra.gmra.mxu0 %vm25_vm0, %v102_v62 }
 0x200   :  { %v189_v0 = vpop.f32.mrf.mxu0 }
 0x201   :  { %v162_v1 = vadd.f32 %v189_v0, %v179_v63 }
 0x202   :  { %v153_v2 = vpop.f32.mrf.mxu0 }
 0x203   :  { %171 = vst.msk [vmem:[%s283_s5 + $0x10] sm:$0xff] %vm168_vm1, %v162_v1  ;;  %v154_v3 = vadd.f32 %v179_v63, %v153_v2 }
 0x204   :  { %v190_v4 = vpop.f32.mrf.mxu0 }
 0x205   :  { %169 = vst.msk [vmem:[%s283_s5] sm:$0xff] %vm168_vm1, %v154_v3  ;;  %v165_v5 = vadd.f32 %v190_v4, %v179_v63 }
 0x206   :  { %v156_v6 = vpop.f32.mrf.mxu0 }
 0x207   :  { %172 = vst.msk [vmem:[%s283_s5 + $0x18] sm:$0xff] %vm168_vm1, %v165_v5  ;;  %v157_v7 = vadd.f32 %v179_v63, %v156_v6 }
 0x209   :  { %170 = vst.msk [vmem:[%s283_s5 + $0x8] sm:$0xff] %vm168_vm1, %v157_v7 }

// kernel: compute_inbatch_contrastive_loss.38
= control target key start
LH: loop header
LB: loop body
LE: loop exit
PB: predicated region body
PF: predicated region fallthrough
CT: control target
= control target key end

     0   :  { %vm34_vm0 = vcmask 130048   ;;  %s194_s1 = inlined_call_operand.vmem [shape: f32[16,16], index: 1, kind: input, shape index: {}]   ;;  %s195_s0 = inlined_call_operand.vmem [shape: f32[32,16], index: 0, kind: input, shape index: {}]   ;;  %s196_s2 = inlined_call_operand.vmem [shape: f32[1,16], index: 2, kind: input, shape index: {}]   ;;  %s197_s3 = inlined_call_operand.vmem [shape: f32[32,16], index: 3, kind: input, shape index: {}]   ;;  %s198_s4 = inlined_call_operand.vmem [shape: f32[32,16], index: 4, kind: output, shape index: {}]  }
   0x1   :  { %v24_v0 = vld [vmem:[%s194_s1] sm:$0xff]  ;;  %v25_v1 = vld [vmem:[%s194_s1 + $0x8] sm:$0xff]  ;;  %v20_v5 = vld [vmem:[%s195_s0 + $0x10] sm:$0xff] }
   0x2   :  { %v18_v2 = vld [vmem:[%s195_s0] sm:$0xff]  ;;  %v26_v3 = vpack.c.bf16 %v25_v1, %v24_v0  ;;  %v19_v4 = vld [vmem:[%s195_s0 + $0x8] sm:$0xff]  ;;  %v21_v6 = vld [vmem:[%s195_s0 + $0x18] sm:$0xff] }
   0x3   :  { %v22_v7 = vpack.c.bf16 %v19_v4, %v18_v2  ;;  %v23_v8 = vpack.c.bf16 %v21_v6, %v20_v5  ;;  %v106_v9 = vld [vmem:[%s196_s2] ss:$0 sm:$0xff]  ;;  %v92_v11 = vld [vmem:[%s197_s3 + $0x10] sm:$0xff]  ;;  %v93_v18 = vld [vmem:[%s197_s3 + $0x18] sm:$0xff] }
   0x4   :  { %112 = vmatprep.subr.bf16.mxu0 %v26_v3  ;;  %v90_v14 = vld [vmem:[%s197_s3] sm:$0xff]  ;;  %v91_v22 = vld [vmem:[%s197_s3 + $0x8] sm:$0xff] }
   0x5   :  { %113 = vmatpush3.bf16.msra.mxu0 %v26_v3  ;;  %114 = vmatprep.mubr.msk.bf16.mxu0 %vm34_vm0, %v22_v7 }
   0x8   :  { %115 = vmatmul.mubr.msk.bf16.vlgmr.msra.gmra.mxu0 %vm34_vm0, %v23_v8 }
  0xc8   :  { %v116_v10 = vpop.f32.mrf.mxu0 }
  0xc9   :  { %v84_v12 = vadd.f32 %v116_v10, %v106_v9 }
  0xca   :  { %v75_v13 = vpop.f32.mrf.mxu0 }
  0xcb   :  { %v96_v15 = vadd.f32 %v92_v11, %v84_v12  ;;  %v76_v16 = vadd.f32 %v106_v9, %v75_v13 }
  0xcc   :  { %v117_v17 = vpop.f32.mrf.mxu0 }
  0xcd   :  { %100 = vst.msk [vmem:[%s198_s4 + $0x10] sm:$0xff] %vm34_vm0, %v96_v15  ;;  %v94_v19 = vadd.f32 %v90_v14, %v76_v16  ;;  %v87_v20 = vadd.f32 %v117_v17, %v106_v9 }
  0xce   :  { %v78_v21 = vpop.f32.mrf.mxu0 }
  0xcf   :  { %98 = vst.msk [vmem:[%s198_s4] sm:$0xff] %vm34_vm0, %v94_v19  ;;  %v97_v23 = vadd.f32 %v93_v18, %v87_v20  ;;  %v79_v24 = vadd.f32 %v106_v9, %v78_v21 }
  0xd1   :  { %101 = vst.msk [vmem:[%s198_s4 + $0x18] sm:$0xff] %vm34_vm0, %v97_v23  ;;  %v95_v25 = vadd.f32 %v91_v22, %v79_v24 }
  0xd3   :  { %99 = vst.msk [vmem:[%s198_s4 + $0x8] sm:$0xff] %vm34_vm0, %v95_v25 }

// kernel: compute_inbatch_contrastive_loss.37
= control target key start
LH: loop header
LB: loop body
LE: loop exit
PB: predicated region body
PF: predicated region fallthrough
CT: control target
= control target key end

     0   :  { %s528_s9 = smov 0   ;;  %s580_s0 = inlined_call_operand.vmem [shape: f32[4,8,48], index: 0, kind: input, shape index: {}]   ;;  %s581_s1 = inlined_call_operand.vmem [shape: f32[1,8,8], index: 1, kind: input, shape index: {}]   ;;  %s582_s2 = inlined_call_operand.vmem [shape: f32[4,8,16], index: 2, kind: output, shape index: {}]  }
   0x1 LB: > { %s428_s10 = sadd.s32 4294967295, %s503_s9   ;;  %p432_p0 = scmp.ge.s32.totalorder %s503_s9, 1  ;;  %s503_s9 = sphi %s528_s9, %s12_s9  }
   0x2   : > { %p111_p1 = scmp.lt.s32.totalorder %s503_s9, 5 }
   0x4   : > { %p112_p2 = pnand %p432_p0, %p111_p1 }
   0x5   : > { %p131_p3 = scmp.lt.s32.totalorder (!%p112_p2), %s428_s10, 3  ;;  %s507_s15 = smov (!%p112_p2), 112  }
   0x6   : > { %115 = sbr.rel (%p112_p2) target bundleno = 1480 (0x5c8), region = 28  ;;  %s508_s16 = smov (!%p112_p2), 96  }
   0x7   : > { %s509_s19 = smov (!%p112_p2), 104   ;;  %s510_s20 = smov (!%p112_p2), 120  }
   0x8   : > { %s511_s21 = smov (!%p112_p2), 88   ;;  %s512_s22 = smov (!%p112_p2), 8  }
   0xb   : > { %v505_v0 = vmov 0.0   ;;  %vm506_vm0 = vmmov 0   ;;  %s584_s10 = smov (!%p131_p3, %s428_s10), 3  ;;  %vm145_vm1 = vcmask 64512   ;;  %v193_v6 = vld [vmem:[%s581_s1] sm:$0xff]  ;;  %vm212_vm2 = vcmask 1043456  }
   0xc   : > { %449 = vmatprep.subr.bf16.mxu0 %v505_v0  ;;  %451 = vmatprep.mubr.msk.bf16.mxu0 %vm506_vm0, %v505_v0  ;;  %s433_s11 = sshll.u32 %s584_s10, 3  ;;  %vm373_vm3 = vcmask 130048  }
   0xd   : > { %455 = vmatprep.subr.bf16.mxu1 %v505_v0  ;;  %457 = vmatprep.mubr.msk.bf16.mxu1 %vm506_vm0, %v505_v0  ;;  %s134_s14 = scalar_lea.vmem %s580_s0, %s433_s11  ;;  %s138_s25 = scalar_lea.vmem %s582_s2, %s433_s11 }
   0xe   : > { %v140_v1 = vld [vmem:[%s134_s14] sm:$0xff] }
   0xf   : > { %v546_v2 = vpack.c.bf16 %v140_v1, %v140_v1 }
  0x11   : > { %143 = vrot.lane.b32.xlu0 %v546_v2, %s507_s15  ;;  %207 = vrot.lane.b32.xlu1 %v546_v2, %s508_s16 }
  0x83   : > { %v144_v3 = vpop.permute.xlu0 %143  ;;  %v208_v13 = vpop.permute.xlu1 %207 }
  0x84   : > { %v150_v4 = vsel %vm145_vm1, %v144_v3, 0  ;;  %v214_v14 = vsel %vm212_vm2, %v208_v13, 0 }
  0x85   : > { %450 = vmatpush3.bf16.xpose.msra.mxu0 %v150_v4  ;;  %456 = vmatpush3.bf16.msra.mxu1 %v214_v14 }
  0x86   : > { %467 = vmatprep.subr.bf16.mxu0 %v505_v0  ;;  %461 = vmatprep.subr.bf16.mxu1 %v505_v0 }
  0x8c   : > { %452 = vmatmul.mubr.msk.bf16.vlgmr.msra.gmra.mxu0 %vm145_vm1, %v546_v2 }
  0x8d   : > { %469 = vmatprep.mubr.msk.bf16.mxu0 %vm506_vm0, %v505_v0 }
 0x14c   : > { %v186_v5 = vpop.f32.mrf.mxu0 }
 0x14d   : > { %v192_v7 = vmul.f32 0.35355338, %v186_v5 }
 0x14e   : > { %v453_v8 = vpop.f32.mrf.mxu0 }
 0x14f   : > { %v194_v9 = vadd.f32 %v193_v6, %v192_v7 }
 0x150   : > { %v189_v10 = vpop.f32.mrf.mxu0 }
 0x151   : > { %v195_v11 = vsel %vm145_vm1, %v194_v9, -inf }
 0x152   : > { %196 = vmax.xlane.f32.xlu0 %v195_v11  ;;  %v454_v12 = vpop.f32.mrf.mxu0 }
 0x1db   : > { %v197_v15 = vpop.xlane.xlu0 %196 }
 0x1dc   : > { %v198_v16 = vsub.f32 %v194_v9, %v197_v15 }
 0x1de   : > { %v199_v17 = vmul.f32 1.442695, %v198_v16 }
 0x1e0   : > { %489 = vpow2.f32 %v199_v17 }
 0x1ed   : > { %v490_v18 = vpop.eup %489 }
 0x1ee   : > { %v201_v19 = vsel %vm145_vm1, %v490_v18, 0.0 }
 0x1ef   : > { %202 = vadd.xlane.f32.xlu1 %v201_v19 }
 0x200   : > { %258 = vrot.lane.b32.xlu1 %v546_v2, %s509_s19 }
 0x204   : > { %256 = vrot.lane.b32.xlu1 %v546_v2, %s510_s20 }
 0x278   : > { %v203_v20 = vpop.xlane.xlu1 %202 }
 0x279   : > { %491 = vrcp.f32 %v203_v20 }
 0x27c   : > { %v259_v22 = vpop.permute.xlu1 %258 }
 0x27d   : > { %v264_v24 = vsel %vm145_vm1, %v259_v22, 0 }
 0x280   : > { %v257_v26 = vpop.permute.xlu1 %256 }
 0x286   : > { %v492_v21 = vpop.eup %491 }
 0x287   : > { %v205_v23 = vmul.f32 %v492_v21, %v490_v18 }
 0x289   : > { %v206_v25 = vpack.c.bf16 %v205_v23, %v205_v23 }
 0x28b   : > { %458 = vmatmul.mubr.msk.bf16.vlgmr.msra.gmra.mxu1 %vm145_vm1, %v206_v25 }
 0x28c   : > { %462 = vmatpush3.bf16.xpose.msra.mxu1 %v264_v24  ;;  %463 = vmatprep.mubr.msk.bf16.mxu1 %vm506_vm0, %v505_v0 }
 0x293   : > { %464 = vmatmul.mubr.msk.bf16.vlgmr.msra.gmra.mxu1 %vm145_vm1, %v257_v26 }
 0x34b   : > { %v250_v27 = vpop.f32.mrf.mxu1 }
 0x34d   : > { %v459_v28 = vpop.f32.mrf.mxu1 }
 0x34f   : > { %v253_v29 = vpop.f32.mrf.mxu1 }
 0x351   : > { %v460_v30 = vpop.f32.mrf.mxu1 }
 0x353   : > { %v300_v31 = vpop.f32.mrf.mxu1 }
 0x354   : > { %v306_v32 = vmul.f32 0.35355338, %v300_v31 }
 0x355   : > { %v465_v33 = vpop.f32.mrf.mxu1 }
 0x356   : > { %v307_v34 = vadd.f32 %v306_v32, %v193_v6 }
 0x357   : > { %v303_v35 = vpop.f32.mrf.mxu1 }
 0x358   : > { %v308_v36 = vsel %vm145_vm1, %v307_v34, -inf }
 0x359   : > { %309 = vmax.xlane.f32.xlu1 %v308_v36  ;;  %v466_v37 = vpop.f32.mrf.mxu1 }
 0x3e2   : > { %v310_v38 = vpop.xlane.xlu1 %309 }
 0x3e3   : > { %v311_v39 = vsub.f32 %v307_v34, %v310_v38 }
 0x3e5   : > { %v312_v40 = vmul.f32 1.442695, %v311_v39 }
 0x3e7   : > { %493 = vpow2.f32 %v312_v40 }
 0x3f4   : > { %v494_v41 = vpop.eup %493 }
 0x3f5   : > { %v314_v42 = vsel %vm145_vm1, %v494_v41, 0.0 }
 0x3f6   : > { %315 = vadd.xlane.f32.xlu0 %v314_v42 }
 0x40c   : > { %320 = vrot.lane.b32.xlu0 %v546_v2, %s511_s21 }
 0x47f   : > { %v316_v43 = vpop.xlane.xlu0 %315 }
 0x480   : > { %495 = vrcp.f32 %v316_v43 }
 0x483   : > { %v321_v44 = vpop.permute.xlu0 %320 }
 0x484   : > { %v326_v45 = vsel %vm212_vm2, %v321_v44, 0 }
 0x485   : > { %468 = vmatpush3.bf16.msra.mxu0 %v326_v45 }
 0x48d   : > { %v496_v46 = vpop.eup %495 }
 0x48e   : > { %v318_v47 = vmul.f32 %v496_v46, %v494_v41 }
 0x490   : > { %v319_v48 = vpack.c.bf16 %v318_v47, %v318_v47 }
 0x492   : > { %470 = vmatmul.mubr.msk.bf16.vlgmr.msra.gmra.mxu0 %vm145_vm1, %v319_v48 }
 0x552   : > { %v362_v49 = vpop.f32.mrf.mxu0 }
 0x553   : > { %369 = vrot.lane.b32.xlu0 %v362_v49, %s512_s22 }
 0x554   : > { %v471_v50 = vpop.f32.mrf.mxu0 }
 0x556   : > { %v365_v51 = vpop.f32.mrf.mxu0 }
 0x558   : > { %v472_v52 = vpop.f32.mrf.mxu0 }
 0x5c5   : > { %v370_v53 = vpop.permute.xlu0 %369 }
 0x5c6   : > { %v372_v54 = vsel %vm145_vm1, %v250_v27, %v370_v53 }
 0x5c7   : > { %374 = vst.msk [vmem:[%s138_s25] sm:$0xff] %vm373_vm3, %v372_v54 }
 0x5c8 PF: > { %s12_s9 = sadd.s32 1, %s503_s9  }
 0x5c9   : > { %p9_p4 = scmp.ge.s32.totalorder %s12_s9, 6  }
 0x5cb   :  { %11 = sbr.rel (!%p9_p4) target bundleno = 1 (0x1), region = 58 }

// kernel: compute_inbatch_contrastive_loss.39
= control target key start
LH: loop header
LB: loop body
LE: loop exit
PB: predicated region body
PF: predicated region fallthrough
CT: control target
= control target key end

     0   :  { %vm25_vm0 = vcmask 130048   ;;  %vm200_vm1 = vcmask 523264   ;;  %s330_s0 = inlined_call_operand.vmem [shape: f32[32,16], index: 0, kind: input, shape index: {}]   ;;  %s331_s1 = inlined_call_operand.vmem [shape: f32[16,64], index: 1, kind: input, shape index: {}]   ;;  %s332_s2 = inlined_call_operand.vmem [shape: f32[1,16], index: 2, kind: input, shape index: {}]   ;;  %s333_s3 = inlined_call_operand.vmem [shape: f32[1,16], index: 3, kind: input, shape index: {}]   ;;  %s334_s4 = inlined_call_operand.vmem [shape: f32[1,64], index: 4, kind: input, shape index: {}]   ;;  %s335_s5 = inlined_call_operand.vmem [shape: f32[32,64], index: 5, kind: output, shape index: {}]  }
   0x1   :  { %v21_v0 = vld [vmem:[%s330_s0] sm:$0xff]  ;;  %v23_v1 = vld [vmem:[%s330_s0 + $0x10] sm:$0xff]  ;;  %v22_v2 = vld [vmem:[%s330_s0 + $0x8] sm:$0xff] }
   0x2   :  { %v26_v3 = vsel %vm25_vm0, %v21_v0, 0.0  ;;  %v32_v4 = vsel %vm25_vm0, %v23_v1, 0.0  ;;  %v24_v5 = vld [vmem:[%s330_s0 + $0x18] sm:$0xff]  ;;  %v29_v6 = vsel %vm25_vm0, %v22_v2, 0.0  ;;  %v103_v28 = vld [vmem:[%s331_s1] sm:$0xff]  ;;  %v104_v29 = vld [vmem:[%s331_s1 + $0x8] sm:$0xff] }
   0x3   :  { %27 = vadd.xlane.f32.xlu0 %v26_v3  ;;  %33 = vadd.xlane.f32.xlu1 %v32_v4  ;;  %v35_v7 = vsel %vm25_vm0, %v24_v5, 0.0  ;;  %v105_v30 = vpack.c.bf16 %v104_v29, %v103_v28  ;;  %v209_v45 = vld [vmem:[%s332_s2] ss:$0 sm:$0xff] }
   0x4   :  { %v210_v50 = vld [vmem:[%s333_s3] ss:$0 sm:$0xff] }
   0x5   :  { %221 = vmatprep.subr.bf16.mxu0 %v105_v30  ;;  %v211_v63 = vld [vmem:[%s334_s4] ss:$0 sm:$0xff] }
   0x6   :  { %222 = vmatpush3.bf16.msra.mxu0 %v105_v30 }
   0x7   :  { %30 = vadd.xlane.f32.xlu0 %v29_v6  ;;  %36 = vadd.xlane.f32.xlu1 %v35_v7 }
  0x8c   :  { %v28_v8 = vpop.xlane.xlu0 %27  ;;  %v34_v9 = vpop.xlane.xlu1 %33 }
  0x8d   :  { %v39_v10 = vmul.f32 0.0625, %v28_v8  ;;  %v41_v11 = vmul.f32 0.0625, %v34_v9 }
  0x8f   :  { %v43_v12 = vsub.f32 %v21_v0, %v39_v10  ;;  %v45_v13 = vsub.f32 %v23_v1, %v41_v11 }
  0x90   :  { %v31_v14 = vpop.xlane.xlu0 %30  ;;  %v37_v15 = vpop.xlane.xlu1 %36 }
  0x91   :  { %v40_v16 = vmul.f32 0.0625, %v31_v14  ;;  %v42_v17 = vmul.f32 0.0625, %v37_v15  ;;  %v47_v18 = vmul.f32 %v43_v12, %v43_v12  ;;  %v49_v19 = vmul.f32 %v45_v13, %v45_v13 }
  0x93   :  { %v44_v20 = vsub.f32 %v22_v2, %v40_v16  ;;  %v46_v21 = vsub.f32 %v24_v5, %v42_v17  ;;  %v51_v22 = vsel %vm25_vm0, %v47_v18, 0.0  ;;  %v57_v23 = vsel %vm25_vm0, %v49_v19, 0.0 }
  0x94   :  { %52 = vadd.xlane.f32.xlu0 %v51_v22 }
  0x95   :  { %v48_v24 = vmul.f32 %v44_v20, %v44_v20  ;;  %v50_v25 = vmul.f32 %v46_v21, %v46_v21 }
  0x97   :  { %v54_v26 = vsel %vm25_vm0, %v48_v24, 0.0  ;;  %v60_v27 = vsel %vm25_vm0, %v50_v25, 0.0 }
  0x98   :  { %58 = vadd.xlane.f32.xlu0 %v57_v23  ;;  %55 = vadd.xlane.f32.xlu1 %v54_v26 }
  0x9c   :  { %61 = vadd.xlane.f32.xlu1 %v60_v27 }
 0x11d   :  { %v53_v31 = vpop.xlane.xlu0 %52 }
 0x11e   :  { %v63_v32 = vmul.f32 0.0625, %v53_v31 }
 0x120   :  { %v67_v33 = vadd.f32 1e-05, %v63_v32 }
 0x121   :  { %v56_v34 = vpop.xlane.xlu1 %55  ;;  %v59_v35 = vpop.xlane.xlu0 %58 }
 0x122   :  { %227 = vrsqrt.f32 %v67_v33  ;;  %v64_v36 = vmul.f32 0.0625, %v56_v34  ;;  %v65_v37 = vmul.f32 0.0625, %v59_v35 }
 0x124   :  { %v68_v38 = vadd.f32 1e-05, %v64_v36  ;;  %v69_v39 = vadd.f32 1e-05, %v65_v37 }
 0x125   :  { %v62_v40 = vpop.xlane.xlu1 %61 }
 0x126   :  { %229 = vrsqrt.f32 %v68_v38  ;;  %v66_v41 = vmul.f32 0.0625, %v62_v40 }
 0x127   :  { %231 = vrsqrt.f32 %v69_v39 }
 0x128   :  { %v70_v42 = vadd.f32 1e-05, %v66_v41 }
 0x12a   :  { %233 = vrsqrt.f32 %v70_v42 }
 0x12f   :  { %v228_v43 = vpop.eup %227 }
 0x130   :  { %v75_v44 = vmul.f32 %v228_v43, %v43_v12 }
 0x132   :  { %v86_v49 = vmul.f32 %v209_v45, %v75_v44 }
 0x133   :  { %v230_v46 = vpop.eup %229 }
 0x134   :  { %v232_v47 = vpop.eup %231  ;;  %v76_v48 = vmul.f32 %v230_v46, %v44_v20  ;;  %v97_v54 = vadd.f32 %v210_v50, %v86_v49 }
 0x135   :  { %v77_v51 = vmul.f32 %v232_v47, %v45_v13 }
 0x136   :  { %v87_v52 = vmul.f32 %v209_v45, %v76_v48 }
 0x137   :  { %v234_v53 = vpop.eup %233  ;;  %v88_v57 = vmul.f32 %v209_v45, %v77_v51 }
 0x138   :  { %v98_v55 = vadd.f32 %v210_v50, %v87_v52  ;;  %v78_v56 = vmul.f32 %v234_v53, %v46_v21 }
 0x139   :  { %v99_v60 = vadd.f32 %v210_v50, %v88_v57 }
 0x13a   :  { %v101_v58 = vpack.c.bf16 %v98_v55, %v97_v54  ;;  %v89_v59 = vmul.f32 %v209_v45, %v78_v56 }
 0x13c   :  { %223 = vmatprep.mubr.msk.bf16.mxu0 %vm25_vm0, %v101_v58  ;;  %v100_v61 = vadd.f32 %v210_v50, %v89_v59 }
 0x13e   :  { %v102_v62 = vpack.c.bf16 %v100_v61, %v99_v60 }
 0x140   :  { %224 = vmatmul.mubr.msk.bf16.vlgmr.msra.gmra.mxu0 %vm25_vm0, %v102_v62 }
 0x200   :  { %v225_v0 = vpop.f32.mrf.mxu0 }
 0x201   :  { %v162_v1 = vadd.f32 %v225_v0, %v211_v63 }
 0x202   :  { %v153_v2 = vpop.f32.mrf.mxu0 }
 0x203   :  { %v216_v3 = vmul.f32 -1.702, %v162_v1  ;;  %v154_v4 = vadd.f32 %v211_v63, %v153_v2 }
 0x204   :  { %v226_v5 = vpop.f32.mrf.mxu0 }
 0x205   :  { %v180_v6 = vmul.f32 1.442695, %v216_v3  ;;  %v214_v7 = vmul.f32 -1.702, %v154_v4  ;;  %v165_v8 = vadd.f32 %v226_v5, %v211_v63 }
 0x206   :  { %v156_v9 = vpop.f32.mrf.mxu0 }
 0x207   :  { %235 = vpow2.f32 %v180_v6  ;;  %v176_v10 = vmul.f32 1.442695, %v214_v7  ;;  %v217_v11 = vmul.f32 -1.702, %v165_v8  ;;  %v157_v12 = vadd.f32 %v211_v63, %v156_v9 }
 0x209   :  { %237 = vpow2.f32 %v176_v10  ;;  %v182_v13 = vmul.f32 1.442695, %v217_v11  ;;  %v215_v14 = vmul.f32 -1.702, %v157_v12 }
 0x20b   :  { %239 = vpow2.f32 %v182_v13  ;;  %v178_v15 = vmul.f32 1.442695, %v215_v14 }
 0x20d   :  { %241 = vpow2.f32 %v178_v15 }
 0x214   :  { %v236_v16 = vpop.eup %235 }
 0x215   :  { %v186_v17 = vadd.f32 1.0, %v236_v16 }
 0x216   :  { %v238_v18 = vpop.eup %237 }
 0x217   :  { %243 = vrcp.f32 %v186_v17  ;;  %v184_v19 = vadd.f32 1.0, %v238_v18 }
 0x218   :  { %v240_v20 = vpop.eup %239 }
 0x219   :  { %245 = vrcp.f32 %v184_v19  ;;  %v187_v21 = vadd.f32 1.0, %v240_v20 }
 0x21a   :  { %v242_v22 = vpop.eup %241 }
 0x21b   :  { %247 = vrcp.f32 %v187_v21  ;;  %v185_v23 = vadd.f32 1.0, %v242_v22 }
 0x21d   :  { %249 = vrcp.f32 %v185_v23 }
 0x224   :  { %v244_v24 = vpop.eup %243 }
 0x225   :  { %v198_v25 = vmul.f32 %v244_v24, %v162_v1 }
 0x226   :  { %v246_v26 = vpop.eup %245 }
 0x227   :  { %203 = vst.msk [vmem:[%s335_s5 + $0x10] sm:$0xff] %vm200_vm1, %v198_v25  ;;  %v196_v27 = vmul.f32 %v246_v26, %v154_v4 }
 0x228   :  { %v248_v28 = vpop.eup %247 }
 0x229   :  { %201 = vst.msk [vmem:[%s335_s5] sm:$0xff] %vm200_vm1, %v196_v27  ;;  %v199_v29 = vmul.f32 %v248_v28, %v165_v8 }
 0x22a   :  { %v250_v30 = vpop.eup %249 }
 0x22b   :  { %204 = vst.msk [vmem:[%s335_s5 + $0x18] sm:$0xff] %vm200_vm1, %v199_v29  ;;  %v197_v31 = vmul.f32 %v250_v30, %v157_v12 }
 0x22d   :  { %202 = vst.msk [vmem:[%s335_s5 + $0x8] sm:$0xff] %vm200_vm1, %v197_v31 }

// kernel: compute_inbatch_contrastive_loss.40
= control target key start
LH: loop header
LB: loop body
LE: loop exit
PB: predicated region body
PF: predicated region fallthrough
CT: control target
= control target key end

     0   :  { %vm43_vm0 = vcmask 523264   ;;  %vm107_vm1 = vcmask 130048   ;;  %s231_s1 = inlined_call_operand.vmem [shape: f32[64,16], index: 1, kind: input, shape index: {}]   ;;  %s232_s0 = inlined_call_operand.vmem [shape: f32[32,64], index: 0, kind: input, shape index: {}]   ;;  %s233_s2 = inlined_call_operand.vmem [shape: f32[1,16], index: 2, kind: input, shape index: {}]   ;;  %s234_s3 = inlined_call_operand.vmem [shape: f32[32,16], index: 3, kind: input, shape index: {}]   ;;  %s235_s4 = inlined_call_operand.vmem [shape: f32[32,16], index: 4, kind: output, shape index: {}]  }
   0x1   :  { %v30_v0 = vld [vmem:[%s231_s1 + $0x30] sm:$0xff]  ;;  %v31_v1 = vld [vmem:[%s231_s1 + $0x38] sm:$0xff]  ;;  %v28_v2 = vld [vmem:[%s231_s1 + $0x20] sm:$0xff] }
   0x2   :  { %v35_v3 = vpack.c.bf16 %v31_v1, %v30_v0  ;;  %v29_v4 = vld [vmem:[%s231_s1 + $0x28] sm:$0xff]  ;;  %v26_v6 = vld [vmem:[%s231_s1 + $0x10] sm:$0xff]  ;;  %v27_v7 = vld [vmem:[%s231_s1 + $0x18] sm:$0xff] }
   0x3   :  { %v34_v5 = vpack.c.bf16 %v29_v4, %v28_v2  ;;  %v18_v8 = vld [vmem:[%s232_s0] sm:$0xff]  ;;  %v19_v9 = vld [vmem:[%s232_s0 + $0x8] sm:$0xff]  ;;  %v33_v11 = vpack.c.bf16 %v27_v7, %v26_v6  ;;  %v20_v15 = vld [vmem:[%s232_s0 + $0x10] sm:$0xff] }
   0x4   :  { %125 = vmatprep.subr.bf16.mxu0 %v35_v3  ;;  %v22_v10 = vpack.c.bf16 %v19_v9, %v18_v8  ;;  %v24_v12 = vld [vmem:[%s231_s1] sm:$0xff]  ;;  %v25_v13 = vld [vmem:[%s231_s1 + $0x8] sm:$0xff]  ;;  %v21_v16 = vld [vmem:[%s232_s0 + $0x18] sm:$0xff] }
   0x5   :  { %126 = vmatpush3.bf16.msra.mxu0 %v35_v3  ;;  %v32_v14 = vpack.c.bf16 %v25_v13, %v24_v12  ;;  %v23_v17 = vpack.c.bf16 %v21_v16, %v20_v15  ;;  %v116_v18 = vld [vmem:[%s233_s2] ss:$0 sm:$0xff]  ;;  %v101_v20 = vld [vmem:[%s234_s3 + $0x10] sm:$0xff]  ;;  %v102_v27 = vld [vmem:[%s234_s3 + $0x18] sm:$0xff] }
   0x6   :  { %127 = vmatprep.subr.bf16.mxu0 %v34_v5  ;;  %133 = vmatprep.mubr.msk.bf16.mxu0 %vm43_vm0, %v22_v10  ;;  %v99_v23 = vld [vmem:[%s234_s3] sm:$0xff]  ;;  %v100_v31 = vld [vmem:[%s234_s3 + $0x8] sm:$0xff] }
   0x9   :  { %128 = vmatpush3.bf16.msra.mxu0 %v34_v5 }
   0xa   :  { %129 = vmatprep.subr.bf16.mxu0 %v33_v11 }
   0xd   :  { %130 = vmatpush3.bf16.msra.mxu0 %v33_v11 }
   0xe   :  { %131 = vmatprep.subr.bf16.mxu0 %v32_v14 }
  0x11   :  { %132 = vmatpush3.bf16.msra.mxu0 %v32_v14 }
  0x14   :  { %134 = vmatmul.mubr.msk.bf16.vlgmr.msra.gmra.mxu0 %vm43_vm0, %v23_v17 }
  0xd4   :  { %v135_v19 = vpop.f32.mrf.mxu0 }
  0xd5   :  { %v93_v21 = vadd.f32 %v135_v19, %v116_v18 }
  0xd6   :  { %v84_v22 = vpop.f32.mrf.mxu0 }
  0xd7   :  { %v105_v24 = vadd.f32 %v101_v20, %v93_v21  ;;  %v85_v25 = vadd.f32 %v116_v18, %v84_v22 }
  0xd8   :  { %v136_v26 = vpop.f32.mrf.mxu0 }
  0xd9   :  { %110 = vst.msk [vmem:[%s235_s4 + $0x10] sm:$0xff] %vm107_vm1, %v105_v24  ;;  %v103_v28 = vadd.f32 %v99_v23, %v85_v25  ;;  %v96_v29 = vadd.f32 %v136_v26, %v116_v18 }
  0xda   :  { %v87_v30 = vpop.f32.mrf.mxu0 }
  0xdb   :  { %108 = vst.msk [vmem:[%s235_s4] sm:$0xff] %vm107_vm1, %v103_v28  ;;  %v106_v32 = vadd.f32 %v102_v27, %v96_v29  ;;  %v88_v33 = vadd.f32 %v116_v18, %v87_v30 }
  0xdd   :  { %111 = vst.msk [vmem:[%s235_s4 + $0x18] sm:$0xff] %vm107_vm1, %v106_v32  ;;  %v104_v34 = vadd.f32 %v100_v31, %v88_v33 }
  0xdf   :  { %109 = vst.msk [vmem:[%s235_s4 + $0x8] sm:$0xff] %vm107_vm1, %v104_v34 }

// kernel: compute_inbatch_contrastive_loss.46
= control target key start
LH: loop header
LB: loop body
LE: loop exit
PB: predicated region body
PF: predicated region fallthrough
CT: control target
= control target key end

     0   :  { %vm18_vm0 = vcmask 130048   ;;  %s174_s0 = inlined_call_operand.vmem [shape: f32[32,16], index: 0, kind: input, shape index: {}]   ;;  %s175_s1 = inlined_call_operand.vmem [shape: f32[1,16], index: 1, kind: input, shape index: {}]   ;;  %s176_s2 = inlined_call_operand.vmem [shape: f32[1,16], index: 2, kind: input, shape index: {}]   ;;  %s177_s3 = inlined_call_operand.vmem [shape: f32[32,16], index: 3, kind: output, shape index: {}]  }
   0x1   :  { %v14_v0 = vld [vmem:[%s174_s0] sm:$0xff]  ;;  %v16_v1 = vld [vmem:[%s174_s0 + $0x10] sm:$0xff]  ;;  %v15_v2 = vld [vmem:[%s174_s0 + $0x8] sm:$0xff] }
   0x2   :  { %v19_v3 = vsel %vm18_vm0, %v14_v0, 0.0  ;;  %v25_v4 = vsel %vm18_vm0, %v16_v1, 0.0  ;;  %v17_v5 = vld [vmem:[%s174_s0 + $0x18] sm:$0xff]  ;;  %v22_v6 = vsel %vm18_vm0, %v15_v2, 0.0  ;;  %v102_v41 = vld [vmem:[%s175_s1] ss:$0 sm:$0xff] }
   0x3   :  { %20 = vadd.xlane.f32.xlu0 %v19_v3  ;;  %26 = vadd.xlane.f32.xlu1 %v25_v4  ;;  %v28_v7 = vsel %vm18_vm0, %v17_v5, 0.0  ;;  %v103_v43 = vld [vmem:[%s176_s2] ss:$0 sm:$0xff] }
   0x7   :  { %23 = vadd.xlane.f32.xlu0 %v22_v6  ;;  %29 = vadd.xlane.f32.xlu1 %v28_v7 }
  0x8c   :  { %v21_v8 = vpop.xlane.xlu0 %20  ;;  %v27_v9 = vpop.xlane.xlu1 %26 }
  0x8d   :  { %v32_v10 = vmul.f32 0.0625, %v21_v8  ;;  %v34_v11 = vmul.f32 0.0625, %v27_v9 }
  0x8f   :  { %v36_v12 = vsub.f32 %v14_v0, %v32_v10  ;;  %v38_v13 = vsub.f32 %v16_v1, %v34_v11 }
  0x90   :  { %v24_v14 = vpop.xlane.xlu0 %23  ;;  %v30_v15 = vpop.xlane.xlu1 %29 }
  0x91   :  { %v33_v16 = vmul.f32 0.0625, %v24_v14  ;;  %v35_v17 = vmul.f32 0.0625, %v30_v15  ;;  %v40_v18 = vmul.f32 %v36_v12, %v36_v12  ;;  %v42_v19 = vmul.f32 %v38_v13, %v38_v13 }
  0x93   :  { %v37_v20 = vsub.f32 %v15_v2, %v33_v16  ;;  %v39_v21 = vsub.f32 %v17_v5, %v35_v17  ;;  %v44_v22 = vsel %vm18_vm0, %v40_v18, 0.0  ;;  %v50_v23 = vsel %vm18_vm0, %v42_v19, 0.0 }
  0x94   :  { %45 = vadd.xlane.f32.xlu0 %v44_v22 }
  0x95   :  { %v41_v24 = vmul.f32 %v37_v20, %v37_v20  ;;  %v43_v25 = vmul.f32 %v39_v21, %v39_v21 }
  0x97   :  { %v47_v26 = vsel %vm18_vm0, %v41_v24, 0.0  ;;  %v53_v27 = vsel %vm18_vm0, %v43_v25, 0.0 }
  0x98   :  { %51 = vadd.xlane.f32.xlu0 %v50_v23  ;;  %48 = vadd.xlane.f32.xlu1 %v47_v26 }
  0x9c   :  { %54 = vadd.xlane.f32.xlu1 %v53_v27 }
 0x11d   :  { %v46_v28 = vpop.xlane.xlu0 %45 }
 0x11e   :  { %v56_v29 = vmul.f32 0.0625, %v46_v28 }
 0x120   :  { %v60_v30 = vadd.f32 1e-05, %v56_v29 }
 0x121   :  { %v49_v31 = vpop.xlane.xlu1 %48  ;;  %v52_v32 = vpop.xlane.xlu0 %51 }
 0x122   :  { %104 = vrsqrt.f32 %v60_v30  ;;  %v57_v33 = vmul.f32 0.0625, %v49_v31  ;;  %v58_v34 = vmul.f32 0.0625, %v52_v32 }
 0x124   :  { %v61_v35 = vadd.f32 1e-05, %v57_v33  ;;  %v62_v36 = vadd.f32 1e-05, %v58_v34 }
 0x125   :  { %v55_v37 = vpop.xlane.xlu1 %54 }
 0x126   :  { %106 = vrsqrt.f32 %v61_v35  ;;  %v59_v38 = vmul.f32 0.0625, %v55_v37 }
 0x127   :  { %108 = vrsqrt.f32 %v62_v36 }
 0x128   :  { %v63_v39 = vadd.f32 1e-05, %v59_v38 }
 0x12a   :  { %110 = vrsqrt.f32 %v63_v39 }
 0x12f   :  { %v105_v40 = vpop.eup %104 }
 0x130   :  { %v68_v42 = vmul.f32 %v105_v40, %v36_v12 }
 0x132   :  { %v79_v44 = vmul.f32 %v102_v41, %v68_v42 }
 0x133   :  { %v107_v45 = vpop.eup %106 }
 0x134   :  { %v109_v46 = vpop.eup %108  ;;  %v90_v47 = vadd.f32 %v103_v43, %v79_v44  ;;  %v69_v48 = vmul.f32 %v107_v45, %v37_v20 }
 0x135   :  { %v70_v49 = vmul.f32 %v109_v46, %v38_v13 }
 0x136   :  { %94 = vst.msk [vmem:[%s177_s3] sm:$0xff] %vm18_vm0, %v90_v47  ;;  %v80_v50 = vmul.f32 %v102_v41, %v69_v48 }
 0x137   :  { %v111_v51 = vpop.eup %110  ;;  %v81_v52 = vmul.f32 %v102_v41, %v70_v49 }
 0x138   :  { %v91_v53 = vadd.f32 %v103_v43, %v80_v50  ;;  %v71_v54 = vmul.f32 %v111_v51, %v39_v21 }
 0x139   :  { %v92_v55 = vadd.f32 %v103_v43, %v81_v52 }
 0x13a   :  { %95 = vst.msk [vmem:[%s177_s3 + $0x8] sm:$0xff] %vm18_vm0, %v91_v53  ;;  %v82_v56 = vmul.f32 %v102_v41, %v71_v54 }
 0x13b   :  { %96 = vst.msk [vmem:[%s177_s3 + $0x10] sm:$0xff] %vm18_vm0, %v92_v55 }
 0x13c   :  { %v93_v57 = vadd.f32 %v103_v43, %v82_v56 }
 0x13e   :  { %97 = vst.msk [vmem:[%s177_s3 + $0x18] sm:$0xff] %vm18_vm0, %v93_v57 }

// kernel: compute_inbatch_contrastive_loss.60
= control target key start
LH: loop header
LB: loop body
LE: loop exit
PB: predicated region body
PF: predicated region fallthrough
CT: control target
= control target key end

     0   :  { %vm29_vm0 = vcmask 130048   ;;  %vm48_vm1 = vcmask 125952   ;;  %vm178_vm2 = vcmask 785408   ;;  %vm185_vm3 = vcmask 781312   ;;  %s349_s0 = inlined_call_operand.vmem [shape: f32[52,16], index: 0, kind: input, shape index: {}]   ;;  %s350_s1 = inlined_call_operand.vmem [shape: f32[16,96], index: 1, kind: input, shape index: {}]   ;;  %s351_s2 = inlined_call_operand.vmem [shape: f32[1,16], index: 2, kind: input, shape index: {}]   ;;  %s352_s3 = inlined_call_operand.vmem [shape: f32[52,96], index: 3, kind: output, shape index: {}]  }
   0x1   :  { %v250_v0 = vld [vmem:[%s349_s0 + $0x20] sm:$0xff]  ;;  %v260_v2 = vld [vmem:[%s349_s0 + $0x28] sm:$0xff]  ;;  %v278_v8 = vld [vmem:[%s349_s0 + $0x18] sm:$0xff] }
   0x2   :  { %v255_v1 = vld [vmem:[%s349_s0] sm:$0xff]  ;;  %v26_v3 = vmul.f32 %v250_v0, %v250_v0  ;;  %v27_v5 = vmul.f32 %v260_v2, %v260_v2  ;;  %v271_v6 = vld [vmem:[%s349_s0 + $0x8] sm:$0xff]  ;;  %v283_v9 = vld [vmem:[%s349_s0 + $0x10] sm:$0xff]  ;;  %v25_v14 = vmul.f32 %v278_v8, %v278_v8 }
   0x3   :  { %v22_v4 = vmul.f32 %v255_v1, %v255_v1  ;;  %v23_v7 = vmul.f32 %v271_v6, %v271_v6  ;;  %v24_v15 = vmul.f32 %v283_v9, %v283_v9  ;;  %v296_v16 = vld [vmem:[%s349_s0 + $0x30] sm:$0xf]  ;;  %v99_v21 = vld [vmem:[%s350_s1] sm:$0xff]  ;;  %v100_v22 = vld [vmem:[%s350_s1 + $0x8] sm:$0xff] }
   0x4   :  { %v42_v10 = vsel %vm29_vm0, %v26_v3, 0.0  ;;  %v45_v12 = vsel %vm29_vm0, %v27_v5, 0.0  ;;  %v39_v17 = vsel %vm29_vm0, %v25_v14, 0.0  ;;  %v28_v19 = vmul.f32 %v296_v16, %v296_v16  ;;  %v191_v50 = vld [vmem:[%s351_s2] ss:$0 sm:$0xff] }
   0x5   :  { %v30_v11 = vsel %vm29_vm0, %v22_v4, 0.0  ;;  %43 = vadd.xlane.f32.xlu1 %v42_v10  ;;  %v33_v13 = vsel %vm29_vm0, %v23_v7, 0.0  ;;  %v36_v18 = vsel %vm29_vm0, %v24_v15, 0.0  ;;  %v101_v23 = vpack.c.bf16 %v100_v22, %v99_v21 }
   0x6   :  { %31 = vadd.xlane.f32.xlu0 %v30_v11  ;;  %v49_v20 = vsel %vm48_vm1, %v28_v19, 0.0 }
   0x7   :  { %201 = vmatprep.subr.bf16.mxu0 %v101_v23  ;;  %211 = vmatprep.subr.bf16.mxu1 %v101_v23 }
   0x8   :  { %202 = vmatpush3.bf16.msra.mxu0 %v101_v23  ;;  %212 = vmatpush3.bf16.msra.mxu1 %v101_v23 }
   0x9   :  { %46 = vadd.xlane.f32.xlu1 %v45_v12 }
   0xa   :  { %34 = vadd.xlane.f32.xlu0 %v33_v13 }
   0xd   :  { %40 = vadd.xlane.f32.xlu1 %v39_v17 }
   0xe   :  { %37 = vadd.xlane.f32.xlu0 %v36_v18 }
  0x12   :  { %50 = vadd.xlane.f32.xlu0 %v49_v20 }
  0x8e   :  { %v44_v24 = vpop.xlane.xlu1 %43 }
  0x8f   :  { %v32_v25 = vpop.xlane.xlu0 %31  ;;  %v57_v26 = vmul.f32 0.0625, %v44_v24 }
  0x90   :  { %v53_v27 = vmul.f32 0.0625, %v32_v25 }
  0x91   :  { %v64_v28 = vadd.f32 1e-06, %v57_v26 }
  0x92   :  { %v60_v29 = vadd.f32 1e-06, %v53_v27  ;;  %v47_v30 = vpop.xlane.xlu1 %46 }
  0x93   :  { %v35_v31 = vpop.xlane.xlu0 %34  ;;  %213 = vrsqrt.f32 %v64_v28  ;;  %v58_v32 = vmul.f32 0.0625, %v47_v30 }
  0x94   :  { %v54_v33 = vmul.f32 0.0625, %v35_v31  ;;  %215 = vrsqrt.f32 %v60_v29 }
  0x95   :  { %v65_v34 = vadd.f32 1e-06, %v58_v32 }
  0x96   :  { %v61_v35 = vadd.f32 1e-06, %v54_v33  ;;  %v41_v36 = vpop.xlane.xlu1 %40 }
  0x97   :  { %v38_v37 = vpop.xlane.xlu0 %37  ;;  %217 = vrsqrt.f32 %v65_v34  ;;  %v56_v38 = vmul.f32 0.0625, %v41_v36 }
  0x98   :  { %v55_v39 = vmul.f32 0.0625, %v38_v37  ;;  %219 = vrsqrt.f32 %v61_v35 }
  0x99   :  { %v63_v40 = vadd.f32 1e-06, %v56_v38 }
  0x9a   :  { %v62_v41 = vadd.f32 1e-06, %v55_v39 }
  0x9b   :  { %v51_v42 = vpop.xlane.xlu0 %50  ;;  %221 = vrsqrt.f32 %v63_v40 }
  0x9c   :  { %v59_v43 = vmul.f32 0.0625, %v51_v42  ;;  %223 = vrsqrt.f32 %v62_v41 }
  0x9e   :  { %v66_v44 = vadd.f32 1e-06, %v59_v43 }
  0xa0   :  { %225 = vrsqrt.f32 %v66_v44  ;;  %v214_v45 = vpop.eup %213 }
  0xa1   :  { %v216_v46 = vpop.eup %215  ;;  %v78_v47 = vmul.f32 %v214_v45, %v250_v0 }
  0xa2   :  { %v74_v49 = vmul.f32 %v216_v46, %v255_v1 }
  0xa3   :  { %v92_v53 = vmul.f32 %v191_v50, %v78_v47 }
  0xa4   :  { %v218_v48 = vpop.eup %217  ;;  %v88_v57 = vmul.f32 %v191_v50, %v74_v49 }
  0xa5   :  { %v220_v51 = vpop.eup %219  ;;  %v79_v52 = vmul.f32 %v218_v48, %v260_v2 }
  0xa6   :  { %v75_v54 = vmul.f32 %v220_v51, %v271_v6 }
  0xa7   :  { %v93_v55 = vmul.f32 %v191_v50, %v79_v52 }
  0xa8   :  { %v222_v56 = vpop.eup %221  ;;  %v89_v58 = vmul.f32 %v191_v50, %v75_v54 }
  0xa9   :  { %v224_v59 = vpop.eup %223  ;;  %v97_v60 = vpack.c.bf16 %v93_v55, %v92_v53  ;;  %v77_v61 = vmul.f32 %v222_v56, %v278_v8 }
  0xaa   :  { %v95_v62 = vpack.c.bf16 %v89_v58, %v88_v57  ;;  %v76_v63 = vmul.f32 %v224_v59, %v283_v9 }
  0xab   :  { %207 = vmatprep.mubr.msk.bf16.mxu1 %vm29_vm0, %v97_v60  ;;  %v91_v0 = vmul.f32 %v191_v50, %v77_v61 }
  0xac   :  { %203 = vmatprep.mubr.msk.bf16.mxu0 %vm29_vm0, %v95_v62  ;;  %v90_v2 = vmul.f32 %v191_v50, %v76_v63 }
  0xad   :  { %v226_v1 = vpop.eup %225 }
  0xae   :  { %v80_v3 = vmul.f32 %v226_v1, %v296_v16  ;;  %v96_v4 = vpack.c.bf16 %v91_v0, %v90_v2 }
  0xb0   :  { %v94_v5 = vmul.f32 %v191_v50, %v80_v3  ;;  %204 = vmatmul.mubr.msk.bf16.vlgmr.msra.gmra.mxu0 %vm29_vm0, %v96_v4 }
  0xb2   :  { %v98_v6 = vpack.c.bf16 %v94_v5, %v94_v5 }
  0xb4   :  { %208 = vmatmul.mubr.msk.bf16.vlgmr.msra.gmra.mxu1 %vm29_vm0, %v98_v6 }
 0x170   :  { %v205_v7 = vpop.f32.mrf.mxu0 }
 0x171   :  { %181 = vst.msk [vmem:[%s352_s3 + $0x10] sm:$0xff] %vm178_vm2, %v205_v7 }
 0x172   :  { %v148_v8 = vpop.f32.mrf.mxu0 }
 0x173   :  { %179 = vst.msk [vmem:[%s352_s3] sm:$0xff] %vm178_vm2, %v148_v8 }
 0x174   :  { %v209_v9 = vpop.f32.mrf.mxu1  ;;  %v206_v10 = vpop.f32.mrf.mxu0 }
 0x175   :  { %186 = vst.msk [vmem:[%s352_s3 + $0x30] sm:$0xf] %vm185_vm3, %v209_v9 }
 0x176   :  { %182 = vst.msk [vmem:[%s352_s3 + $0x18] sm:$0xff] %vm178_vm2, %v206_v10  ;;  %v164_v11 = vpop.f32.mrf.mxu1  ;;  %v151_v12 = vpop.f32.mrf.mxu0 }
 0x177   :  { %183 = vst.msk [vmem:[%s352_s3 + $0x20] sm:$0xff] %vm178_vm2, %v164_v11  ;;  %180 = vst.msk [vmem:[%s352_s3 + $0x8] sm:$0xff] %vm178_vm2, %v151_v12 }
 0x178   :  { %v210_v13 = vpop.f32.mrf.mxu1 }
 0x17a   :  { %v167_v14 = vpop.f32.mrf.mxu1 }
 0x17b   :  { %184 = vst.msk [vmem:[%s352_s3 + $0x28] sm:$0xff] %vm178_vm2, %v167_v14 }

// kernel: compute_inbatch_contrastive_loss.62
= control target key start
LH: loop header
LB: loop body
LE: loop exit
PB: predicated region body
PF: predicated region fallthrough
CT: control target
= control target key end

     0   :  { %vm39_vm0 = vcmask 261120   ;;  %vm116_vm1 = vcmask 130048   ;;  %vm123_vm2 = vcmask 125952   ;;  %s260_s1 = inlined_call_operand.vmem [shape: f32[32,16], index: 1, kind: input, shape index: {}]   ;;  %s261_s0 = inlined_call_operand.vmem [shape: f32[52,32], index: 0, kind: input, shape index: {}]   ;;  %s262_s2 = inlined_call_operand.vmem [shape: f32[52,16], index: 2, kind: input, shape index: {}]   ;;  %s263_s3 = inlined_call_operand.vmem [shape: f32[52,16], index: 3, kind: output, shape index: {}]  }
   0x1   :  { %v28_v0 = vld [vmem:[%s260_s1 + $0x10] sm:$0xff]  ;;  %v29_v1 = vld [vmem:[%s260_s1 + $0x18] sm:$0xff]  ;;  %v26_v2 = vld [vmem:[%s260_s1] sm:$0xff] }
   0x2   :  { %v31_v3 = vpack.c.bf16 %v29_v1, %v28_v0  ;;  %v27_v4 = vld [vmem:[%s260_s1 + $0x8] sm:$0xff]  ;;  %v15_v5 = vld [vmem:[%s261_s0] sm:$0xff]  ;;  %v17_v12 = vld [vmem:[%s261_s0 + $0x10] sm:$0xff] }
   0x3   :  { %v16_v6 = vld [vmem:[%s261_s0 + $0x8] sm:$0xff]  ;;  %v30_v7 = vpack.c.bf16 %v27_v4, %v26_v2  ;;  %v19_v9 = vld [vmem:[%s261_s0 + $0x20] sm:$0xff]  ;;  %v18_v13 = vld [vmem:[%s261_s0 + $0x18] sm:$0xff] }
   0x4   :  { %v22_v8 = vpack.c.bf16 %v16_v6, %v15_v5  ;;  %v20_v10 = vld [vmem:[%s261_s0 + $0x28] sm:$0xff]  ;;  %139 = vmatprep.subr.bf16.mxu0 %v31_v3  ;;  %151 = vmatprep.subr.bf16.mxu1 %v31_v3  ;;  %v21_v14 = vld [vmem:[%s261_s0 + $0x30] sm:$0xf]  ;;  %v23_v15 = vpack.c.bf16 %v18_v13, %v17_v12  ;;  %v32_v21 = vld [vmem:[%s262_s2] sm:$0xff] }
   0x5   :  { %v24_v11 = vpack.c.bf16 %v20_v10, %v19_v9  ;;  %140 = vmatpush3.bf16.msra.mxu0 %v31_v3  ;;  %153 = vmatpush3.bf16.msra.mxu1 %v31_v3  ;;  %v25_v16 = vpack.c.bf16 %v21_v14, %v21_v14  ;;  %v34_v17 = vld [vmem:[%s262_s2 + $0x10] sm:$0xff]  ;;  %v36_v22 = vld [vmem:[%s262_s2 + $0x20] sm:$0xff]  ;;  %v35_v27 = vld [vmem:[%s262_s2 + $0x18] sm:$0xff] }
   0x6   :  { %141 = vmatprep.subr.bf16.mxu0 %v30_v7  ;;  %152 = vmatprep.subr.bf16.mxu1 %v30_v7  ;;  %v38_v18 = vld [vmem:[%s262_s2 + $0x30] sm:$0xf]  ;;  %v33_v32 = vld [vmem:[%s262_s2 + $0x8] sm:$0xff] }
   0x7   :  { %143 = vmatprep.mubr.msk.bf16.mxu0 %vm39_vm0, %v22_v8  ;;  %147 = vmatprep.mubr.msk.bf16.mxu1 %vm39_vm0, %v24_v11  ;;  %v37_v33 = vld [vmem:[%s262_s2 + $0x28] sm:$0xff] }
   0x9   :  { %142 = vmatpush3.bf16.msra.mxu0 %v30_v7  ;;  %154 = vmatpush3.bf16.msra.mxu1 %v30_v7 }
   0xc   :  { %144 = vmatmul.mubr.msk.bf16.vlgmr.msra.gmra.mxu0 %vm39_vm0, %v23_v15  ;;  %148 = vmatmul.mubr.msk.bf16.vlgmr.msra.gmra.mxu1 %vm39_vm0, %v25_v16 }
  0xcc   :  { %v145_v19 = vpop.f32.mrf.mxu0  ;;  %v149_v20 = vpop.f32.mrf.mxu1 }
  0xcd   :  { %v95_v23 = vadd.f32 %v145_v19, %v34_v17  ;;  %v111_v24 = vadd.f32 %v149_v20, %v38_v18 }
  0xce   :  { %v86_v25 = vpop.f32.mrf.mxu0  ;;  %v102_v26 = vpop.f32.mrf.mxu1 }
  0xcf   :  { %119 = vst.msk [vmem:[%s263_s3 + $0x10] sm:$0xff] %vm116_vm1, %v95_v23  ;;  %v87_v28 = vadd.f32 %v86_v25, %v32_v21  ;;  %v103_v29 = vadd.f32 %v102_v26, %v36_v22 }
  0xd0   :  { %124 = vst.msk [vmem:[%s263_s3 + $0x30] sm:$0xf] %vm123_vm2, %v111_v24  ;;  %v146_v30 = vpop.f32.mrf.mxu0  ;;  %v150_v31 = vpop.f32.mrf.mxu1 }
  0xd1   :  { %117 = vst.msk [vmem:[%s263_s3] sm:$0xff] %vm116_vm1, %v87_v28  ;;  %121 = vst.msk [vmem:[%s263_s3 + $0x20] sm:$0xff] %vm116_vm1, %v103_v29  ;;  %v98_v34 = vadd.f32 %v146_v30, %v35_v27 }
  0xd2   :  { %v89_v35 = vpop.f32.mrf.mxu0  ;;  %v105_v36 = vpop.f32.mrf.mxu1 }
  0xd3   :  { %120 = vst.msk [vmem:[%s263_s3 + $0x18] sm:$0xff] %vm116_vm1, %v98_v34  ;;  %v90_v37 = vadd.f32 %v89_v35, %v33_v32  ;;  %v106_v38 = vadd.f32 %v105_v36, %v37_v33 }
  0xd5   :  { %118 = vst.msk [vmem:[%s263_s3 + $0x8] sm:$0xff] %vm116_vm1, %v90_v37  ;;  %122 = vst.msk [vmem:[%s263_s3 + $0x28] sm:$0xff] %vm116_vm1, %v106_v38 }

// kernel: compute_inbatch_contrastive_loss.63
= control target key start
LH: loop header
LB: loop body
LE: loop exit
PB: predicated region body
PF: predicated region fallthrough
CT: control target
= control target key end

     0   :  { %vm29_vm0 = vcmask 130048   ;;  %vm48_vm1 = vcmask 125952   ;;  %vm185_vm2 = vcmask 261120   ;;  %vm192_vm3 = vcmask 257024   ;;  %s356_s0 = inlined_call_operand.vmem [shape: f32[52,16], index: 0, kind: input, shape index: {}]   ;;  %s357_s1 = inlined_call_operand.vmem [shape: f32[16,32], index: 1, kind: input, shape index: {}]   ;;  %s358_s2 = inlined_call_operand.vmem [shape: f32[1,16], index: 2, kind: input, shape index: {}]   ;;  %s359_s3 = inlined_call_operand.vmem [shape: f32[52,32], index: 3, kind: output, shape index: {}]  }
   0x1   :  { %v257_v0 = vld [vmem:[%s356_s0 + $0x20] sm:$0xff]  ;;  %v267_v2 = vld [vmem:[%s356_s0 + $0x28] sm:$0xff]  ;;  %v285_v8 = vld [vmem:[%s356_s0 + $0x18] sm:$0xff] }
   0x2   :  { %v262_v1 = vld [vmem:[%s356_s0] sm:$0xff]  ;;  %v26_v3 = vmul.f32 %v257_v0, %v257_v0  ;;  %v27_v5 = vmul.f32 %v267_v2, %v267_v2  ;;  %v278_v6 = vld [vmem:[%s356_s0 + $0x8] sm:$0xff]  ;;  %v290_v9 = vld [vmem:[%s356_s0 + $0x10] sm:$0xff]  ;;  %v25_v14 = vmul.f32 %v285_v8, %v285_v8 }
   0x3   :  { %v22_v4 = vmul.f32 %v262_v1, %v262_v1  ;;  %v23_v7 = vmul.f32 %v278_v6, %v278_v6  ;;  %v24_v15 = vmul.f32 %v290_v9, %v290_v9  ;;  %v303_v16 = vld [vmem:[%s356_s0 + $0x30] sm:$0xf]  ;;  %v99_v21 = vld [vmem:[%s357_s1] sm:$0xff]  ;;  %v100_v22 = vld [vmem:[%s357_s1 + $0x8] sm:$0xff] }
   0x4   :  { %v42_v10 = vsel %vm29_vm0, %v26_v3, 0.0  ;;  %v45_v12 = vsel %vm29_vm0, %v27_v5, 0.0  ;;  %v39_v17 = vsel %vm29_vm0, %v25_v14, 0.0  ;;  %v28_v19 = vmul.f32 %v303_v16, %v303_v16  ;;  %v198_v50 = vld [vmem:[%s358_s2] ss:$0 sm:$0xff] }
   0x5   :  { %v30_v11 = vsel %vm29_vm0, %v22_v4, 0.0  ;;  %43 = vadd.xlane.f32.xlu1 %v42_v10  ;;  %v33_v13 = vsel %vm29_vm0, %v23_v7, 0.0  ;;  %v36_v18 = vsel %vm29_vm0, %v24_v15, 0.0  ;;  %v101_v23 = vpack.c.bf16 %v100_v22, %v99_v21 }
   0x6   :  { %31 = vadd.xlane.f32.xlu0 %v30_v11  ;;  %v49_v20 = vsel %vm48_vm1, %v28_v19, 0.0 }
   0x7   :  { %208 = vmatprep.subr.bf16.mxu0 %v101_v23  ;;  %218 = vmatprep.subr.bf16.mxu1 %v101_v23 }
   0x8   :  { %209 = vmatpush3.bf16.msra.mxu0 %v101_v23  ;;  %219 = vmatpush3.bf16.msra.mxu1 %v101_v23 }
   0x9   :  { %46 = vadd.xlane.f32.xlu1 %v45_v12 }
   0xa   :  { %34 = vadd.xlane.f32.xlu0 %v33_v13 }
   0xd   :  { %40 = vadd.xlane.f32.xlu1 %v39_v17 }
   0xe   :  { %37 = vadd.xlane.f32.xlu0 %v36_v18 }
  0x12   :  { %50 = vadd.xlane.f32.xlu0 %v49_v20 }
  0x8e   :  { %v44_v24 = vpop.xlane.xlu1 %43 }
  0x8f   :  { %v32_v25 = vpop.xlane.xlu0 %31  ;;  %v57_v26 = vmul.f32 0.0625, %v44_v24 }
  0x90   :  { %v53_v27 = vmul.f32 0.0625, %v32_v25 }
  0x91   :  { %v64_v28 = vadd.f32 1e-06, %v57_v26 }
  0x92   :  { %v60_v29 = vadd.f32 1e-06, %v53_v27  ;;  %v47_v30 = vpop.xlane.xlu1 %46 }
  0x93   :  { %v35_v31 = vpop.xlane.xlu0 %34  ;;  %220 = vrsqrt.f32 %v64_v28  ;;  %v58_v32 = vmul.f32 0.0625, %v47_v30 }
  0x94   :  { %v54_v33 = vmul.f32 0.0625, %v35_v31  ;;  %222 = vrsqrt.f32 %v60_v29 }
  0x95   :  { %v65_v34 = vadd.f32 1e-06, %v58_v32 }
  0x96   :  { %v61_v35 = vadd.f32 1e-06, %v54_v33  ;;  %v41_v36 = vpop.xlane.xlu1 %40 }
  0x97   :  { %v38_v37 = vpop.xlane.xlu0 %37  ;;  %224 = vrsqrt.f32 %v65_v34  ;;  %v56_v38 = vmul.f32 0.0625, %v41_v36 }
  0x98   :  { %v55_v39 = vmul.f32 0.0625, %v38_v37  ;;  %226 = vrsqrt.f32 %v61_v35 }
  0x99   :  { %v63_v40 = vadd.f32 1e-06, %v56_v38 }
  0x9a   :  { %v62_v41 = vadd.f32 1e-06, %v55_v39 }
  0x9b   :  { %v51_v42 = vpop.xlane.xlu0 %50  ;;  %228 = vrsqrt.f32 %v63_v40 }
  0x9c   :  { %v59_v43 = vmul.f32 0.0625, %v51_v42  ;;  %230 = vrsqrt.f32 %v62_v41 }
  0x9e   :  { %v66_v44 = vadd.f32 1e-06, %v59_v43 }
  0xa0   :  { %232 = vrsqrt.f32 %v66_v44  ;;  %v221_v45 = vpop.eup %220 }
  0xa1   :  { %v223_v46 = vpop.eup %222  ;;  %v78_v47 = vmul.f32 %v221_v45, %v257_v0 }
  0xa2   :  { %v74_v49 = vmul.f32 %v223_v46, %v262_v1 }
  0xa3   :  { %v92_v53 = vmul.f32 %v198_v50, %v78_v47 }
  0xa4   :  { %v225_v48 = vpop.eup %224  ;;  %v88_v57 = vmul.f32 %v198_v50, %v74_v49 }
  0xa5   :  { %v227_v51 = vpop.eup %226  ;;  %v79_v52 = vmul.f32 %v225_v48, %v267_v2 }
  0xa6   :  { %v75_v54 = vmul.f32 %v227_v51, %v278_v6 }
  0xa7   :  { %v93_v55 = vmul.f32 %v198_v50, %v79_v52 }
  0xa8   :  { %v229_v56 = vpop.eup %228  ;;  %v89_v58 = vmul.f32 %v198_v50, %v75_v54 }
  0xa9   :  { %v231_v59 = vpop.eup %230  ;;  %v97_v60 = vpack.c.bf16 %v93_v55, %v92_v53  ;;  %v77_v61 = vmul.f32 %v229_v56, %v285_v8 }
  0xaa   :  { %v95_v62 = vpack.c.bf16 %v89_v58, %v88_v57  ;;  %v76_v63 = vmul.f32 %v231_v59, %v290_v9 }
  0xab   :  { %214 = vmatprep.mubr.msk.bf16.mxu1 %vm29_vm0, %v97_v60  ;;  %v91_v0 = vmul.f32 %v198_v50, %v77_v61 }
  0xac   :  { %210 = vmatprep.mubr.msk.bf16.mxu0 %vm29_vm0, %v95_v62  ;;  %v90_v2 = vmul.f32 %v198_v50, %v76_v63 }
  0xad   :  { %v233_v1 = vpop.eup %232 }
  0xae   :  { %v80_v3 = vmul.f32 %v233_v1, %v303_v16  ;;  %v96_v4 = vpack.c.bf16 %v91_v0, %v90_v2 }
  0xb0   :  { %v94_v5 = vmul.f32 %v198_v50, %v80_v3  ;;  %211 = vmatmul.mubr.msk.bf16.vlgmr.msra.gmra.mxu0 %vm29_vm0, %v96_v4 }
  0xb2   :  { %v98_v6 = vpack.c.bf16 %v94_v5, %v94_v5 }
  0xb4   :  { %215 = vmatmul.mubr.msk.bf16.vlgmr.msra.gmra.mxu1 %vm29_vm0, %v98_v6 }
 0x170   :  { %v212_v7 = vpop.f32.mrf.mxu0 }
 0x171   :  { %v180_v8 = vmax.f32 %v212_v7, 0.0 }
 0x172   :  { %v148_v9 = vpop.f32.mrf.mxu0 }
 0x173   :  { %188 = vst.msk [vmem:[%s359_s3 + $0x10] sm:$0xff] %vm185_vm2, %v180_v8  ;;  %v178_v10 = vmax.f32 %v148_v9, 0.0 }
 0x174   :  { %v216_v11 = vpop.f32.mrf.mxu1  ;;  %v213_v12 = vpop.f32.mrf.mxu0 }
 0x175   :  { %v184_v13 = vmax.f32 %v216_v11, 0.0  ;;  %186 = vst.msk [vmem:[%s359_s3] sm:$0xff] %vm185_vm2, %v178_v10  ;;  %v181_v14 = vmax.f32 %v213_v12, 0.0 }
 0x176   :  { %v164_v15 = vpop.f32.mrf.mxu1  ;;  %v151_v16 = vpop.f32.mrf.mxu0 }
 0x177   :  { %193 = vst.msk [vmem:[%s359_s3 + $0x30] sm:$0xf] %vm192_vm3, %v184_v13  ;;  %v182_v17 = vmax.f32 %v164_v15, 0.0  ;;  %v179_v18 = vmax.f32 %v151_v16, 0.0 }
 0x178   :  { %189 = vst.msk [vmem:[%s359_s3 + $0x18] sm:$0xff] %vm185_vm2, %v181_v14  ;;  %v217_v19 = vpop.f32.mrf.mxu1 }
 0x179   :  { %190 = vst.msk [vmem:[%s359_s3 + $0x20] sm:$0xff] %vm185_vm2, %v182_v17  ;;  %187 = vst.msk [vmem:[%s359_s3 + $0x8] sm:$0xff] %vm185_vm2, %v179_v18 }
 0x17a   :  { %v167_v20 = vpop.f32.mrf.mxu1 }
 0x17b   :  { %v183_v21 = vmax.f32 %v167_v20, 0.0 }
 0x17d   :  { %191 = vst.msk [vmem:[%s359_s3 + $0x28] sm:$0xff] %vm185_vm2, %v183_v21 }

// kernel: compute_inbatch_contrastive_loss.61
= control target key start
LH: loop header
LB: loop body
LE: loop exit
PB: predicated region body
PF: predicated region fallthrough
CT: control target
= control target key end

     0   :  { %s936_s9 = smov 0   ;;  %s1064_s0 = inlined_call_operand.vmem [shape: f32[4,13,96], index: 0, kind: input, shape index: {}]   ;;  %s1065_s1 = inlined_call_operand.vmem [shape: f32[4,13,13], index: 1, kind: input, shape index: {}]   ;;  %s1066_s2 = inlined_call_operand.vmem [shape: f32[4,13,32], index: 2, kind: output, shape index: {}]  }
   0x1 LB: > { %s748_s10 = sadd.s32 4294967295, %s902_s9   ;;  %p752_p0 = scmp.ge.s32.totalorder %s902_s9, 1  ;;  %s902_s9 = sphi %s936_s9, %s12_s9  }
   0x2   : > { %p112_p1 = scmp.lt.s32.totalorder %s902_s9, 5 }
   0x4   : > { %p113_p2 = pnand %p752_p0, %p112_p1 }
   0x5   : > { %p134_p3 = scmp.lt.s32.totalorder (!%p113_p2), %s748_s10, 3  ;;  %s906_s15 = smov (!%p113_p2), 96  }
   0x6   : > { %116 = sbr.rel (%p113_p2) target bundleno = 1504 (0x5e0), region = 28  ;;  %s907_s20 = smov (!%p113_p2), 64  }
   0x7   : > { %s908_s21 = smov (!%p113_p2), 80   ;;  %s910_s22 = smov (!%p113_p2), 88  }
   0x8   : > { %s911_s23 = smov (!%p113_p2), 120   ;;  %s912_s24 = smov (!%p113_p2), 112  }
   0x9   : > { %s913_s25 = smov (!%p113_p2), 72   ;;  %s914_s26 = smov (!%p113_p2), 104  }
   0xa   : > { %s917_s16 = smov (!%p113_p2), 48   ;;  %s918_s17 = smov (!%p113_p2), 8  }
   0xb   : > { %v904_v0 = vmov 0.0   ;;  %vm905_vm0 = vmmov 0   ;;  %s1068_s10 = smov (!%p134_p3, %s748_s10), 3  ;;  %vm153_vm1 = vcmask 64512   ;;  %v148_v6 = vld [vmem:[%s1065_s1] sm:$0xff]  ;;  %vm201_vm2 = vcmask 105472  }
   0xc   : > { %791 = vmatprep.subr.bf16.mxu0 %v904_v0  ;;  %793 = vmatprep.mubr.msk.bf16.mxu0 %vm905_vm0, %v904_v0  ;;  %s773_s11 = sshll.u32 %s1068_s10, 4  ;;  %v149_v10 = vld [vmem:[%s1065_s1 + $0x8] sm:$0x1f]  ;;  %vm205_vm3 = vcmask 102400   ;;  %vm231_vm4 = vcmask 1045504   ;;  %vm232_vm5 = vcmask 1046528  }
   0xd   : > { %797 = vmatprep.subr.bf16.mxu1 %v904_v0  ;;  %799 = vmatprep.mubr.msk.bf16.mxu1 %vm905_vm0, %v904_v0  ;;  %s138_s14 = scalar_lea.vmem %s1064_s0, %s773_s11  ;;  %v909_v19 = vmov 65535   ;;  %v759_v51 = vld [vmem:[%s1065_s1 + $0x10] sm:$0xff]  ;;  %v760_v55 = vld [vmem:[%s1065_s1 + $0x18] sm:$0x1f]  ;;  %v763_v60 = vld [vmem:[%s1065_s1 + $0x20] sm:$0xff]  ;;  %s919_s18 = smov 16  }
   0xe   : > { %v145_v1 = vld [vmem:[%s138_s14] sm:$0xff]  ;;  %v146_v2 = vld [vmem:[%s138_s14 + $0x8] sm:$0x1f]  ;;  %v233_v20 = vsel %vm231_vm4, 4294967295, %v909_v19  ;;  %s915_s14 = smov 56   ;;  %s920_s19 = smov 24  }
   0xf   : > { %v958_v3 = vpack.c.bf16 %v146_v2, %v145_v1  ;;  %v977_v23 = vsel %vm232_vm5, %v233_v20, 0  ;;  %v764_v2 = vld [vmem:[%s1065_s1 + $0x28] sm:$0x1f]  ;;  %vm683_vm6 = vcmask 130048   ;;  %vm686_vm7 = vcmask 195584  }
  0x10   : > { %vm689_vm8 = vcmask 261120   ;;  %vm691_vm9 = vcmask 258048  }
  0x11   : > { %151 = vrot.lane.b32.xlu0 %v958_v3, %s906_s15  ;;  %s916_s15 = smov 40  }
  0x83   : > { %v152_v4 = vpop.permute.xlu0 %151 }
  0x84   : > { %v158_v5 = vsel %vm153_vm1, %v152_v4, 0 }
  0x85   : > { %792 = vmatpush3.bf16.xpose.msra.mxu0 %v158_v5 }
  0x86   : > { %809 = vmatprep.subr.bf16.mxu0 %v904_v0 }
  0x8c   : > { %794 = vmatmul.mubr.msk.bf16.vlgmr.msra.gmra.mxu0 %vm153_vm1, %v958_v3 }
  0x8d   : > { %811 = vmatprep.mubr.msk.bf16.mxu0 %vm905_vm0, %v904_v0 }
 0x14c   : > { %v194_v7 = vpop.f32.mrf.mxu0 }
 0x14d   : > { %v195_v8 = vadd.f32 %v194_v7, %v148_v6 }
 0x14e   : > { %v795_v9 = vpop.f32.mrf.mxu0 }
 0x14f   : > { %v202_v11 = vsel %vm201_vm2, %v195_v8, -inf }
 0x150   : > { %203 = vmax.xlane.f32.xlu0 %v202_v11  ;;  %v197_v12 = vpop.f32.mrf.mxu0 }
 0x151   : > { %v198_v13 = vadd.f32 %v197_v12, %v149_v10 }
 0x152   : > { %v796_v14 = vpop.f32.mrf.mxu0 }
 0x153   : > { %v206_v15 = vsel %vm205_vm3, %v198_v13, -inf }
 0x154   : > { %207 = vmax.xlane.f32.xlu1 %v206_v15 }
 0x165   : > { %226 = vrot.lane.b32.xlu1 %v958_v3, %s907_s20 }
 0x166   : > { %410 = vrot.lane.b32.xlu0 %v958_v3, %s908_s21 }
 0x1d9   : > { %v204_v16 = vpop.xlane.xlu0 %203 }
 0x1da   : > { %v209_v17 = vsub.f32 %v195_v8, %v204_v16  ;;  %v767_v8 = vld [vmem:[%s1065_s1 + $0x30] sm:$0xff] }
 0x1dc   : > { %v211_v18 = vmul.f32 1.442695, %v209_v17 }
 0x1dd   : > { %v208_v21 = vpop.xlane.xlu1 %207  ;;  %v411_v41 = vpop.permute.xlu0 %410 }
 0x1de   : > { %864 = vpow2.f32 %v211_v18  ;;  %v210_v22 = vsub.f32 %v198_v13, %v208_v21  ;;  %v416_v43 = vsel %vm153_vm1, %v411_v41, 0  ;;  %v768_v13 = vld [vmem:[%s1065_s1 + $0x38] sm:$0x1f] }
 0x1e0   : > { %v213_v24 = vmul.f32 1.442695, %v210_v22 }
 0x1e1   : > { %v227_v25 = vpop.permute.xlu1 %226 }
 0x1e2   : > { %866 = vpow2.f32 %v213_v24  ;;  %v236_v26 = vand.u32 %v977_v23, %v227_v25 }
 0x1e4   : > { %798 = vmatpush3.bf16.msra.mxu1 %v236_v26 }
 0x1e5   : > { %803 = vmatprep.subr.bf16.mxu1 %v904_v0 }
 0x1eb   : > { %v865_v27 = vpop.eup %864 }
 0x1ec   : > { %v215_v28 = vsel %vm201_vm2, %v865_v27, 0.0 }
 0x1ed   : > { %216 = vadd.xlane.f32.xlu1 %v215_v28 }
 0x1ef   : > { %v867_v29 = vpop.eup %866 }
 0x1f0   : > { %v218_v30 = vsel %vm205_vm3, %v867_v29, 0.0 }
 0x1f1   : > { %219 = vadd.xlane.f32.xlu1 %v218_v30 }
 0x202   : > { %284 = vrot.lane.b32.xlu1 %v958_v3, %s910_s22  ;;  %s143_s22 = scalar_lea.vmem %s1066_s2, %s773_s11 }
 0x206   : > { %282 = vrot.lane.b32.xlu1 %v958_v3, %s911_s23 }
 0x20a   : > { %408 = vrot.lane.b32.xlu1 %v958_v3, %s912_s24 }
 0x20e   : > { %536 = vrot.lane.b32.xlu1 %v958_v3, %s913_s25 }
 0x212   : > { %534 = vrot.lane.b32.xlu1 %v958_v3, %s914_s26 }
 0x276   : > { %v217_v31 = vpop.xlane.xlu1 %216 }
 0x277   : > { %868 = vrcp.f32 %v217_v31 }
 0x27a   : > { %v220_v32 = vpop.xlane.xlu1 %219 }
 0x27b   : > { %870 = vrcp.f32 %v220_v32 }
 0x27e   : > { %v285_v35 = vpop.permute.xlu1 %284 }
 0x27f   : > { %v290_v38 = vsel %vm153_vm1, %v285_v35, 0 }
 0x282   : > { %v283_v40 = vpop.permute.xlu1 %282 }
 0x284   : > { %v869_v33 = vpop.eup %868 }
 0x285   : > { %v223_v36 = vmul.f32 %v869_v33, %v865_v27 }
 0x286   : > { %v409_v42 = vpop.permute.xlu1 %408 }
 0x288   : > { %v871_v34 = vpop.eup %870 }
 0x289   : > { %v224_v37 = vmul.f32 %v871_v34, %v867_v29 }
 0x28a   : > { %v537_v44 = vpop.permute.xlu1 %536 }
 0x28b   : > { %v225_v39 = vpack.c.bf16 %v224_v37, %v223_v36  ;;  %v542_v45 = vsel %vm153_vm1, %v537_v44, 0 }
 0x28d   : > { %800 = vmatmul.mubr.msk.bf16.vlgmr.msra.gmra.mxu1 %vm201_vm2, %v225_v39 }
 0x28e   : > { %804 = vmatpush3.bf16.xpose.msra.mxu1 %v290_v38  ;;  %805 = vmatprep.mubr.msk.bf16.mxu1 %vm905_vm0, %v904_v0  ;;  %v535_v46 = vpop.permute.xlu1 %534 }
 0x28f   : > { %815 = vmatprep.subr.bf16.mxu1 %v904_v0 }
 0x295   : > { %806 = vmatmul.mubr.msk.bf16.vlgmr.msra.gmra.mxu1 %vm153_vm1, %v283_v40 }
 0x296   : > { %816 = vmatpush3.bf16.xpose.msra.mxu1 %v416_v43  ;;  %817 = vmatprep.mubr.msk.bf16.mxu1 %vm905_vm0, %v904_v0 }
 0x297   : > { %827 = vmatprep.subr.bf16.mxu1 %v904_v0 }
 0x29d   : > { %818 = vmatmul.mubr.msk.bf16.vlgmr.msra.gmra.mxu1 %vm153_vm1, %v409_v42 }
 0x29e   : > { %828 = vmatpush3.bf16.xpose.msra.mxu1 %v542_v45  ;;  %829 = vmatprep.mubr.msk.bf16.mxu1 %vm905_vm0, %v904_v0 }
 0x2a5   : > { %830 = vmatmul.mubr.msk.bf16.vlgmr.msra.gmra.mxu1 %vm153_vm1, %v535_v46 }
 0x34d   : > { %v1003_v47 = vpop.f32.mrf.mxu1 }
 0x34f   : > { %v801_v48 = vpop.f32.mrf.mxu1 }
 0x351   : > { %v1005_v49 = vpop.f32.mrf.mxu1 }
 0x353   : > { %v802_v50 = vpop.f32.mrf.mxu1 }
 0x355   : > { %v326_v52 = vpop.f32.mrf.mxu1 }
 0x356   : > { %v327_v53 = vadd.f32 %v759_v51, %v326_v52 }
 0x357   : > { %v807_v54 = vpop.f32.mrf.mxu1 }
 0x358   : > { %v333_v56 = vsel %vm201_vm2, %v327_v53, -inf }
 0x359   : > { %334 = vmax.xlane.f32.xlu1 %v333_v56  ;;  %v329_v57 = vpop.f32.mrf.mxu1 }
 0x35a   : > { %v330_v58 = vadd.f32 %v760_v55, %v329_v57 }
 0x35b   : > { %v808_v59 = vpop.f32.mrf.mxu1 }
 0x35c   : > { %v336_v61 = vsel %vm205_vm3, %v330_v58, -inf }
 0x35d   : > { %337 = vmax.xlane.f32.xlu0 %v336_v61  ;;  %v452_v62 = vpop.f32.mrf.mxu1 }
 0x35e   : > { %v453_v63 = vadd.f32 %v763_v60, %v452_v62 }
 0x35f   : > { %v819_v1 = vpop.f32.mrf.mxu1 }
 0x360   : > { %v459_v4 = vsel %vm201_vm2, %v453_v63, -inf }
 0x361   : > { %460 = vmax.xlane.f32.xlu1 %v459_v4  ;;  %v455_v5 = vpop.f32.mrf.mxu1 }
 0x362   : > { %v456_v6 = vadd.f32 %v764_v2, %v455_v5 }
 0x363   : > { %v820_v7 = vpop.f32.mrf.mxu1 }
 0x364   : > { %v462_v9 = vsel %vm205_vm3, %v456_v6, -inf }
 0x365   : > { %463 = vmax.xlane.f32.xlu0 %v462_v9  ;;  %v578_v10 = vpop.f32.mrf.mxu1 }
 0x366   : > { %v579_v11 = vadd.f32 %v767_v8, %v578_v10 }
 0x367   : > { %v831_v12 = vpop.f32.mrf.mxu1 }
 0x368   : > { %v585_v14 = vsel %vm201_vm2, %v579_v11, -inf }
 0x369   : > { %586 = vmax.xlane.f32.xlu1 %v585_v14  ;;  %v581_v15 = vpop.f32.mrf.mxu1 }
 0x36a   : > { %v582_v16 = vadd.f32 %v768_v13, %v581_v15 }
 0x36b   : > { %v832_v17 = vpop.f32.mrf.mxu1 }
 0x36c   : > { %v588_v18 = vsel %vm205_vm3, %v582_v16, -inf }
 0x36d   : > { %589 = vmax.xlane.f32.xlu0 %v588_v18 }
 0x37a   : > { %356 = vrot.lane.b32.xlu1 %v958_v3, %s915_s14 }
 0x3e2   : > { %v335_v19 = vpop.xlane.xlu1 %334 }
 0x3e3   : > { %v339_v20 = vsub.f32 %v327_v53, %v335_v19 }
 0x3e5   : > { %v341_v21 = vmul.f32 1.442695, %v339_v20 }
 0x3e6   : > { %v338_v22 = vpop.xlane.xlu0 %337 }
 0x3e7   : > { %872 = vpow2.f32 %v341_v21  ;;  %v340_v24 = vsub.f32 %v330_v58, %v338_v22 }
 0x3e9   : > { %v343_v25 = vmul.f32 1.442695, %v340_v24 }
 0x3ea   : > { %v461_v26 = vpop.xlane.xlu1 %460 }
 0x3eb   : > { %874 = vpow2.f32 %v343_v25  ;;  %v465_v27 = vsub.f32 %v453_v63, %v461_v26 }
 0x3ed   : > { %v467_v28 = vmul.f32 1.442695, %v465_v27 }
 0x3ee   : > { %v464_v29 = vpop.xlane.xlu0 %463 }
 0x3ef   : > { %876 = vpow2.f32 %v467_v28  ;;  %v466_v30 = vsub.f32 %v456_v6, %v464_v29 }
 0x3f1   : > { %v469_v31 = vmul.f32 1.442695, %v466_v30 }
 0x3f2   : > { %v587_v32 = vpop.xlane.xlu1 %586 }
 0x3f3   : > { %878 = vpow2.f32 %v469_v31  ;;  %v591_v33 = vsub.f32 %v579_v11, %v587_v32 }
 0x3f4   : > { %v873_v34 = vpop.eup %872 }
 0x3f5   : > { %v593_v35 = vmul.f32 1.442695, %v591_v33  ;;  %v345_v36 = vsel %vm201_vm2, %v873_v34, 0.0 }
 0x3f6   : > { %v590_v37 = vpop.xlane.xlu0 %589  ;;  %346 = vadd.xlane.f32.xlu1 %v345_v36  ;;  %v357_v38 = vpop.permute.xlu1 %356 }
 0x3f7   : > { %880 = vpow2.f32 %v593_v35  ;;  %v592_v39 = vsub.f32 %v582_v16, %v590_v37  ;;  %v362_v40 = vand.u32 %v357_v38, %v977_v23 }
 0x3f8   : > { %v875_v41 = vpop.eup %874 }
 0x3f9   : > { %v595_v42 = vmul.f32 1.442695, %v592_v39  ;;  %v348_v43 = vsel %vm205_vm3, %v875_v41, 0.0  ;;  %810 = vmatpush3.bf16.msra.mxu0 %v362_v40 }
 0x3fa   : > { %349 = vadd.xlane.f32.xlu0 %v348_v43  ;;  %821 = vmatprep.subr.bf16.mxu0 %v904_v0 }
 0x3fb   : > { %882 = vpow2.f32 %v595_v42 }
 0x3fc   : > { %v877_v44 = vpop.eup %876 }
 0x3fd   : > { %v471_v45 = vsel %vm201_vm2, %v877_v44, 0.0 }
 0x3fe   : > { %472 = vadd.xlane.f32.xlu1 %v471_v45 }
 0x400   : > { %v879_v46 = vpop.eup %878 }
 0x401   : > { %v474_v48 = vsel %vm205_vm3, %v879_v46, 0.0 }
 0x402   : > { %475 = vadd.xlane.f32.xlu0 %v474_v48 }
 0x404   : > { %v881_v50 = vpop.eup %880 }
 0x405   : > { %v597_v51 = vsel %vm201_vm2, %v881_v50, 0.0 }
 0x406   : > { %598 = vadd.xlane.f32.xlu1 %v597_v51 }
 0x408   : > { %v883_v52 = vpop.eup %882 }
 0x409   : > { %v600_v53 = vsel %vm205_vm3, %v883_v52, 0.0 }
 0x40a   : > { %601 = vadd.xlane.f32.xlu0 %v600_v53 }
 0x417   : > { %608 = vrot.lane.b32.xlu1 %v958_v3, %s916_s15 }
 0x420   : > { %482 = vrot.lane.b32.xlu0 %v958_v3, %s917_s16 }
 0x47f   : > { %v347_v54 = vpop.xlane.xlu1 %346 }
 0x480   : > { %884 = vrcp.f32 %v347_v54 }
 0x483   : > { %v350_v55 = vpop.xlane.xlu0 %349 }
 0x484   : > { %886 = vrcp.f32 %v350_v55 }
 0x487   : > { %v473_v56 = vpop.xlane.xlu1 %472 }
 0x488   : > { %888 = vrcp.f32 %v473_v56 }
 0x48b   : > { %v476_v57 = vpop.xlane.xlu0 %475 }
 0x48c   : > { %890 = vrcp.f32 %v476_v57 }
 0x48d   : > { %v885_v58 = vpop.eup %884 }
 0x48e   : > { %v353_v61 = vmul.f32 %v885_v58, %v873_v34 }
 0x48f   : > { %v599_v59 = vpop.xlane.xlu1 %598 }
 0x490   : > { %892 = vrcp.f32 %v599_v59 }
 0x491   : > { %v887_v60 = vpop.eup %886 }
 0x492   : > { %v354_v62 = vmul.f32 %v887_v60, %v875_v41 }
 0x493   : > { %v602_v63 = vpop.xlane.xlu0 %601  ;;  %v609_v5 = vpop.permute.xlu1 %608 }
 0x494   : > { %894 = vrcp.f32 %v602_v63  ;;  %v355_v1 = vpack.c.bf16 %v354_v62, %v353_v61  ;;  %v614_v9 = vand.u32 %v609_v5, %v977_v23 }
 0x495   : > { %v889_v3 = vpop.eup %888 }
 0x496   : > { %812 = vmatmul.mubr.msk.bf16.vlgmr.msra.gmra.mxu0 %vm201_vm2, %v355_v1  ;;  %v479_v7 = vmul.f32 %v889_v3, %v877_v44 }
 0x497   : > { %v483_v2 = vpop.permute.xlu0 %482  ;;  %823 = vmatprep.mubr.msk.bf16.mxu0 %vm905_vm0, %v904_v0 }
 0x498   : > { %v488_v4 = vand.u32 %v483_v2, %v977_v23 }
 0x499   : > { %v891_v6 = vpop.eup %890 }
 0x49a   : > { %822 = vmatpush3.bf16.msra.mxu0 %v488_v4  ;;  %v480_v8 = vmul.f32 %v891_v6, %v879_v46 }
 0x49b   : > { %833 = vmatprep.subr.bf16.mxu0 %v904_v0 }
 0x49c   : > { %v481_v10 = vpack.c.bf16 %v480_v8, %v479_v7 }
 0x49d   : > { %v893_v11 = vpop.eup %892 }
 0x49e   : > { %824 = vmatmul.mubr.msk.bf16.vlgmr.msra.gmra.mxu0 %vm201_vm2, %v481_v10  ;;  %v605_v13 = vmul.f32 %v893_v11, %v881_v50 }
 0x49f   : > { %834 = vmatpush3.bf16.msra.mxu0 %v614_v9  ;;  %835 = vmatprep.mubr.msk.bf16.mxu0 %vm905_vm0, %v904_v0 }
 0x4a1   : > { %v895_v12 = vpop.eup %894 }
 0x4a2   : > { %v606_v14 = vmul.f32 %v895_v12, %v883_v52 }
 0x4a4   : > { %v607_v15 = vpack.c.bf16 %v606_v14, %v605_v13 }
 0x4a6   : > { %836 = vmatmul.mubr.msk.bf16.vlgmr.msra.gmra.mxu0 %vm201_vm2, %v607_v15 }
 0x556   : > { %v398_v16 = vpop.f32.mrf.mxu0 }
 0x557   : > { %659 = vrot.lane.b32.xlu1 %v398_v16, %s918_s17 }
 0x558   : > { %v813_v23 = vpop.f32.mrf.mxu0 }
 0x55a   : > { %v401_v17 = vpop.f32.mrf.mxu0 }
 0x55b   : > { %661 = vrot.lane.b32.xlu0 %v401_v17, %s918_s17 }
 0x55c   : > { %v814_v18 = vpop.f32.mrf.mxu0 }
 0x55e   : > { %v524_v19 = vpop.f32.mrf.mxu0 }
 0x55f   : > { %667 = vrot.lane.b32.xlu1 %v524_v19, %s919_s18 }
 0x560   : > { %v825_v20 = vpop.f32.mrf.mxu0 }
 0x562   : > { %v527_v21 = vpop.f32.mrf.mxu0 }
 0x563   : > { %669 = vrot.lane.b32.xlu0 %v527_v21, %s919_s18 }
 0x564   : > { %v826_v0 = vpop.f32.mrf.mxu0 }
 0x566   : > { %v650_v22 = vpop.f32.mrf.mxu0 }
 0x567   : > { %675 = vrot.lane.b32.xlu1 %v650_v22, %s920_s19 }
 0x568   : > { %v837_v24 = vpop.f32.mrf.mxu0 }
 0x56a   : > { %v653_v25 = vpop.f32.mrf.mxu0 }
 0x56b   : > { %677 = vrot.lane.b32.xlu0 %v653_v25, %s920_s19 }
 0x56c   : > { %v838_v26 = vpop.f32.mrf.mxu0 }
 0x5c9   : > { %v660_v27 = vpop.permute.xlu1 %659 }
 0x5ca   : > { %v681_v30 = vsel %vm153_vm1, %v1003_v47, %v660_v27 }
 0x5cd   : > { %v662_v28 = vpop.permute.xlu0 %661 }
 0x5ce   : > { %v682_v35 = vsel %vm153_vm1, %v1005_v49, %v662_v28 }
 0x5d1   : > { %v668_v29 = vpop.permute.xlu1 %667 }
 0x5d2   : > { %v684_v31 = vsel %vm683_vm6, %v681_v30, %v668_v29 }
 0x5d5   : > { %v670_v32 = vpop.permute.xlu0 %669 }
 0x5d6   : > { %v685_v36 = vsel %vm683_vm6, %v682_v35, %v670_v32 }
 0x5d9   : > { %v676_v33 = vpop.permute.xlu1 %675 }
 0x5da   : > { %v687_v34 = vsel %vm686_vm7, %v684_v31, %v676_v33 }
 0x5db   : > { %690 = vst.msk [vmem:[%s143_s22] sm:$0xff] %vm689_vm8, %v687_v34 }
 0x5dd   : > { %v678_v37 = vpop.permute.xlu0 %677 }
 0x5de   : > { %v688_v38 = vsel %vm686_vm7, %v685_v36, %v678_v37 }
 0x5df   : > { %692 = vst.msk [vmem:[%s143_s22 + $0x8] sm:$0x1f] %vm691_vm9, %v688_v38 }
 0x5e0 PF: > { %s12_s9 = sadd.s32 1, %s902_s9  }
 0x5e1   : > { %p9_p4 = scmp.ge.s32.totalorder %s12_s9, 6  }
 0x5e3   :  { %11 = sbr.rel (!%p9_p4) target bundleno = 1 (0x1), region = 61 }

// kernel: compute_inbatch_contrastive_loss.70
= control target key start
LH: loop header
LB: loop body
LE: loop exit
PB: predicated region body
PF: predicated region fallthrough
CT: control target
= control target key end

     0   :  { %vm27_vm0 = vcmask 130048   ;;  %vm31_vm1 = vcmask 126976   ;;  %vm146_vm2 = vcmask 1041409   ;;  %vm148_vm3 = vcmask 1042434   ;;  %s277_s0 = inlined_call_operand.vmem [shape: f32[4,13,16], index: 0, kind: input, shape index: {}]   ;;  %s278_s1 = inlined_call_operand.vmem [shape: f32[1,1,16], index: 1, kind: input, shape index: {}]   ;;  %s279_s2 = inlined_call_operand.vmem [shape: f32[4,16], index: 2, kind: output, shape index: {}]  }
   0x1   :  { %v194_v0 = vld [vmem:[%s277_s0 + $0x10] sm:$0xff]  ;;  %v199_v1 = vld [vmem:[%s277_s0] sm:$0xff]  ;;  %v204_v2 = vld [vmem:[%s277_s0 + $0x18] sm:$0x1f]  ;;  %vm150_vm4 = vcmask 1043459   ;;  %vm153_vm5 = vcmask 125952  }
   0x2   :  { %v21_v3 = vmul.f32 %v194_v0, %v194_v0  ;;  %v19_v4 = vmul.f32 %v199_v1, %v199_v1  ;;  %v22_v5 = vmul.f32 %v204_v2, %v204_v2  ;;  %v215_v6 = vld [vmem:[%s277_s0 + $0x8] sm:$0x1f]  ;;  %v227_v9 = vld [vmem:[%s277_s0 + $0x20] sm:$0xff]  ;;  %v240_v16 = vld [vmem:[%s277_s0 + $0x38] sm:$0x1f] }
   0x3   :  { %v20_v7 = vmul.f32 %v215_v6, %v215_v6  ;;  %v222_v8 = vld [vmem:[%s277_s0 + $0x28] sm:$0x1f]  ;;  %v23_v15 = vmul.f32 %v227_v9, %v227_v9  ;;  %v245_v17 = vld [vmem:[%s277_s0 + $0x30] sm:$0xff]  ;;  %v26_v20 = vmul.f32 %v240_v16, %v240_v16  ;;  %v159_v51 = vld [vmem:[%s278_s1] ss:$0 sm:$0xff] }
   0x4   :  { %v35_v10 = vsel %vm27_vm0, %v21_v3, 0.0  ;;  %v28_v11 = vsel %vm27_vm0, %v19_v4, 0.0  ;;  %v38_v12 = vsel %vm31_vm1, %v22_v5, 0.0  ;;  %v24_v14 = vmul.f32 %v222_v8, %v222_v8 }
   0x5   :  { %36 = vadd.xlane.f32.xlu1 %v35_v10  ;;  %29 = vadd.xlane.f32.xlu0 %v28_v11  ;;  %v32_v13 = vsel %vm31_vm1, %v20_v7, 0.0  ;;  %v41_v19 = vsel %vm27_vm0, %v23_v15, 0.0  ;;  %v25_v21 = vmul.f32 %v245_v17, %v245_v17  ;;  %v50_v22 = vsel %vm31_vm1, %v26_v20, 0.0 }
   0x6   :  { %v44_v18 = vsel %vm31_vm1, %v24_v14, 0.0 }
   0x7   :  { %v47_v23 = vsel %vm27_vm0, %v25_v21, 0.0 }
   0x9   :  { %39 = vadd.xlane.f32.xlu1 %v38_v12  ;;  %33 = vadd.xlane.f32.xlu0 %v32_v13 }
   0xd   :  { %45 = vadd.xlane.f32.xlu1 %v44_v18  ;;  %42 = vadd.xlane.f32.xlu0 %v41_v19 }
  0x11   :  { %51 = vadd.xlane.f32.xlu1 %v50_v22  ;;  %48 = vadd.xlane.f32.xlu0 %v47_v23 }
  0x8e   :  { %v37_v24 = vpop.xlane.xlu1 %36  ;;  %v30_v25 = vpop.xlane.xlu0 %29 }
  0x8f   :  { %v56_v26 = vmul.f32 0.0625, %v37_v24  ;;  %v54_v27 = vmul.f32 0.0625, %v30_v25 }
  0x91   :  { %v64_v28 = vadd.f32 1e-06, %v56_v26  ;;  %v62_v29 = vadd.f32 1e-06, %v54_v27 }
  0x92   :  { %v40_v30 = vpop.xlane.xlu1 %39  ;;  %v34_v31 = vpop.xlane.xlu0 %33 }
  0x93   :  { %160 = vrsqrt.f32 %v64_v28  ;;  %v57_v32 = vmul.f32 0.0625, %v40_v30  ;;  %v55_v33 = vmul.f32 0.0625, %v34_v31 }
  0x94   :  { %162 = vrsqrt.f32 %v62_v29 }
  0x95   :  { %v65_v34 = vadd.f32 1e-06, %v57_v32  ;;  %v63_v35 = vadd.f32 1e-06, %v55_v33 }
  0x96   :  { %v46_v36 = vpop.xlane.xlu1 %45  ;;  %v43_v37 = vpop.xlane.xlu0 %42 }
  0x97   :  { %164 = vrsqrt.f32 %v65_v34  ;;  %v59_v38 = vmul.f32 0.0625, %v46_v36  ;;  %v58_v39 = vmul.f32 0.0625, %v43_v37 }
  0x98   :  { %166 = vrsqrt.f32 %v63_v35 }
  0x99   :  { %v67_v40 = vadd.f32 1e-06, %v59_v38  ;;  %v66_v41 = vadd.f32 1e-06, %v58_v39 }
  0x9a   :  { %v52_v42 = vpop.xlane.xlu1 %51  ;;  %v49_v43 = vpop.xlane.xlu0 %48 }
  0x9b   :  { %168 = vrsqrt.f32 %v67_v40  ;;  %v61_v44 = vmul.f32 0.0625, %v52_v42  ;;  %v60_v45 = vmul.f32 0.0625, %v49_v43 }
  0x9c   :  { %170 = vrsqrt.f32 %v66_v41 }
  0x9d   :  { %v69_v46 = vadd.f32 1e-06, %v61_v44  ;;  %v68_v47 = vadd.f32 1e-06, %v60_v45 }
  0x9f   :  { %172 = vrsqrt.f32 %v69_v46 }
  0xa0   :  { %v161_v48 = vpop.eup %160  ;;  %174 = vrsqrt.f32 %v68_v47 }
  0xa1   :  { %v163_v49 = vpop.eup %162  ;;  %v80_v50 = vmul.f32 %v161_v48, %v194_v0 }
  0xa2   :  { %v78_v52 = vmul.f32 %v163_v49, %v199_v1 }
  0xa3   :  { %v95_v55 = vmul.f32 %v159_v51, %v80_v50 }
  0xa4   :  { %v165_v53 = vpop.eup %164  ;;  %v93_v57 = vmul.f32 %v159_v51, %v78_v52 }
  0xa5   :  { %v167_v54 = vpop.eup %166  ;;  %v81_v56 = vmul.f32 %v165_v53, %v204_v2  ;;  %v110_v63 = vsel %vm27_vm0, %v95_v55, 0.0 }
  0xa6   :  { %v79_v58 = vmul.f32 %v167_v54, %v215_v6  ;;  %v101_v1 = vsel %vm27_vm0, %v93_v57, 0.0 }
  0xa7   :  { %v96_v59 = vmul.f32 %v159_v51, %v81_v56 }
  0xa8   :  { %v169_v60 = vpop.eup %168  ;;  %v94_v61 = vmul.f32 %v159_v51, %v79_v58 }
  0xa9   :  { %v171_v62 = vpop.eup %170  ;;  %v111_v0 = vsel %vm31_vm1, %v96_v59, 0.0  ;;  %v83_v3 = vmul.f32 %v169_v60, %v222_v8 }
  0xaa   :  { %v112_v4 = vadd.f32 %v111_v0, %v110_v63  ;;  %v102_v5 = vsel %vm31_vm1, %v94_v61, 0.0  ;;  %v82_v2 = vmul.f32 %v171_v62, %v227_v9 }
  0xab   :  { %v103_v7 = vadd.f32 %v102_v5, %v101_v1  ;;  %v98_v10 = vmul.f32 %v159_v51, %v83_v3 }
  0xac   :  { %v173_v6 = vpop.eup %172  ;;  %v113_v11 = vrot.slane %v112_v4, 4  ;;  %v97_v12 = vmul.f32 %v159_v51, %v82_v2 }
  0xad   :  { %v175_v13 = vpop.eup %174  ;;  %v104_v14 = vrot.slane %v103_v7, 4  ;;  %v120_v15 = vsel %vm31_vm1, %v98_v10, 0.0  ;;  %v85_v18 = vmul.f32 %v173_v6, %v240_v16 }
  0xae   :  { %v114_v19 = vadd.f32 %v113_v11, %v112_v4  ;;  %v119_v8 = vsel %vm27_vm0, %v97_v12, 0.0  ;;  %v84_v20 = vmul.f32 %v175_v13, %v245_v17 }
  0xaf   :  { %v105_v21 = vadd.f32 %v104_v14, %v103_v7  ;;  %v121_v22 = vadd.f32 %v120_v15, %v119_v8  ;;  %v100_v23 = vmul.f32 %v159_v51, %v85_v18 }
  0xb0   :  { %v115_v9 = vrot.slane %v114_v19, 2  ;;  %v99_v24 = vmul.f32 %v159_v51, %v84_v20 }
  0xb1   :  { %v106_v25 = vrot.slane %v105_v21, 2  ;;  %v122_v26 = vrot.slane %v121_v22, 4  ;;  %v129_v27 = vsel %vm31_vm1, %v100_v23, 0.0 }
  0xb2   :  { %v116_v28 = vadd.f32 %v115_v9, %v114_v19  ;;  %v128_v29 = vsel %vm27_vm0, %v99_v24, 0.0 }
  0xb3   :  { %v107_v30 = vadd.f32 %v106_v25, %v105_v21  ;;  %v123_v31 = vadd.f32 %v122_v26, %v121_v22  ;;  %v130_v16 = vadd.f32 %v129_v27, %v128_v29 }
  0xb4   :  { %v117_v32 = vrot.slane %v116_v28, 1 }
  0xb5   :  { %v108_v33 = vrot.slane %v107_v30, 1  ;;  %v124_v34 = vrot.slane %v123_v31, 2  ;;  %v131_v35 = vrot.slane %v130_v16, 4 }
  0xb6   :  { %v118_v37 = vadd.f32 %v117_v32, %v116_v28 }
  0xb7   :  { %v125_v17 = vadd.f32 %v124_v34, %v123_v31  ;;  %v132_v36 = vadd.f32 %v131_v35, %v130_v16  ;;  %v109_v38 = vadd.f32 %v108_v33, %v107_v30 }
  0xb8   :  { %v139_v43 = vmul.f32 0.07692308, %v118_v37 }
  0xb9   :  { %v126_v39 = vrot.slane %v125_v17, 1  ;;  %v133_v40 = vrot.slane %v132_v36, 2  ;;  %v138_v44 = vmul.f32 0.07692308, %v109_v38 }
  0xbb   :  { %v127_v41 = vadd.f32 %v126_v39, %v125_v17  ;;  %v134_v42 = vadd.f32 %v133_v40, %v132_v36  ;;  %v147_v48 = vsel %vm146_vm2, %v139_v43, %v138_v44 }
  0xbd   :  { %v135_v45 = vrot.slane %v134_v42, 1  ;;  %v140_v46 = vmul.f32 0.07692308, %v127_v41 }
  0xbf   :  { %v136_v47 = vadd.f32 %v135_v45, %v134_v42  ;;  %v149_v50 = vsel %vm148_vm3, %v140_v46, %v147_v48 }
  0xc1   :  { %v141_v49 = vmul.f32 0.07692308, %v136_v47 }
  0xc3   :  { %v151_v51 = vsel %vm150_vm4, %v141_v49, %v149_v50 }
  0xc4   :  { %154 = vst.msk [vmem:[%s279_s2] sm:$0xf] %vm153_vm5, %v151_v51 }

// kernel: compute_inbatch_contrastive_loss.71
= control target key start
LH: loop header
LB: loop body
LE: loop exit
PB: predicated region body
PF: predicated region fallthrough
CT: control target
= control target key end

     0   :  { %vm18_vm0 = vcmask 123904   ;;  %v133_v6 = vmov 0.0   ;;  %vm134_vm1 = vmmov 0   ;;  %vm32_vm2 = vcmask 130048   ;;  %s167_s1 = inlined_call_operand.vmem [shape: f32[2,16], index: 1, kind: input, shape index: {}]   ;;  %s168_s0 = inlined_call_operand.vmem [shape: f32[2,16], index: 0, kind: input, shape index: {}]   ;;  %s169_s2 = inlined_call_operand.<no memory space> [shape: f32[1], index: 2, kind: input, shape index: {}]   ;;  %s170_s3 = inlined_call_operand.vmem [shape: f32[2,2], index: 3, kind: output, shape index: {}]  }
   0x1   :  { %v16_v0 = vld [vmem:[%s167_s1] sm:$0x3]  ;;  %122 = vmatprep.subr.mxu0 %v133_v6  ;;  %124 = vmatprep.mubr.msk.f32.mxu0 %vm134_vm1, %v133_v6  ;;  %v110_v15 = vstv %s169_s2  ;;  %vm112_vm3 = vcmask 9216  }
   0x2   :  { %v15_v1 = vld [vmem:[%s168_s0] sm:$0x3]  ;;  %v25_v2 = vmul.f32 %v16_v0, %v16_v0 }
   0x3   :  { %v17_v3 = vmul.f32 %v15_v1, %v15_v1 }
   0x4   :  { %v26_v4 = vsel %vm18_vm0, %v25_v2, 0.0 }
   0x5   :  { %27 = vadd.xlane.f32.xlu0 %v26_v4  ;;  %v19_v5 = vsel %vm18_vm0, %v17_v3, 0.0 }
   0x9   :  { %20 = vadd.xlane.f32.xlu0 %v19_v5 }
  0x8e   :  { %v28_v7 = vpop.xlane.xlu0 %27 }
  0x8f   :  { %v29_v8 = vmax.f32 %v28_v7, 1e-24 }
  0x91   :  { %129 = vrsqrt.f32 %v29_v8 }
  0x92   :  { %v21_v9 = vpop.xlane.xlu0 %20 }
  0x93   :  { %v22_v10 = vmax.f32 %v21_v9, 1e-24 }
  0x95   :  { %131 = vrsqrt.f32 %v22_v10 }
  0x9e   :  { %v130_v11 = vpop.eup %129 }
  0x9f   :  { %v31_v12 = vmul.f32 %v130_v11, %v16_v0 }
  0xa1   :  { %123 = vmatpush3.xpose.msk.msra.mxu0 %vm32_vm2, %v31_v12 }
  0xa2   :  { %v132_v13 = vpop.eup %131 }
  0xa3   :  { %v24_v14 = vmul.f32 %v132_v13, %v15_v1 }
  0xa5   :  { %125 = vmatmul.mubr.msk.f32.vlgmr.msra.gmra.mxu0 %vm32_vm2, %v24_v14 }
 0x165   :  { %v105_v16 = vpop.f32.mrf.mxu0 }
 0x166   :  { %v111_v17 = vmul.f32 %v110_v15, %v105_v16 }
 0x167   :  { %v126_v18 = vpop.f32.mrf.mxu0 }
 0x168   :  { %113 = vst.msk [vmem:[%s170_s3] sm:$0x3] %vm112_vm3, %v111_v17 }

</bundles_post_ra>
